<compile_context>
chip_gen: v5e
topology: v5e:2x2
jax: 0.10.0
libtpu: 0.0.40
codegen_flags: <defaults>
</compile_context>

<pallas_src>
import jax
import jax.numpy as jnp
from jax.experimental import pallas as pl
from jax.experimental.pallas import tpu as pltpu

# ---- module hyperparameters (from the PyTorch script) ----
CLASS_NUM = 10
GEN_LAYERS = [256, 512, 1024]
IMG_SIZE = 28
Z_SIZE = 100

IN_FEAT = Z_SIZE + CLASS_NUM          # 110 (true fan-in of layer 1)
IN_PAD = 128                          # lane-aligned K for the first matmul
OUT_FEAT = IMG_SIZE * IMG_SIZE        # 784
OUT_PAD = 896                         # 7*128, lane-dense output stores


def _round_up(a, m):
    return (a + m - 1) // m * m


def _leaky_relu(x, slope=0.2):
    # max(x, slope*x) == LeakyReLU(slope) for 0 < slope < 1; cheaper than compare+select.
    return jnp.maximum(x, slope * x)


def _choose_tiling(B):
    """Padded batch size and batch-tile size.

    - multiples of 16 (bf16 sublane packing)
    - small batches: one tile (minimal padding / single grid step)
    - padded batch >= 512: tiles are multiples of 256 and the grid has >= 2 steps so the
      'parallel' batch axis shards across both TensorCores on v7x.
    """
    bp = _round_up(max(B, 1), 16)
    if bp < 512:
        return bp, bp
    tm = min(1024, _round_up(pl.cdiv(bp, 2), 256))
    bp = _round_up(bp, tm)
    return bp, tm


def generator_kernel(x_ref,
                     w1_ref, b1_ref,
                     w2_ref, b2_ref,
                     w3_ref, b3_ref,
                     w4_ref, b4_ref,
                     out_ref):
    """Full MLP forward for one batch tile: 3x (Linear + LeakyReLU(0.2)) + Linear + Tanh.

    MXU inputs are bf16; accumulation, bias add and activation math are f32; the inter-layer
    buffers and the output store are bf16.
    """
    h = jnp.dot(x_ref[...], w1_ref[...],
                preferred_element_type=jnp.float32) + b1_ref[...]
    h = _leaky_relu(h).astype(jnp.bfloat16)

    h = jnp.dot(h, w2_ref[...],
                preferred_element_type=jnp.float32) + b2_ref[...]
    h = _leaky_relu(h).astype(jnp.bfloat16)

    h = jnp.dot(h, w3_ref[...],
                preferred_element_type=jnp.float32) + b3_ref[...]
    h = _leaky_relu(h).astype(jnp.bfloat16)

    h = jnp.dot(h, w4_ref[...],
                preferred_element_type=jnp.float32) + b4_ref[...]
    out_ref[...] = jnp.tanh(h).astype(jnp.bfloat16)


def init_params(key):
    """Deterministic parameter init (same architecture as the PyTorch module), padded + bf16 weights."""
    dims_in = [IN_FEAT, GEN_LAYERS[0], GEN_LAYERS[1], GEN_LAYERS[2]]
    dims_out = [GEN_LAYERS[0], GEN_LAYERS[1], GEN_LAYERS[2], OUT_FEAT]
    pad_in = [IN_PAD, GEN_LAYERS[0], GEN_LAYERS[1], GEN_LAYERS[2]]
    pad_out = [GEN_LAYERS[0], GEN_LAYERS[1], GEN_LAYERS[2], OUT_PAD]

    keys = jax.random.split(key, 2 * len(dims_in) + 1)
    params = {}
    # Embedding(class_num, class_num) weight, N(0,1) like nn.Embedding default.
    params["emb"] = jax.random.normal(keys[0], (CLASS_NUM, CLASS_NUM), jnp.float32)

    for i, (din, dout, pin, pout) in enumerate(zip(dims_in, dims_out, pad_in, pad_out)):
        bound = 1.0 / float(din) ** 0.5  # nn.Linear default U(-1/sqrt(in), 1/sqrt(in))
        w = jax.random.uniform(keys[1 + 2 * i], (din, dout), jnp.float32, -bound, bound)
        b = jax.random.uniform(keys[2 + 2 * i], (1, dout), jnp.float32, -bound, bound)
        # Zero-pad to lane-aligned shapes; padded rows/cols contribute nothing / are sliced off.
        w = jnp.pad(w, ((0, pin - din), (0, pout - dout)))
        b = jnp.pad(b, ((0, 0), (0, pout - dout)))
        params[f"w{i + 1}"] = w.astype(jnp.bfloat16)   # bf16 weights: half the HBM->VMEM bytes
        params[f"b{i + 1}"] = b                        # biases stay f32 (tiny)
    return params


def generator_forward(params, z, labels):
    """JAX wrapper reproducing Generator.forward semantics."""
    z = z.reshape(-1, Z_SIZE)                          # z.view(-1, z_size)
    c = jnp.take(params["emb"], labels, axis=0)        # self.label_emb(labels)
    x = jnp.concatenate([z, c], axis=1)                # torch.cat([z, c], 1) -> (B, 110)
    B = x.shape[0]

    # Lane-align the feature dim (110 -> 128) and sublane-align / tile the batch dim.
    x = jnp.pad(x, ((0, 0), (0, IN_PAD - x.shape[1])))
    Bp, TM = _choose_tiling(B)
    x = jnp.pad(x, ((0, Bp - B), (0, 0))).astype(jnp.bfloat16)

    grid = (Bp // TM,)

    # Weights/biases: constant index_map (loaded into VMEM once, resident across batch tiles)
    # + single buffering (no wasted double-buffer VMEM for constant blocks).
    def const_map(i):
        return (0, 0)

    def resident(shape):
        return pl.BlockSpec(shape, const_map, pipeline_mode=pl.Buffered(1))

    in_specs = [
        pl.BlockSpec((TM, IN_PAD), lambda i: (i, 0)),      # x tile
        resident((IN_PAD, GEN_LAYERS[0])),                 # w1
        resident((1, GEN_LAYERS[0])),                      # b1
        resident((GEN_LAYERS[0], GEN_LAYERS[1])),          # w2
        resident((1, GEN_LAYERS[1])),                      # b2
        resident((GEN_LAYERS[1], GEN_LAYERS[2])),          # w3
        resident((1, GEN_LAYERS[2])),                      # b3
        resident((GEN_LAYERS[2], OUT_PAD)),                # w4
        resident((1, OUT_PAD)),                            # b4
    ]
    out_specs = pl.BlockSpec((TM, OUT_PAD), lambda i: (i, 0))

    out_flat = pl.pallas_call(
        generator_kernel,
        out_shape=jax.ShapeDtypeStruct((Bp, OUT_PAD), jnp.bfloat16),  # bf16 writeback
        grid=grid,
        in_specs=in_specs,
        out_specs=out_specs,
        compiler_params=pltpu.CompilerParams(
            dimension_semantics=("parallel",),   # batch tiles are independent (2 TCs on v7x)
            vmem_limit_bytes=32 << 20,           # ~3 MiB bf16 weights + activations; ample headroom
        ),
    )(x, params["w1"], params["b1"],
      params["w2"], params["b2"],
      params["w3"], params["b3"],
      params["w4"], params["b4"])

    # Drop batch/feature padding; out.view(-1, img_size, img_size); f32 for consumers.
    return out_flat[:B, :OUT_FEAT].astype(jnp.float32).reshape(-1, IMG_SIZE, IMG_SIZE)


def generator_reference(params, z, labels):
    """Pure-JAX reference mirroring the kernel's precision (bf16 MXU inputs, f32 accumulate,
    bf16 inter-layer buffers, bf16 output)."""
    z = z.reshape(-1, Z_SIZE)
    c = jnp.take(params["emb"], labels, axis=0)
    h = jnp.concatenate([z, c], axis=1)
    h = jnp.pad(h, ((0, 0), (0, IN_PAD - h.shape[1]))).astype(jnp.bfloat16)

    def lin(a, w, b):
        return jnp.dot(a, w, preferred_element_type=jnp.float32) + b

    h = _leaky_relu(lin(h, params["w1"], params["b1"])).astype(jnp.bfloat16)
    h = _leaky_relu(lin(h, params["w2"], params["b2"])).astype(jnp.bfloat16)
    h = _leaky_relu(lin(h, params["w3"], params["b3"])).astype(jnp.bfloat16)
    h = jnp.tanh(lin(h, params["w4"], params["b4"])).astype(jnp.bfloat16)
    return h[:, :OUT_FEAT].astype(jnp.float32).reshape(-1, IMG_SIZE, IMG_SIZE)


if __name__ == "__main__":
    key = jax.random.PRNGKey(0)
    k_params, k_z, k_lbl = jax.random.split(key, 3)

    params = init_params(k_params)

    B = 8
    z = jax.random.normal(k_z, (B, Z_SIZE), jnp.float32)
    labels = jax.random.randint(k_lbl, (B,), 0, CLASS_NUM, jnp.int32)

    out = jax.block_until_ready(generator_forward(params, z, labels))
    ref = jax.block_until_ready(generator_reference(params, z, labels))

    assert out.shape == (B, IMG_SIZE, IMG_SIZE), out.shape
    # bf16 output -> ~1 ulp near |tanh| ~= 1 is ~8e-3; allow a small margin over that.
    max_err = float(jnp.max(jnp.abs(out - ref)))
    assert max_err < 2e-2, max_err

    print("KERNEL_OK")
</pallas_src>

<mosaic_0001>
module attributes {stable_mosaic.version = 11 : i64} {
  func.func @generator_kernel(%arg0: i32, %arg1: memref<16x128xbf16, #tpu.memory_space<vmem>>, %arg2: memref<128x256xbf16, #tpu.memory_space<vmem>>, %arg3: memref<1x256xf32, #tpu.memory_space<vmem>>, %arg4: memref<256x512xbf16, #tpu.memory_space<vmem>>, %arg5: memref<1x512xf32, #tpu.memory_space<vmem>>, %arg6: memref<512x1024xbf16, #tpu.memory_space<vmem>>, %arg7: memref<1x1024xf32, #tpu.memory_space<vmem>>, %arg8: memref<1024x896xbf16, #tpu.memory_space<vmem>>, %arg9: memref<1x896xf32, #tpu.memory_space<vmem>>, %arg10: memref<16x896xbf16, #tpu.memory_space<vmem>>) attributes {dimension_semantics = [#tpu.dimension_semantics<parallel>], iteration_bounds = array<i64: 1>, scalar_prefetch = 0 : i64, scratch_operands = 0 : i64, tpu.core_type = #tpu.core_type<tc>, window_params = [{transform_indices = @transform_0, window_bounds = array<i64: 16, 128>}, {pipeline_mode = #tpu.pipeline_mode<synchronous>, transform_indices = @transform_1, window_bounds = array<i64: 128, 256>}, {pipeline_mode = #tpu.pipeline_mode<synchronous>, transform_indices = @transform_2, window_bounds = array<i64: 1, 256>}, {pipeline_mode = #tpu.pipeline_mode<synchronous>, transform_indices = @transform_3, window_bounds = array<i64: 256, 512>}, {pipeline_mode = #tpu.pipeline_mode<synchronous>, transform_indices = @transform_4, window_bounds = array<i64: 1, 512>}, {pipeline_mode = #tpu.pipeline_mode<synchronous>, transform_indices = @transform_5, window_bounds = array<i64: 512, 1024>}, {pipeline_mode = #tpu.pipeline_mode<synchronous>, transform_indices = @transform_6, window_bounds = array<i64: 1, 1024>}, {pipeline_mode = #tpu.pipeline_mode<synchronous>, transform_indices = @transform_7, window_bounds = array<i64: 1024, 896>}, {pipeline_mode = #tpu.pipeline_mode<synchronous>, transform_indices = @transform_8, window_bounds = array<i64: 1, 896>}, {transform_indices = @transform_9, window_bounds = array<i64: 16, 896>}]} {
    %c0 = arith.constant 0 : index
    %c0_0 = arith.constant 0 : index
    %0 = vector.load %arg1[%c0, %c0_0] : memref<16x128xbf16, #tpu.memory_space<vmem>>, vector<16x128xbf16>
    %c0_1 = arith.constant 0 : index
    %c0_2 = arith.constant 0 : index
    %1 = vector.load %arg2[%c0_1, %c0_2] : memref<128x256xbf16, #tpu.memory_space<vmem>>, vector<128x256xbf16>
    %cst = arith.constant dense<0.000000e+00> : vector<16x256xf32>
    %2 = tpu.matmul %0, %1, %cst {dimension_numbers = #tpu.dot_dimension_numbers<[1], [0], [0], [1], [0, 0, 1, 1], [], []>} : vector<16x128xbf16>, vector<128x256xbf16>, vector<16x256xf32> -> vector<16x256xf32>
    %c0_3 = arith.constant 0 : index
    %c0_4 = arith.constant 0 : index
    %3 = vector.load %arg3[%c0_3, %c0_4] : memref<1x256xf32, #tpu.memory_space<vmem>>, vector<1x256xf32>
    %4 = vector.broadcast %3 : vector<1x256xf32> to vector<16x256xf32>
    %5 = arith.addf %2, %4 : vector<16x256xf32>
    %cst_5 = arith.constant 2.000000e-01 : f32
    %6 = vector.broadcast %cst_5 : f32 to vector<16x256xf32>
    %7 = arith.mulf %6, %5 : vector<16x256xf32>
    %8 = arith.maximumf %5, %7 : vector<16x256xf32>
    %9 = arith.truncf %8 : vector<16x256xf32> to vector<16x256xbf16>
    %c0_6 = arith.constant 0 : index
    %c0_7 = arith.constant 0 : index
    %10 = vector.load %arg4[%c0_6, %c0_7] : memref<256x512xbf16, #tpu.memory_space<vmem>>, vector<256x512xbf16>
    %cst_8 = arith.constant dense<0.000000e+00> : vector<16x512xf32>
    %11 = tpu.matmul %9, %10, %cst_8 {dimension_numbers = #tpu.dot_dimension_numbers<[1], [0], [0], [1], [0, 0, 1, 1], [], []>} : vector<16x256xbf16>, vector<256x512xbf16>, vector<16x512xf32> -> vector<16x512xf32>
    %c0_9 = arith.constant 0 : index
    %c0_10 = arith.constant 0 : index
    %12 = vector.load %arg5[%c0_9, %c0_10] : memref<1x512xf32, #tpu.memory_space<vmem>>, vector<1x512xf32>
    %13 = vector.broadcast %12 : vector<1x512xf32> to vector<16x512xf32>
    %14 = arith.addf %11, %13 : vector<16x512xf32>
    %cst_11 = arith.constant 2.000000e-01 : f32
    %15 = vector.broadcast %cst_11 : f32 to vector<16x512xf32>
    %16 = arith.mulf %15, %14 : vector<16x512xf32>
    %17 = arith.maximumf %14, %16 : vector<16x512xf32>
    %18 = arith.truncf %17 : vector<16x512xf32> to vector<16x512xbf16>
    %c0_12 = arith.constant 0 : index
    %c0_13 = arith.constant 0 : index
    %19 = vector.load %arg6[%c0_12, %c0_13] : memref<512x1024xbf16, #tpu.memory_space<vmem>>, vector<512x1024xbf16>
    %cst_14 = arith.constant dense<0.000000e+00> : vector<16x1024xf32>
    %20 = tpu.matmul %18, %19, %cst_14 {dimension_numbers = #tpu.dot_dimension_numbers<[1], [0], [0], [1], [0, 0, 1, 1], [], []>} : vector<16x512xbf16>, vector<512x1024xbf16>, vector<16x1024xf32> -> vector<16x1024xf32>
    %c0_15 = arith.constant 0 : index
    %c0_16 = arith.constant 0 : index
    %21 = vector.load %arg7[%c0_15, %c0_16] : memref<1x1024xf32, #tpu.memory_space<vmem>>, vector<1x1024xf32>
    %22 = vector.broadcast %21 : vector<1x1024xf32> to vector<16x1024xf32>
    %23 = arith.addf %20, %22 : vector<16x1024xf32>
    %cst_17 = arith.constant 2.000000e-01 : f32
    %24 = vector.broadcast %cst_17 : f32 to vector<16x1024xf32>
    %25 = arith.mulf %24, %23 : vector<16x1024xf32>
    %26 = arith.maximumf %23, %25 : vector<16x1024xf32>
    %27 = arith.truncf %26 : vector<16x1024xf32> to vector<16x1024xbf16>
    %c0_18 = arith.constant 0 : index
    %c0_19 = arith.constant 0 : index
    %28 = vector.load %arg8[%c0_18, %c0_19] : memref<1024x896xbf16, #tpu.memory_space<vmem>>, vector<1024x896xbf16>
    %cst_20 = arith.constant dense<0.000000e+00> : vector<16x896xf32>
    %29 = tpu.matmul %27, %28, %cst_20 {dimension_numbers = #tpu.dot_dimension_numbers<[1], [0], [0], [1], [0, 0, 1, 1], [], []>} : vector<16x1024xbf16>, vector<1024x896xbf16>, vector<16x896xf32> -> vector<16x896xf32>
    %c0_21 = arith.constant 0 : index
    %c0_22 = arith.constant 0 : index
    %30 = vector.load %arg9[%c0_21, %c0_22] : memref<1x896xf32, #tpu.memory_space<vmem>>, vector<1x896xf32>
    %31 = vector.broadcast %30 : vector<1x896xf32> to vector<16x896xf32>
    %32 = arith.addf %29, %31 : vector<16x896xf32>
    %33 = math.tanh %32 : vector<16x896xf32>
    %34 = arith.truncf %33 : vector<16x896xf32> to vector<16x896xbf16>
    %c0_23 = arith.constant 0 : index
    %c0_24 = arith.constant 0 : index
    %35 = vector.load %arg10[%c0_23, %c0_24] : memref<16x896xbf16, #tpu.memory_space<vmem>>, vector<16x896xbf16>
    tpu.vector_store %arg10[%c0_23, %c0_24], %34 {strides = array<i32>} : memref<16x896xbf16, #tpu.memory_space<vmem>>, vector<16x896xbf16>,
    return
  }
  func.func @transform_0(%arg0: i32) -> (i32, i32) {
    %c0_i32 = arith.constant 0 : i32
    %c0_i32_0 = arith.constant 0 : i32
    return %arg0, %c0_i32 : i32, i32
  }
  func.func @transform_1(%arg0: i32) -> (i32, i32) {
    %c0_i32 = arith.constant 0 : i32
    %c0_i32_0 = arith.constant 0 : i32
    %c0_i32_1 = arith.constant 0 : i32
    return %c0_i32, %c0_i32_0 : i32, i32
  }
  func.func @transform_2(%arg0: i32) -> (i32, i32) {
    %c0_i32 = arith.constant 0 : i32
    %c0_i32_0 = arith.constant 0 : i32
    %c0_i32_1 = arith.constant 0 : i32
    return %c0_i32, %c0_i32_0 : i32, i32
  }
  func.func @transform_3(%arg0: i32) -> (i32, i32) {
    %c0_i32 = arith.constant 0 : i32
    %c0_i32_0 = arith.constant 0 : i32
    %c0_i32_1 = arith.constant 0 : i32
    return %c0_i32, %c0_i32_0 : i32, i32
  }
  func.func @transform_4(%arg0: i32) -> (i32, i32) {
    %c0_i32 = arith.constant 0 : i32
    %c0_i32_0 = arith.constant 0 : i32
    %c0_i32_1 = arith.constant 0 : i32
    return %c0_i32, %c0_i32_0 : i32, i32
  }
  func.func @transform_5(%arg0: i32) -> (i32, i32) {
    %c0_i32 = arith.constant 0 : i32
    %c0_i32_0 = arith.constant 0 : i32
    %c0_i32_1 = arith.constant 0 : i32
    return %c0_i32, %c0_i32_0 : i32, i32
  }
  func.func @transform_6(%arg0: i32) -> (i32, i32) {
    %c0_i32 = arith.constant 0 : i32
    %c0_i32_0 = arith.constant 0 : i32
    %c0_i32_1 = arith.constant 0 : i32
    return %c0_i32, %c0_i32_0 : i32, i32
  }
  func.func @transform_7(%arg0: i32) -> (i32, i32) {
    %c0_i32 = arith.constant 0 : i32
    %c0_i32_0 = arith.constant 0 : i32
    %c0_i32_1 = arith.constant 0 : i32
    return %c0_i32, %c0_i32_0 : i32, i32
  }
  func.func @transform_8(%arg0: i32) -> (i32, i32) {
    %c0_i32 = arith.constant 0 : i32
    %c0_i32_0 = arith.constant 0 : i32
    %c0_i32_1 = arith.constant 0 : i32
    return %c0_i32, %c0_i32_0 : i32, i32
  }
  func.func @transform_9(%arg0: i32) -> (i32, i32) {
    %c0_i32 = arith.constant 0 : i32
    %c0_i32_0 = arith.constant 0 : i32
    return %arg0, %c0_i32 : i32, i32
  }
}

</mosaic_0001>

<bundles_post_ra>
// kernel: tpu_custom_call.1
= control target key start
LH: loop header
LB: loop body
LE: loop exit
PB: predicated region body
PF: predicated region fallthrough
CT: control target
= control target key end

     0   :  { %14 = vsyncpa [#allocation3], 0  ;;  %s11240_s0 = inlined_call_operand.hbm [shape: bf16[16,128], index: 0, kind: input, shape index: {}]   ;;  %s11241_s1 = inlined_call_operand.hbm [shape: bf16[128,256], index: 1, kind: input, shape index: {}]   ;;  %s11242_s2 = inlined_call_operand.hbm [shape: f32[1,256], index: 2, kind: input, shape index: {}]   ;;  %s11243_s3 = inlined_call_operand.hbm [shape: bf16[256,512], index: 3, kind: input, shape index: {}]   ;;  %s11244_s4 = inlined_call_operand.hbm [shape: f32[1,512], index: 4, kind: input, shape index: {}]   ;;  %s11245_s5 = inlined_call_operand.hbm [shape: bf16[512,1024], index: 5, kind: input, shape index: {}]   ;;  %s11246_s6 = inlined_call_operand.hbm [shape: f32[1,1024], index: 6, kind: input, shape index: {}]   ;;  %s11247_s7 = inlined_call_operand.hbm [shape: bf16[1024,896], index: 7, kind: input, shape index: {}]   ;;  %s11248_s8 = inlined_call_operand.hbm [shape: f32[1,896], index: 8, kind: input, shape index: {}]   ;;  %s11249_s9 = inlined_call_operand.hbm [shape: bf16[16,896], index: 9, kind: output, shape index: {}]  }
   0x1   :  { %15 = vsyncpa [#allocation6], 0 }
   0x2   :  { %16 = vsyncpa [#allocation9], 0 }
   0x3   :  { %17 = vsyncpa [#allocation12], 0 }
   0x4   :  { %18 = vsyncpa [#allocation15], 0  ;;  %s37_s11 = sshll.u32 %s11241_s1, 4  ;;  %s38_s11 = int_to_ptr.hbm [resolvable:$true] %s37_s11 }
   0x5   :  { %19 = vsyncpa [#allocation4], 0  ;;  %s10777_s12 = smov [#allocation5]   ;;  %s61_s16 = sshll.u32 %s11243_s3, 4  ;;  %s62_s16 = int_to_ptr.hbm [resolvable:$true] %s61_s16 }
   0x6   :  { %s39_s13 = sshll.u32 %s10777_s12, 4  ;;  %s10778_s17 = smov 128   ;;  %s40_s13 = int_to_ptr.vmem [resolvable:$true] %s39_s13 }
   0x7   :  { %s10779_s18 = smov 8   ;;  %s10780_s19 = smov [#allocation8]  }
   0x8   :  { %45 = dma.hbm_to_vmem [thread:$0]  %s38_s11, 2048, %s40_s13, [#allocation6], %s10778_s17, %s10778_s17, %s10779_s18  }
   0x9   :  { %s63_s20 = sshll.u32 %s10780_s19, 4  ;;  %s10781_s21 = smov 256   ;;  %s64_s20 = int_to_ptr.vmem [resolvable:$true] %s63_s20 }
   0xa   :  { %s10782_s22 = smov 16   ;;  %s85_s24 = sshll.u32 %s11245_s5, 4  ;;  %s86_s24 = int_to_ptr.hbm [resolvable:$true] %s85_s24 }
   0xb   :  { %69 = dma.hbm_to_vmem [thread:$0]  %s62_s16, 8192, %s64_s20, [#allocation9], %s10781_s21, %s10781_s21, %s10782_s22  }
   0xc   :  { %s10783_s25 = smov [#allocation11]   ;;  %s109_s28 = sshll.u32 %s11247_s7, 4  ;;  %s110_s28 = int_to_ptr.hbm [resolvable:$true] %s109_s28 }
   0xd   :  { %s87_s26 = sshll.u32 %s10783_s25, 4  ;;  %s10784_s29 = smov 512   ;;  %s88_s26 = int_to_ptr.vmem [resolvable:$true] %s87_s26 }
   0xe   :  { %s10785_s30 = smov 32   ;;  %s10786_s10 = smov [#allocation14]  }
   0xf   :  { %93 = dma.hbm_to_vmem [thread:$0]  %s86_s24, 32768, %s88_s26, [#allocation12], %s10784_s29, %s10784_s29, %s10785_s30  }
  0x10   :  { %s111_s11 = sshll.u32 %s10786_s10, 4  ;;  %s10787_s12 = smov 448   ;;  %s112_s11 = int_to_ptr.vmem [resolvable:$true] %s111_s11 }
  0x11   :  { %s10788_s13 = smov 28   ;;  %s24_s15 = sshll.u32 %s11240_s0, 4  ;;  %s25_s15 = int_to_ptr.hbm [resolvable:$true] %s24_s15 }
  0x12   :  { %117 = dma.hbm_to_vmem [thread:$0]  %s110_s28, 57344, %s112_s11, [#allocation15], %s10787_s12, %s10787_s12, %s10788_s13  }
  0x13   :  { %s10789_s16 = smov [#allocation2]   ;;  %s51_s19 = sshll.u32 %s11242_s2, 4  ;;  %s52_s19 = int_to_ptr.hbm [resolvable:$true] %s51_s19 }
  0x14   :  { %s26_s7 = sshll.u32 %s10789_s16, 4  ;;  %s10790_s20 = smov 64   ;;  %s27_s7 = int_to_ptr.vmem [resolvable:$true] %s26_s7 }
  0x15   :  { %s10791_s21 = smov 4   ;;  %s10792_s22 = smov [#allocation7]  }
  0x16   :  { %32 = dma.hbm_to_vmem [thread:$0]  %s25_s15, 128, %s27_s7, [#allocation3], %s10790_s20, %s10790_s20, %s10791_s21  }
  0x17   :  { %s53_s1 = sshll.u32 %s10792_s22, 4  ;;  %s75_s25 = sshll.u32 %s11244_s4, 4  ;;  %s54_s1 = int_to_ptr.vmem [resolvable:$true] %s53_s1  ;;  %s76_s25 = int_to_ptr.hbm [resolvable:$true] %s75_s25 }
  0x18   :  { %56 = dma.hbm_to_vmem [thread:$0]  %s52_s19, 32, %s54_s1, [#allocation6]  }
  0x19   :  { %s99_s27 = sshll.u32 %s11246_s6, 4  ;;  %s10793_s3 = smov [#allocation10]   ;;  %s100_s27 = int_to_ptr.hbm [resolvable:$true] %s99_s27 }
  0x1a   :  { %s77_s28 = sshll.u32 %s10793_s3, 4  ;;  %s10794_s2 = smov [#allocation13]   ;;  %s78_s28 = int_to_ptr.vmem [resolvable:$true] %s77_s28 }
  0x1b   :  { %80 = dma.hbm_to_vmem [thread:$0]  %s76_s25, 64, %s78_s28, [#allocation9]  }
  0x1c   :  { %s101_s29 = sshll.u32 %s10794_s2, 4  ;;  %s123_s11 = sshll.u32 %s11248_s8, 4  ;;  %s102_s29 = int_to_ptr.vmem [resolvable:$true] %s101_s29  ;;  %s124_s11 = int_to_ptr.hbm [resolvable:$true] %s123_s11 }
  0x1d   :  { %104 = dma.hbm_to_vmem [thread:$0]  %s100_s27, 128, %s102_s29, [#allocation12]  }
  0x1e   :  { %s10795_s4 = smov [#allocation16]  }
  0x1f   :  { %s125_s5 = sshll.u32 %s10795_s4, 4  ;;  %s126_s5 = int_to_ptr.vmem [resolvable:$true] %s125_s5 }
  0x20   :  { %128 = dma.hbm_to_vmem [thread:$0]  %s124_s11, 112, %s126_s5, [#allocation15]  }
  0x21   :  { %10765 = dma.done.wait [#allocation3], 128  }
  0x22   :  { %10766 = vsyncadd [#allocation3], 4294967168 }
  0x23   :  { %10767 = dma.done.wait [#allocation6], 2080  }
  0x24   :  { %10768 = vsyncadd [#allocation6], 4294965216 }
  0x25   :  { %10769 = dma.done.wait [#allocation9], 8256  }
  0x26   :  { %10770 = vsyncadd [#allocation9], 4294959040 }
  0x27   :  { %10771 = dma.done.wait [#allocation12], 32896  }
  0x28   :  { %10772 = vsyncadd [#allocation12], 4294934400 }
  0x29   :  { %10773 = dma.done.wait [#allocation15], 57456  }
  0x2a   :  { %10774 = vsyncadd [#allocation15], 4294909840  ;;  %v6612_v0 = vld [vmem:[#allocation5 + $0x70] sm:$0xf]  ;;  %v9706_v1 = vld [vmem:[#allocation5 + $0x74] sm:$0xf0] }
  0x2b   :  { %v9705_v2 = vld [vmem:[#allocation5 + $0x74] sm:$0xf]  ;;  %v6613_v3 = vor.u32 %v9706_v1, %v6612_v0  ;;  %v6614_v4 = vld [vmem:[#allocation5 + $0x78] sm:$0xf0]  ;;  %v6604_v5 = vld [vmem:[#allocation5 + $0x60] sm:$0xf] }
  0x2c   :  { %v9704_v6 = vld [vmem:[#allocation5 + $0x64] sm:$0xf0]  ;;  %v6617_v7 = vor.u32 %v9705_v2, %v6614_v4  ;;  %v9703_v8 = vld [vmem:[#allocation5 + $0x64] sm:$0xf]  ;;  %v6606_v9 = vld [vmem:[#allocation5 + $0x68] sm:$0xf0] }
  0x2d   :  { %275 = vmatpush.bf16.msra.mxu0 %v6613_v3  ;;  %v6605_v10 = vor.u32 %v9704_v6, %v6604_v5  ;;  %v6609_v11 = vor.u32 %v9703_v8, %v6606_v9  ;;  %v6596_v12 = vld [vmem:[#allocation5 + $0x50] sm:$0xf]  ;;  %v9702_v13 = vld [vmem:[#allocation5 + $0x54] sm:$0xf0]  ;;  %v9701_v14 = vld [vmem:[#allocation5 + $0x54] sm:$0xf] }
  0x2e   :  { %289 = vmatpush.bf16.msra.mxu1 %v6617_v7  ;;  %v6598_v15 = vld [vmem:[#allocation5 + $0x58] sm:$0xf0]  ;;  %v6597_v16 = vor.u32 %v9702_v13, %v6596_v12  ;;  %v6588_v18 = vld [vmem:[#allocation5 + $0x40] sm:$0xf]  ;;  %v9700_v19 = vld [vmem:[#allocation5 + $0x44] sm:$0xf0] }
  0x2f   :  { %v6601_v17 = vor.u32 %v9701_v14, %v6598_v15  ;;  %v9699_v20 = vld [vmem:[#allocation5 + $0x44] sm:$0xf]  ;;  %v6590_v21 = vld [vmem:[#allocation5 + $0x48] sm:$0xf0]  ;;  %v6589_v22 = vor.u32 %v9700_v19, %v6588_v18  ;;  %v9737_v24 = vld [vmem:[#allocation8 + $0xec] sm:$0xf0] }
  0x30   :  { %v6732_v23 = vld [vmem:[#allocation8 + $0xe0] sm:$0xf]  ;;  %v6593_v26 = vor.u32 %v9699_v20, %v6590_v21  ;;  %v6580_v27 = vld [vmem:[#allocation5 + $0x30] sm:$0xf]  ;;  %v9698_v28 = vld [vmem:[#allocation5 + $0x34] sm:$0xf0] }
  0x31   :  { %276 = vmatpush.bf16.msra.mxu0 %v6605_v10  ;;  %v6860_v25 = vld [vmem:[#allocation8 + $0x1e0] sm:$0xf]  ;;  %v6733_v29 = vor.u32 %v9737_v24, %v6732_v23  ;;  %v9769_v30 = vld [vmem:[#allocation8 + $0x1ec] sm:$0xf0]  ;;  %v6582_v32 = vld [vmem:[#allocation5 + $0x38] sm:$0xf0]  ;;  %v6581_v38 = vor.u32 %v9698_v28, %v6580_v27 }
  0x32   :  { %290 = vmatpush.bf16.msra.mxu1 %v6609_v11  ;;  %v9697_v31 = vld [vmem:[#allocation5 + $0x34] sm:$0xf]  ;;  %v6861_v33 = vor.u32 %v9769_v30, %v6860_v25  ;;  %v6716_v34 = vld [vmem:[#allocation8 + $0xc0] sm:$0xf]  ;;  %v9696_v40 = vld [vmem:[#allocation5 + $0x24] sm:$0xf0] }
  0x33   :  { %707 = vmatpush.bf16.msra.mxu2 %v6733_v29  ;;  %v9733_v35 = vld [vmem:[#allocation8 + $0xcc] sm:$0xf0]  ;;  %v6844_v36 = vld [vmem:[#allocation8 + $0x1c0] sm:$0xf]  ;;  %v6585_v43 = vor.u32 %v9697_v31, %v6582_v32  ;;  %v6574_v47 = vld [vmem:[#allocation5 + $0x28] sm:$0xf0] }
  0x34   :  { %v9765_v37 = vld [vmem:[#allocation8 + $0x1cc] sm:$0xf0]  ;;  %v6572_v39 = vld [vmem:[#allocation5 + $0x20] sm:$0xf]  ;;  %721 = vmatpush.bf16.msra.mxu3 %v6861_v33  ;;  %v6717_v41 = vor.u32 %v9733_v35, %v6716_v34  ;;  %v9695_v44 = vld [vmem:[#allocation5 + $0x24] sm:$0xf] }
  0x35   :  { %277 = vmatpush.bf16.msra.mxu0 %v6597_v16  ;;  %v6845_v42 = vor.u32 %v9765_v37, %v6844_v36  ;;  %v6700_v45 = vld [vmem:[#allocation8 + $0xa0] sm:$0xf]  ;;  %v9729_v46 = vld [vmem:[#allocation8 + $0xac] sm:$0xf0]  ;;  %v6573_v51 = vor.u32 %v9696_v40, %v6572_v39  ;;  %v6577_v56 = vor.u32 %v9695_v44, %v6574_v47  ;;  %v9694_v57 = vld [vmem:[#allocation5 + $0x14] sm:$0xf0] }
  0x36   :  { %291 = vmatpush.bf16.msra.mxu1 %v6601_v17  ;;  %v6828_v48 = vld [vmem:[#allocation8 + $0x1a0] sm:$0xf]  ;;  %v9761_v49 = vld [vmem:[#allocation8 + $0x1ac] sm:$0xf0]  ;;  %v6701_v50 = vor.u32 %v9729_v46, %v6700_v45  ;;  %v6566_v61 = vld [vmem:[#allocation5 + $0x18] sm:$0xf0] }
  0x37   :  { %708 = vmatpush.bf16.msra.mxu2 %v6717_v41  ;;  %v6564_v52 = vld [vmem:[#allocation5 + $0x10] sm:$0xf]  ;;  %v6829_v53 = vor.u32 %v9761_v49, %v6828_v48  ;;  %v6684_v54 = vld [vmem:[#allocation8 + $0x80] sm:$0xf]  ;;  %v9693_v60 = vld [vmem:[#allocation5 + $0x14] sm:$0xf] }
  0x38   :  { %722 = vmatpush.bf16.msra.mxu3 %v6845_v42  ;;  %v9725_v55 = vld [vmem:[#allocation8 + $0x8c] sm:$0xf0]  ;;  %v6812_v58 = vld [vmem:[#allocation8 + $0x180] sm:$0xf]  ;;  %v6565_v0 = vor.u32 %v9694_v57, %v6564_v52  ;;  %v9692_v1 = vld [vmem:[#allocation5 + $0x4] sm:$0xf0]  ;;  %v6569_v5 = vor.u32 %v9693_v60, %v6566_v61 }
  0x39   :  { %278 = vmatpush.bf16.msra.mxu0 %v6589_v22  ;;  %v9757_v59 = vld [vmem:[#allocation8 + $0x18c] sm:$0xf0]  ;;  %v6556_v62 = vld [vmem:[#allocation5] sm:$0xf]  ;;  %v6685_v63 = vor.u32 %v9725_v55, %v6684_v54  ;;  %v9691_v6 = vld [vmem:[#allocation5 + $0x4] sm:$0xf] }
  0x3a   :  { %292 = vmatpush.bf16.msra.mxu1 %v6593_v26  ;;  %v6813_v2 = vor.u32 %v9757_v59, %v6812_v58  ;;  %v6668_v3 = vld [vmem:[#allocation8 + $0x60] sm:$0xf]  ;;  %v9721_v4 = vld [vmem:[#allocation8 + $0x6c] sm:$0xf0]  ;;  %v6558_v9 = vld [vmem:[#allocation5 + $0x8] sm:$0xf0]  ;;  %v6557_v15 = vor.u32 %v9692_v1, %v6556_v62 }
  0x3b   :  { %709 = vmatpush.bf16.msra.mxu2 %v6701_v50  ;;  %v6796_v7 = vld [vmem:[#allocation8 + $0x160] sm:$0xf]  ;;  %v9753_v8 = vld [vmem:[#allocation8 + $0x16c] sm:$0xf0]  ;;  %v9735_v10 = vld [vmem:[#allocation8 + $0xe4] sm:$0xf]  ;;  %v6669_v14 = vor.u32 %v9721_v4, %v6668_v3  ;;  %v6561_v19 = vor.u32 %v9691_v6, %v6558_v9 }
  0x3c   :  { %723 = vmatpush.bf16.msra.mxu3 %v6829_v53  ;;  %v6734_v11 = vld [vmem:[#allocation8 + $0xf0] sm:$0xf0]  ;;  %v9767_v12 = vld [vmem:[#allocation8 + $0x1e4] sm:$0xf]  ;;  %v6797_v16 = vor.u32 %v9753_v8, %v6796_v7  ;;  %v6652_v17 = vld [vmem:[#allocation8 + $0x40] sm:$0xf] }
  0x3d   :  { %279 = vmatpush.bf16.msra.mxu0 %v6581_v38  ;;  %v6862_v13 = vld [vmem:[#allocation8 + $0x1f0] sm:$0xf0]  ;;  %v9717_v18 = vld [vmem:[#allocation8 + $0x4c] sm:$0xf0]  ;;  %v6737_v20 = vor.u32 %v9735_v10, %v6734_v11  ;;  %v6780_v21 = vld [vmem:[#allocation8 + $0x140] sm:$0xf] }
  0x3e   :  { %293 = vmatpush.bf16.msra.mxu1 %v6585_v43  ;;  %v9749_v22 = vld [vmem:[#allocation8 + $0x14c] sm:$0xf0]  ;;  %v6865_v23 = vor.u32 %v9767_v12, %v6862_v13  ;;  %v9731_v24 = vld [vmem:[#allocation8 + $0xc4] sm:$0xf]  ;;  %v6718_v25 = vld [vmem:[#allocation8 + $0xd0] sm:$0xf0]  ;;  %v6653_v29 = vor.u32 %v9717_v18, %v6652_v17 }
  0x3f   :  { %710 = vmatpush.bf16.msra.mxu2 %v6685_v63  ;;  %v9690_v26 = vld [vmem:[#allocation2] sm:$0xff]  ;;  %v9763_v27 = vld [vmem:[#allocation8 + $0x1c4] sm:$0xf]  ;;  %v6781_v30 = vor.u32 %v9749_v22, %v6780_v21  ;;  %v6636_v31 = vld [vmem:[#allocation8 + $0x20] sm:$0xf]  ;;  %v6721_v33 = vor.u32 %v9731_v24, %v6718_v25  ;;  %s10796_s6 = smov [#allocation17]  }
  0x40   :  { %724 = vmatpush.bf16.msra.mxu3 %v6813_v2  ;;  %v6846_v28 = vld [vmem:[#allocation8 + $0x1d0] sm:$0xf0]  ;;  %v9713_v32 = vld [vmem:[#allocation8 + $0x2c] sm:$0xf0]  ;;  %v6764_v34 = vld [vmem:[#allocation8 + $0x120] sm:$0xf] }
  0x41   :  { %280 = vmatpush.bf16.msra.mxu0 %v6573_v51  ;;  %v9745_v35 = vld [vmem:[#allocation8 + $0x12c] sm:$0xf0]  ;;  %v6849_v36 = vor.u32 %v9763_v27, %v6846_v28  ;;  %v9727_v37 = vld [vmem:[#allocation8 + $0xa4] sm:$0xf]  ;;  %v6702_v38 = vld [vmem:[#allocation8 + $0xb0] sm:$0xf0]  ;;  %v6637_v41 = vor.u32 %v9713_v32, %v6636_v31 }
  0x42   :  { %294 = vmatpush.bf16.msra.mxu1 %v6577_v56  ;;  %v9759_v39 = vld [vmem:[#allocation8 + $0x1a4] sm:$0xf]  ;;  %v6830_v40 = vld [vmem:[#allocation8 + $0x1b0] sm:$0xf0]  ;;  %v6765_v42 = vor.u32 %v9745_v35, %v6764_v34  ;;  %v6705_v43 = vor.u32 %v9727_v37, %v6702_v38  ;;  %v9709_v6 = vld [vmem:[#allocation8 + $0xc] sm:$0xf0] }
  0x43   :  { %711 = vmatpush.bf16.msra.mxu2 %v6669_v14  ;;  %v6833_v44 = vor.u32 %v9759_v39, %v6830_v40  ;;  %v9723_v45 = vld [vmem:[#allocation8 + $0x84] sm:$0xf]  ;;  %v6686_v46 = vld [vmem:[#allocation8 + $0x90] sm:$0xf0]  ;;  %v6748_v7 = vld [vmem:[#allocation8 + $0x100] sm:$0xf] }
  0x44   :  { %725 = vmatpush.bf16.msra.mxu3 %v6797_v16  ;;  %v9755_v47 = vld [vmem:[#allocation8 + $0x184] sm:$0xf]  ;;  %v6814_v48 = vld [vmem:[#allocation8 + $0x190] sm:$0xf0]  ;;  %v6689_v49 = vor.u32 %v9723_v45, %v6686_v46  ;;  %v9741_v9 = vld [vmem:[#allocation8 + $0x10c] sm:$0xf0] }
  0x45   :  { %281 = vmatpush.bf16.msra.mxu0 %v6565_v0  ;;  %v6817_v50 = vor.u32 %v9755_v47, %v6814_v48  ;;  %v9719_v51 = vld [vmem:[#allocation8 + $0x64] sm:$0xf]  ;;  %v6670_v52 = vld [vmem:[#allocation8 + $0x70] sm:$0xf0]  ;;  %v6749_v11 = vor.u32 %v9741_v9, %v6748_v7  ;;  %v6740_v17 = vld [vmem:[#allocation8 + $0xe8] sm:$0xf] }
  0x46   :  { %295 = vmatpush.bf16.msra.mxu1 %v6569_v5  ;;  %v9751_v53 = vld [vmem:[#allocation8 + $0x164] sm:$0xf]  ;;  %v6798_v54 = vld [vmem:[#allocation8 + $0x170] sm:$0xf0]  ;;  %v6673_v55 = vor.u32 %v9719_v51, %v6670_v52  ;;  %v6620_v5 = vld [vmem:[#allocation8] sm:$0xf] }
  0x47   :  { %712 = vmatpush.bf16.msra.mxu2 %v6653_v29  ;;  %v6801_v56 = vor.u32 %v9751_v53, %v6798_v54  ;;  %v9715_v57 = vld [vmem:[#allocation8 + $0x44] sm:$0xf]  ;;  %v6654_v58 = vld [vmem:[#allocation8 + $0x50] sm:$0xf0]  ;;  %v6621_v8 = vor.u32 %v9709_v6, %v6620_v5  ;;  %v9738_v18 = vld [vmem:[#allocation8 + $0xf4] sm:$0xf0] }
  0x48   :  { %726 = vmatpush.bf16.msra.mxu3 %v6781_v30  ;;  %v9747_v59 = vld [vmem:[#allocation8 + $0x144] sm:$0xf]  ;;  %v6782_v60 = vld [vmem:[#allocation8 + $0x150] sm:$0xf0]  ;;  %v6657_v61 = vor.u32 %v9715_v57, %v6654_v58  ;;  %v9770_v21 = vld [vmem:[#allocation8 + $0x1f4] sm:$0xf0] }
  0x49   :  { %282 = vmatpush.bf16.msra.mxu0 %v6557_v15  ;;  %v6785_v62 = vor.u32 %v9747_v59, %v6782_v60  ;;  %v9711_v63 = vld [vmem:[#allocation8 + $0x24] sm:$0xf]  ;;  %v6638_v0 = vld [vmem:[#allocation8 + $0x30] sm:$0xf0]  ;;  %v9736_v22 = vld [vmem:[#allocation8 + $0xec] sm:$0xf] }
  0x4a   :  { %296 = vmatpush.bf16.msra.mxu1 %v6561_v19  ;;  %v9743_v1 = vld [vmem:[#allocation8 + $0x124] sm:$0xf]  ;;  %v6766_v2 = vld [vmem:[#allocation8 + $0x130] sm:$0xf0]  ;;  %v6641_v3 = vor.u32 %v9711_v63, %v6638_v0  ;;  %v6868_v19 = vld [vmem:[#allocation8 + $0x1e8] sm:$0xf] }
  0x4b   :  { %713 = vmatpush.bf16.msra.mxu2 %v6637_v41  ;;  %v6769_v4 = vor.u32 %v9743_v1, %v6766_v2  ;;  %v9707_v10 = vld [vmem:[#allocation8 + $0x4] sm:$0xf]  ;;  %v6622_v12 = vld [vmem:[#allocation8 + $0x10] sm:$0xf0]  ;;  %v6869_v24 = vor.u32 %v9770_v21, %v6868_v19  ;;  %v6870_v27 = vld [vmem:[#allocation8 + $0x1f8] sm:$0xf0] }
  0x4c   :  { %283 = vmatmul.bf16.vlgmr.msra.gmra.mxu0 %v9690_v26  ;;  %727 = vmatpush.bf16.msra.mxu3 %v6765_v42  ;;  %v9739_v13 = vld [vmem:[#allocation8 + $0x104] sm:$0xf]  ;;  %v6750_v14 = vld [vmem:[#allocation8 + $0x110] sm:$0xf0]  ;;  %v6625_v15 = vor.u32 %v9707_v10, %v6622_v12  ;;  %v6724_v28 = vld [vmem:[#allocation8 + $0xc8] sm:$0xf] }
  0x4d   :  { %735 = vmatpush.bf16.msrb.mxu0 %v6737_v20  ;;  %297 = vmatmul.bf16.vlgmr.msra.gmra.mxu1 %v9690_v26  ;;  %v6753_v16 = vor.u32 %v9739_v13, %v6750_v14  ;;  %v6741_v20 = vor.u32 %v9738_v18, %v6740_v17  ;;  %v9768_v26 = vld [vmem:[#allocation8 + $0x1ec] sm:$0xf]  ;;  %v9734_v30 = vld [vmem:[#allocation8 + $0xd4] sm:$0xf0]  ;;  %v6852_v31 = vld [vmem:[#allocation8 + $0x1c8] sm:$0xf] }
  0x4e   :  { %749 = vmatpush.bf16.msrb.mxu1 %v6865_v23  ;;  %v6742_v23 = vld [vmem:[#allocation8 + $0xf8] sm:$0xf0]  ;;  %v6873_v29 = vor.u32 %v9768_v26, %v6870_v27  ;;  %v9766_v32 = vld [vmem:[#allocation8 + $0x1d4] sm:$0xf0]  ;;  %v9732_v35 = vld [vmem:[#allocation8 + $0xcc] sm:$0xf] }
  0x4f   :  { %714 = vmatpush.bf16.msra.mxu2 %v6621_v8  ;;  %v6745_v25 = vor.u32 %v9736_v22, %v6742_v23  ;;  %v6853_v34 = vor.u32 %v9766_v32, %v6852_v31  ;;  %v9764_v37 = vld [vmem:[#allocation8 + $0x1cc] sm:$0xf]  ;;  %v6854_v39 = vld [vmem:[#allocation8 + $0x1d8] sm:$0xf0]  ;;  %v6708_v41 = vld [vmem:[#allocation8 + $0xa8] sm:$0xf] }
  0x50   :  { %728 = vmatpush.bf16.msra.mxu3 %v6749_v11  ;;  %v6857_v40 = vor.u32 %v9764_v37, %v6854_v39  ;;  %v9730_v42 = vld [vmem:[#allocation8 + $0xb4] sm:$0xf0]  ;;  %v9728_v46 = vld [vmem:[#allocation8 + $0xac] sm:$0xf]  ;;  %v6710_v47 = vld [vmem:[#allocation8 + $0xb8] sm:$0xf0] }
  0x51   :  { %736 = vmatpush.bf16.msrb.mxu0 %v6721_v33  ;;  %v6725_v33 = vor.u32 %v9734_v30, %v6724_v28  ;;  %v9762_v45 = vld [vmem:[#allocation8 + $0x1b4] sm:$0xf0]  ;;  %v6838_v51 = vld [vmem:[#allocation8 + $0x1b8] sm:$0xf0]  ;;  %v6692_v53 = vld [vmem:[#allocation8 + $0x88] sm:$0xf] }
  0x52   :  { %750 = vmatpush.bf16.msrb.mxu1 %v6849_v36  ;;  %v6726_v36 = vld [vmem:[#allocation8 + $0xd8] sm:$0xf0]  ;;  %v9726_v54 = vld [vmem:[#allocation8 + $0x94] sm:$0xf0]  ;;  %v9724_v58 = vld [vmem:[#allocation8 + $0x8c] sm:$0xf] }
  0x53   :  { %763 = vmatpush.bf16.msrb.mxu2 %v6741_v20  ;;  %v6729_v38 = vor.u32 %v9732_v35, %v6726_v36  ;;  %v9758_v57 = vld [vmem:[#allocation8 + $0x194] sm:$0xf0]  ;;  %v6694_v59 = vld [vmem:[#allocation8 + $0x98] sm:$0xf0]  ;;  %v6676_v1 = vld [vmem:[#allocation8 + $0x68] sm:$0xf] }
  0x54   :  { %777 = vmatpush.bf16.msrb.mxu3 %v6869_v24  ;;  %v6822_v63 = vld [vmem:[#allocation8 + $0x198] sm:$0xf0]  ;;  %v9722_v2 = vld [vmem:[#allocation8 + $0x74] sm:$0xf0]  ;;  %v9720_v6 = vld [vmem:[#allocation8 + $0x6c] sm:$0xf] }
  0x55   :  { %737 = vmatpush.bf16.msrb.mxu0 %v6705_v43  ;;  %v6836_v43 = vld [vmem:[#allocation8 + $0x1a8] sm:$0xf]  ;;  %v9754_v5 = vld [vmem:[#allocation8 + $0x174] sm:$0xf0]  ;;  %v6678_v7 = vld [vmem:[#allocation8 + $0x78] sm:$0xf0] }
  0x56   :  { %751 = vmatpush.bf16.msrb.mxu1 %v6833_v44  ;;  %v6709_v44 = vor.u32 %v9730_v42, %v6708_v41  ;;  %v6837_v48 = vor.u32 %v9762_v45, %v6836_v43  ;;  %v6681_v9 = vor.u32 %v9720_v6, %v6678_v7  ;;  %v9752_v10 = vld [vmem:[#allocation8 + $0x16c] sm:$0xf]  ;;  %v6806_v11 = vld [vmem:[#allocation8 + $0x178] sm:$0xf0]  ;;  %v6660_v12 = vld [vmem:[#allocation8 + $0x48] sm:$0xf] }
  0x57   :  { %764 = vmatpush.bf16.msrb.mxu2 %v6725_v33  ;;  %v6809_v13 = vor.u32 %v9752_v10, %v6806_v11  ;;  %v9718_v14 = vld [vmem:[#allocation8 + $0x54] sm:$0xf0]  ;;  %v9716_v17 = vld [vmem:[#allocation8 + $0x4c] sm:$0xf]  ;;  %v6662_v18 = vld [vmem:[#allocation8 + $0x58] sm:$0xf0] }
  0x58   :  { %778 = vmatpush.bf16.msrb.mxu3 %v6853_v34  ;;  %v9748_v19 = vld [vmem:[#allocation8 + $0x14c] sm:$0xf]  ;;  %v6661_v20 = vor.u32 %v9718_v14, %v6660_v12  ;;  %v6790_v21 = vld [vmem:[#allocation8 + $0x158] sm:$0xf0]  ;;  %v6665_v23 = vor.u32 %v9716_v17, %v6662_v18  ;;  %v6644_v24 = vld [vmem:[#allocation8 + $0x28] sm:$0xf] }
  0x59   :  { %738 = vmatpush.bf16.msrb.mxu0 %v6689_v49  ;;  %v6713_v49 = vor.u32 %v9728_v46, %v6710_v47  ;;  %v6772_v26 = vld [vmem:[#allocation8 + $0x128] sm:$0xf]  ;;  %v6793_v27 = vor.u32 %v9748_v19, %v6790_v21  ;;  %v9746_v28 = vld [vmem:[#allocation8 + $0x134] sm:$0xf0]  ;;  %v6646_v30 = vld [vmem:[#allocation8 + $0x38] sm:$0xf0] }
  0x5a   :  { %752 = vmatpush.bf16.msrb.mxu1 %v6817_v50  ;;  %v9760_v50 = vld [vmem:[#allocation8 + $0x1ac] sm:$0xf]  ;;  %v6774_v32 = vld [vmem:[#allocation8 + $0x138] sm:$0xf0]  ;;  %v6773_v34 = vor.u32 %v9746_v28, %v6772_v26  ;;  %v6628_v36 = vld [vmem:[#allocation8 + $0x8] sm:$0xf] }
  0x5b   :  { %v6841_v52 = vor.u32 %v9760_v50, %v6838_v51  ;;  %765 = vmatpush.bf16.msrb.mxu2 %v6709_v44  ;;  %v9744_v31 = vld [vmem:[#allocation8 + $0x12c] sm:$0xf]  ;;  %v9710_v37 = vld [vmem:[#allocation8 + $0x14] sm:$0xf0]  ;;  %v6630_v42 = vld [vmem:[#allocation8 + $0x18] sm:$0xf0] }
  0x5c   :  { %779 = vmatpush.bf16.msrb.mxu3 %v6837_v48  ;;  %v6777_v39 = vor.u32 %v9744_v31, %v6774_v32  ;;  %v9708_v41 = vld [vmem:[#allocation8 + $0xc] sm:$0xf]  ;;  %v6758_v44 = vld [vmem:[#allocation8 + $0x118] sm:$0xf0]  ;;  %v6629_v45 = vor.u32 %v9710_v37, %v6628_v36  ;;  %v10023_v7 = vld [vmem:[#allocation11 + $0x7dc] sm:$0xf0] }
  0x5d   :  { %739 = vmatpush.bf16.msrb.mxu0 %v6673_v55  ;;  %v6820_v55 = vld [vmem:[#allocation8 + $0x188] sm:$0xf]  ;;  %v9740_v43 = vld [vmem:[#allocation8 + $0x10c] sm:$0xf]  ;;  %v183_v46 = vld [vmem:[#allocation7] sm:$0x3]  ;;  %v6633_v48 = vor.u32 %v9708_v41, %v6630_v42 }
  0x5e   :  { %753 = vmatpush.bf16.msrb.mxu1 %v6801_v56  ;;  %v6693_v56 = vor.u32 %v9726_v54, %v6692_v53  ;;  %v6821_v60 = vor.u32 %v9758_v57, %v6820_v55  ;;  %v185_v51 = vperm.slane %v183_v46, 0  ;;  %v186_v53 = vperm.slane %v183_v46, 1  ;;  %v7324_v14 = vld [vmem:[#allocation11 + $0x380] sm:$0xf]  ;;  %s6531_s8 = sshll.u32 %s10796_s6, 4  ;;  %s6533_s16 = sshll.u32 %s11249_s9, 4  ;;  %s6532_s8 = int_to_ptr.vmem [resolvable:$true] %s6531_s8  ;;  %s6534_s16 = int_to_ptr.hbm [resolvable:$true] %s6533_s16 }
  0x5f   :  { %v7068_v18 = vld [vmem:[#allocation11 + $0x180] sm:$0xf] }
  0x60   :  { %766 = vmatpush.bf16.msrb.mxu2 %v6693_v56  ;;  %780 = vmatpush.bf16.msrb.mxu3 %v6821_v60  ;;  %v9823_v19 = vld [vmem:[#allocation11 + $0x19c] sm:$0xf0] }
  0x61   :  { %740 = vmatpush.bf16.msrb.mxu0 %v6657_v61  ;;  %v6697_v61 = vor.u32 %v9724_v58, %v6694_v59  ;;  %v7836_v21 = vld [vmem:[#allocation11 + $0x780] sm:$0xf] }
  0x62   :  { %754 = vmatpush.bf16.msrb.mxu1 %v6785_v62  ;;  %v9756_v62 = vld [vmem:[#allocation8 + $0x18c] sm:$0xf]  ;;  %v9879_v28 = vld [vmem:[#allocation11 + $0x35c] sm:$0xf0] }
  0x63   :  { %v6825_v0 = vor.u32 %v9756_v62, %v6822_v63  ;;  %v7356_v62 = vld [vmem:[#allocation11 + $0x3c0] sm:$0xf] }
  0x64   :  { %v9815_v31 = vld [vmem:[#allocation11 + $0x15c] sm:$0xf0] }
  0x65   :  { %741 = vmatpush.bf16.msrb.mxu0 %v6641_v3  ;;  %v6804_v3 = vld [vmem:[#allocation8 + $0x168] sm:$0xf]  ;;  %v7548_v36 = vld [vmem:[#allocation11 + $0x540] sm:$0xf] }
  0x66   :  { %755 = vmatpush.bf16.msrb.mxu1 %v6769_v4  ;;  %v6677_v4 = vor.u32 %v9722_v2, %v6676_v1  ;;  %v6805_v8 = vor.u32 %v9754_v5, %v6804_v3  ;;  %v7100_v1 = vld [vmem:[#allocation11 + $0x1c0] sm:$0xf] }
  0x67   :  { %v9831_v3 = vld [vmem:[#allocation11 + $0x1dc] sm:$0xf0] }
  0x68   :  { %767 = vmatpush.bf16.msrb.mxu2 %v6677_v4  ;;  %781 = vmatpush.bf16.msrb.mxu3 %v6805_v8  ;;  %v7868_v4 = vld [vmem:[#allocation11 + $0x7c0] sm:$0xf] }
  0x69   :  { %742 = vmatpush.bf16.msrb.mxu0 %v6625_v15  ;;  %v6788_v15 = vld [vmem:[#allocation8 + $0x148] sm:$0xf]  ;;  %v7612_v8 = vld [vmem:[#allocation11 + $0x5c0] sm:$0xf] }
  0x6a   :  { %756 = vmatpush.bf16.msrb.mxu1 %v6753_v16  ;;  %v9750_v16 = vld [vmem:[#allocation8 + $0x154] sm:$0xf0]  ;;  %v9943_v37 = vld [vmem:[#allocation11 + $0x55c] sm:$0xf0] }
  0x6b   :  { %v6789_v22 = vor.u32 %v9750_v16, %v6788_v15  ;;  %v9887_v15 = vld [vmem:[#allocation11 + $0x39c] sm:$0xf0]  ;;  %v7101_v16 = vor.u32 %v9831_v3, %v7100_v1  ;;  %v7549_v46 = vor.u32 %v9943_v37, %v7548_v36  ;;  %v7070_v36 = vld [vmem:[#allocation11 + $0x1a0] sm:$0xf0] }
  0x6c   :  { %768 = vmatpush.bf16.msrb.mxu2 %v6661_v20  ;;  %v7869_v20 = vor.u32 %v10023_v7, %v7868_v4  ;;  %v7325_v26 = vor.u32 %v9887_v15, %v7324_v14  ;;  %v7004_v42 = vld [vmem:[#allocation11 + $0x100] sm:$0xf] }
  0x6d   :  { %791 = vmatpush.bf16.msra.mxu0 %v6745_v25  ;;  %v9714_v25 = vld [vmem:[#allocation8 + $0x34] sm:$0xf0]  ;;  %782 = vmatpush.bf16.msrb.mxu3 %v6789_v22  ;;  %v9855_v1 = vld [vmem:[#allocation11 + $0x29c] sm:$0xf0] }
  0x6e   :  { %805 = vmatpush.bf16.msra.mxu1 %v6873_v29  ;;  %v9712_v29 = vld [vmem:[#allocation8 + $0x2c] sm:$0xf]  ;;  %v6645_v33 = vor.u32 %v9714_v25, %v6644_v24  ;;  %v7580_v24 = vld [vmem:[#allocation11 + $0x580] sm:$0xf] }
  0x6f   :  { %v6649_v35 = vor.u32 %v9712_v29, %v6646_v30  ;;  %v9951_v25 = vld [vmem:[#allocation11 + $0x59c] sm:$0xf0]  ;;  %v7069_v29 = vor.u32 %v9823_v19, %v7068_v18 }
  0x70   :  { %769 = vmatpush.bf16.msrb.mxu2 %v6645_v33  ;;  %v7036_v30 = vld [vmem:[#allocation11 + $0x140] sm:$0xf] }
  0x71   :  { %792 = vmatpush.bf16.msra.mxu0 %v6729_v38  ;;  %v6756_v38 = vld [vmem:[#allocation8 + $0x108] sm:$0xf]  ;;  %783 = vmatpush.bf16.msrb.mxu3 %v6773_v34  ;;  %v7804_v33 = vld [vmem:[#allocation11 + $0x740] sm:$0xf]  ;;  %v7581_v34 = vor.u32 %v9951_v25, %v7580_v24  ;;  %v7037_v41 = vor.u32 %v9815_v31, %v7036_v30 }
  0x72   :  { %806 = vmatpush.bf16.msra.mxu1 %v6857_v40  ;;  %v9742_v40 = vld [vmem:[#allocation8 + $0x114] sm:$0xf0]  ;;  %v9791_v3 = vld [vmem:[#allocation11 + $0x9c] sm:$0xf0]  ;;  %v7102_v24 = vld [vmem:[#allocation11 + $0x1e0] sm:$0xf0] }
  0x73   :  { %v6757_v47 = vor.u32 %v9742_v40, %v6756_v38  ;;  %v9871_v40 = vld [vmem:[#allocation11 + $0x31c] sm:$0xf0]  ;;  %v7326_v30 = vld [vmem:[#allocation11 + $0x3a0] sm:$0xf0] }
  0x74   :  { %770 = vmatpush.bf16.msrb.mxu2 %v6629_v45  ;;  %v7772_v45 = vld [vmem:[#allocation11 + $0x700] sm:$0xf] }
  0x75   :  { %793 = vmatpush.bf16.msra.mxu0 %v6713_v49  ;;  %v6761_v49 = vor.u32 %v9740_v43, %v6758_v44  ;;  %784 = vmatpush.bf16.msrb.mxu3 %v6757_v47  ;;  %v9807_v43 = vld [vmem:[#allocation11 + $0x11c] sm:$0xf0] }
  0x76   :  { %807 = vmatpush.bf16.msra.mxu1 %v6841_v52  ;;  %v9999_v47 = vld [vmem:[#allocation11 + $0x71c] sm:$0xf0] }
  0x77   :  { %v9983_v7 = vld [vmem:[#allocation11 + $0x69c] sm:$0xf0] }
  0x78   :  { %v9783_v14 = vld [vmem:[#allocation11 + $0x5c] sm:$0xf0] }
  0x79   :  { %794 = vmatpush.bf16.msra.mxu0 %v6697_v61  ;;  %v9839_v18 = vld [vmem:[#allocation11 + $0x21c] sm:$0xf0] }
  0x7a   :  { %808 = vmatpush.bf16.msra.mxu1 %v6825_v0  ;;  %v9895_v0 = vld [vmem:[#allocation11 + $0x3dc] sm:$0xf0] }
  0x7d   :  { %795 = vmatpush.bf16.msra.mxu0 %v6681_v9  ;;  %v9959_v9 = vld [vmem:[#allocation11 + $0x5dc] sm:$0xf0] }
  0x7e   :  { %809 = vmatpush.bf16.msra.mxu1 %v6809_v13  ;;  %v7357_v13 = vor.u32 %v9895_v0, %v7356_v62  ;;  %v7613_v22 = vor.u32 %v9959_v9, %v7612_v8  ;;  %v7164_v9 = vld [vmem:[#allocation11 + $0x240] sm:$0xf] }
  0x81   :  { %796 = vmatpush.bf16.msra.mxu0 %v6665_v23  ;;  %v10015_v23 = vld [vmem:[#allocation11 + $0x79c] sm:$0xf0] }
  0x82   :  { %810 = vmatpush.bf16.msra.mxu1 %v6793_v27  ;;  %v7292_v27 = vld [vmem:[#allocation11 + $0x340] sm:$0xf]  ;;  %v7837_v32 = vor.u32 %v10015_v23, %v7836_v21  ;;  %v9827_v23 = vld [vmem:[#allocation11 + $0x1c4] sm:$0xf] }
  0x83   :  { %v7293_v38 = vor.u32 %v9879_v28, %v7292_v27  ;;  %v6876_v21 = vld [vmem:[#allocation11] sm:$0xf]  ;;  %v7105_v28 = vor.u32 %v9827_v23, %v7102_v24  ;;  %v6942_v23 = vld [vmem:[#allocation11 + $0xa0] sm:$0xf0] }
  0x84   :  { %v9947_v24 = vld [vmem:[#allocation11 + $0x584] sm:$0xf] }
  0x85   :  { %797 = vmatpush.bf16.msra.mxu0 %v6649_v35  ;;  %v10007_v35 = vld [vmem:[#allocation11 + $0x75c] sm:$0xf0] }
  0x86   :  { %811 = vmatpush.bf16.msra.mxu1 %v6777_v39  ;;  %v7260_v39 = vld [vmem:[#allocation11 + $0x300] sm:$0xf]  ;;  %v7805_v44 = vor.u32 %v10007_v35, %v7804_v33  ;;  %v7294_v33 = vld [vmem:[#allocation11 + $0x360] sm:$0xf0] }
  0x87   :  { %v9819_v35 = vld [vmem:[#allocation11 + $0x184] sm:$0xf] }
  0x88   :  { %v7073_v37 = vor.u32 %v9819_v35, %v7070_v36  ;;  %v6910_v35 = vld [vmem:[#allocation11 + $0x60] sm:$0xf0] }
  0x89   :  { %798 = vmatpush.bf16.msra.mxu0 %v6633_v48  ;;  %v7516_v48 = vld [vmem:[#allocation11 + $0x500] sm:$0xf] }
  0x8a   :  { %812 = vmatpush.bf16.msra.mxu1 %v6761_v49  ;;  %v9935_v49 = vld [vmem:[#allocation11 + $0x51c] sm:$0xf0] }
  0xc9   :  { %v284_v50 = vpop.f32.mrf.mxu0 }
  0xca   :  { %v298_v52 = vpop.f32.mrf.mxu1  ;;  %v285_v54 = vadd.f32 %v284_v50, %v185_v51  ;;  %v7261_v50 = vor.u32 %v9871_v40, %v7260_v39  ;;  %v9975_v39 = vld [vmem:[#allocation11 + $0x65c] sm:$0xf0] }
  0xcb   :  { %v299_v55 = vadd.f32 %v298_v52, %v186_v53  ;;  %v9863_v52 = vld [vmem:[#allocation11 + $0x2dc] sm:$0xf0] }
  0xcc   :  { %v303_v57 = vmul.f32 0.2, %v285_v54 }
  0xcd   :  { %v304_v60 = vmul.f32 0.2, %v299_v55 }
  0xce   :  { %v307_v5 = vmax.f32 %v285_v54, %v303_v57  ;;  %v6972_v54 = vld [vmem:[#allocation11 + $0xc0] sm:$0xf] }
  0xcf   :  { %v308_v10 = vmax.f32 %v299_v55, %v304_v60  ;;  %v9799_v55 = vld [vmem:[#allocation11 + $0xdc] sm:$0xf0] }
  0xd0   :  { %v7740_v57 = vld [vmem:[#allocation11 + $0x6c0] sm:$0xf]  ;;  %v6973_v0 = vor.u32 %v9799_v55, %v6972_v54  ;;  %v7230_v54 = vld [vmem:[#allocation11 + $0x2e0] sm:$0xf0] }
  0xd1   :  { %v286_v56 = vpop.f32.mrf.mxu0  ;;  %v7484_v60 = vld [vmem:[#allocation11 + $0x4c0] sm:$0xf]  ;;  %v10019_v55 = vld [vmem:[#allocation11 + $0x7c4] sm:$0xf] }
  0xd2   :  { %v287_v58 = vadd.f32 %v286_v56, %v185_v51  ;;  %v300_v59 = vpop.f32.mrf.mxu1  ;;  %v7228_v51 = vld [vmem:[#allocation11 + $0x2c0] sm:$0xf]  ;;  %v7773_v56 = vor.u32 %v9999_v47, %v7772_v45  ;;  %v9811_v47 = vld [vmem:[#allocation11 + $0x144] sm:$0xf] }
  0xd3   :  { %v301_v61 = vadd.f32 %v300_v59, %v186_v53  ;;  %v7005_v53 = vor.u32 %v9807_v43, %v7004_v42  ;;  %v9991_v59 = vld [vmem:[#allocation11 + $0x6dc] sm:$0xf0]  ;;  %v7229_v62 = vor.u32 %v9863_v52, %v7228_v51  ;;  %v7262_v42 = vld [vmem:[#allocation11 + $0x320] sm:$0xf0] }
  0xd4   :  { %v305_v63 = vmul.f32 0.2, %v287_v58  ;;  %v7741_v4 = vor.u32 %v9991_v59, %v7740_v57  ;;  %v9919_v45 = vld [vmem:[#allocation11 + $0x49c] sm:$0xf0]  ;;  %v7870_v57 = vld [vmem:[#allocation11 + $0x7e0] sm:$0xf0] }
  0xd5   :  { %v306_v2 = vmul.f32 0.2, %v301_v61  ;;  %v9967_v51 = vld [vmem:[#allocation11 + $0x61c] sm:$0xf0] }
  0xd6   :  { %v309_v6 = vmax.f32 %v287_v58, %v305_v63  ;;  %v7517_v58 = vor.u32 %v9935_v49, %v7516_v48  ;;  %v7196_v63 = vld [vmem:[#allocation11 + $0x280] sm:$0xf]  ;;  %v7038_v48 = vld [vmem:[#allocation11 + $0x160] sm:$0xf0] }
  0xd7   :  { %v310_v11 = vmax.f32 %v301_v61, %v306_v2  ;;  %v9927_v61 = vld [vmem:[#allocation11 + $0x4dc] sm:$0xf0]  ;;  %v7197_v8 = vor.u32 %v9855_v1, %v7196_v63  ;;  %v7041_v49 = vor.u32 %v9811_v47, %v7038_v48  ;;  %v7006_v63 = vld [vmem:[#allocation11 + $0x120] sm:$0xf0] }
  0xd8   :  { %v10877_v12 = vpack.c.bf16 %v309_v6, %v307_v5  ;;  %v6940_v2 = vld [vmem:[#allocation11 + $0x80] sm:$0xf]  ;;  %v7485_v5 = vor.u32 %v9927_v61, %v7484_v60  ;;  %v7873_v60 = vor.u32 %v10019_v55, %v7870_v57  ;;  %v9851_v1 = vld [vmem:[#allocation11 + $0x284] sm:$0xf]  ;;  %v10889_v55 = vld [vmem:[#allocation10] sm:$0xf] }
  0xd9   :  { %v10879_v17 = vpack.c.bf16 %v310_v11, %v308_v10  ;;  %v7708_v6 = vld [vmem:[#allocation11 + $0x680] sm:$0xf]  ;;  %v6941_v10 = vor.u32 %v9791_v3, %v6940_v2  ;;  %v7198_v2 = vld [vmem:[#allocation11 + $0x2a0] sm:$0xf0] }
  0xda   :  { %715 = vmatmul.bf16.vlgmr.msra.gmra.mxu2 %v10877_v12  ;;  %743 = vmatmul.bf16.vlgmr.msrb.gmra.mxu0 %v10877_v12  ;;  %v9847_v11 = vld [vmem:[#allocation11 + $0x25c] sm:$0xf0]  ;;  %v7709_v15 = vor.u32 %v9983_v7, %v7708_v6  ;;  %v10011_v3 = vld [vmem:[#allocation11 + $0x784] sm:$0xf] }
  0xdb   :  { %729 = vmatmul.bf16.vlgmr.msra.gmra.mxu3 %v10879_v17  ;;  %757 = vmatmul.bf16.vlgmr.msrb.gmra.mxu1 %v10879_v17  ;;  %v9911_v59 = vld [vmem:[#allocation11 + $0x45c] sm:$0xf0]  ;;  %v7518_v47 = vld [vmem:[#allocation11 + $0x520] sm:$0xf0] }
  0xdc   :  { %2407 = vmatpush.bf16.msra.mxu3 %v7357_v13  ;;  %2393 = vmatpush.bf16.msra.mxu2 %v7101_v16  ;;  %v6908_v13 = vld [vmem:[#allocation11 + $0x40] sm:$0xf]  ;;  %v7165_v16 = vor.u32 %v9847_v11, %v7164_v9  ;;  %v6974_v11 = vld [vmem:[#allocation11 + $0xe0] sm:$0xf0] }
  0xdd   :  { %2435 = vmatpush.bf16.msrb.mxu1 %v7869_v20  ;;  %2421 = vmatpush.bf16.msrb.mxu0 %v7613_v22  ;;  %v6909_v19 = vor.u32 %v9783_v14, %v6908_v13  ;;  %v9891_v20 = vld [vmem:[#allocation11 + $0x3c4] sm:$0xf]  ;;  %v7388_v6 = vld [vmem:[#allocation11 + $0x400] sm:$0xf] }
  0xde   :  { %v7358_v22 = vld [vmem:[#allocation11 + $0x3e0] sm:$0xf0]  ;;  %v9903_v7 = vld [vmem:[#allocation11 + $0x41c] sm:$0xf0] }
  0xdf   :  { %v7361_v27 = vor.u32 %v9891_v20, %v7358_v22  ;;  %v7389_v9 = vor.u32 %v9903_v7, %v7388_v6  ;;  %v9955_v13 = vld [vmem:[#allocation11 + $0x5c4] sm:$0xf] }
  0xe0   :  { %2408 = vmatpush.bf16.msra.mxu3 %v7325_v26  ;;  %2394 = vmatpush.bf16.msra.mxu2 %v7069_v29  ;;  %v9883_v29 = vld [vmem:[#allocation11 + $0x384] sm:$0xf] }
  0xe1   :  { %2436 = vmatpush.bf16.msrb.mxu1 %v7837_v32  ;;  %2422 = vmatpush.bf16.msrb.mxu0 %v7581_v34  ;;  %v7329_v31 = vor.u32 %v9883_v29, %v7326_v30  ;;  %v9875_v32 = vld [vmem:[#allocation11 + $0x344] sm:$0xf] }
  0xe2   :  { %v7297_v34 = vor.u32 %v9875_v32, %v7294_v33  ;;  %v9787_v22 = vld [vmem:[#allocation11 + $0x84] sm:$0xf] }
  0xe3   :  { %v7134_v29 = vld [vmem:[#allocation11 + $0x220] sm:$0xf0] }
  0xe4   :  { %2409 = vmatpush.bf16.msra.mxu3 %v7293_v38  ;;  %2395 = vmatpush.bf16.msra.mxu2 %v7037_v41  ;;  %v7676_v38 = vld [vmem:[#allocation11 + $0x640] sm:$0xf]  ;;  %v9867_v41 = vld [vmem:[#allocation11 + $0x304] sm:$0xf] }
  0xe5   :  { %2437 = vmatpush.bf16.msrb.mxu1 %v7805_v44  ;;  %2423 = vmatpush.bf16.msrb.mxu0 %v7549_v46  ;;  %v7677_v40 = vor.u32 %v9975_v39, %v7676_v38  ;;  %v7265_v43 = vor.u32 %v9867_v41, %v7262_v42  ;;  %v7452_v44 = vld [vmem:[#allocation11 + $0x480] sm:$0xf]  ;;  %v7774_v32 = vld [vmem:[#allocation11 + $0x720] sm:$0xf0] }
  0xe6   :  { %v7453_v46 = vor.u32 %v9919_v45, %v7452_v44  ;;  %v7550_v38 = vld [vmem:[#allocation11 + $0x560] sm:$0xf0] }
  0xe7   :  { %v7742_v41 = vld [vmem:[#allocation11 + $0x6e0] sm:$0xf0] }
  0xe8   :  { %2410 = vmatpush.bf16.msra.mxu3 %v7261_v50  ;;  %2396 = vmatpush.bf16.msra.mxu2 %v7005_v53  ;;  %v7644_v50 = vld [vmem:[#allocation11 + $0x600] sm:$0xf]  ;;  %v9859_v53 = vld [vmem:[#allocation11 + $0x2c4] sm:$0xf] }
  0xe9   :  { %2438 = vmatpush.bf16.msrb.mxu1 %v7773_v56  ;;  %2424 = vmatpush.bf16.msrb.mxu0 %v7517_v58  ;;  %v7645_v52 = vor.u32 %v9967_v51, %v7644_v50  ;;  %v7233_v56 = vor.u32 %v9859_v53, %v7230_v54  ;;  %v7420_v58 = vld [vmem:[#allocation11 + $0x440] sm:$0xf]  ;;  %v6878_v44 = vld [vmem:[#allocation11 + $0x20] sm:$0xf0] }
  0xea   :  { %771 = vmatmul.bf16.vlgmr.msrb.gmra.mxu2 %v10877_v12  ;;  %799 = vmatmul.bf16.vlgmr.msra.gmra.mxu0 %v10877_v12  ;;  %v7132_v12 = vld [vmem:[#allocation11 + $0x200] sm:$0xf]  ;;  %v7421_v61 = vor.u32 %v9911_v59, %v7420_v58  ;;  %v7710_v50 = vld [vmem:[#allocation11 + $0x6a0] sm:$0xf0] }
  0xeb   :  { %785 = vmatmul.bf16.vlgmr.msrb.gmra.mxu3 %v10879_v17  ;;  %813 = vmatmul.bf16.vlgmr.msra.gmra.mxu1 %v10879_v17  ;;  %v9775_v17 = vld [vmem:[#allocation11 + $0x1c] sm:$0xf0]  ;;  %v7133_v25 = vor.u32 %v9839_v18, %v7132_v12  ;;  %v9843_v12 = vld [vmem:[#allocation11 + $0x244] sm:$0xf] }
  0xec   :  { %2411 = vmatpush.bf16.msra.mxu3 %v7229_v62  ;;  %2397 = vmatpush.bf16.msra.mxu2 %v6973_v0  ;;  %v6877_v26 = vor.u32 %v9775_v17, %v6876_v21  ;;  %v9803_v62 = vld [vmem:[#allocation11 + $0x104] sm:$0xf] }
  0xed   :  { %2439 = vmatpush.bf16.msrb.mxu1 %v7741_v4  ;;  %2425 = vmatpush.bf16.msrb.mxu0 %v7485_v5  ;;  %v7009_v0 = vor.u32 %v9803_v62, %v7006_v63  ;;  %v7201_v4 = vor.u32 %v9851_v1, %v7198_v2  ;;  %v7838_v5 = vld [vmem:[#allocation11 + $0x7a0] sm:$0xf0] }
  0xee   :  { %v7166_v18 = vld [vmem:[#allocation11 + $0x260] sm:$0xf0] }
  0xef   :  { %v7169_v20 = vor.u32 %v9843_v12, %v7166_v18  ;;  %v7806_v21 = vld [vmem:[#allocation11 + $0x760] sm:$0xf0] }
  0xf0   :  { %2412 = vmatpush.bf16.msra.mxu3 %v7197_v8  ;;  %2398 = vmatpush.bf16.msra.mxu2 %v6941_v10  ;;  %v7841_v8 = vor.u32 %v10011_v3, %v7838_v5  ;;  %v9795_v10 = vld [vmem:[#allocation11 + $0xc4] sm:$0xf] }
  0xf1   :  { %2440 = vmatpush.bf16.msrb.mxu1 %v7709_v15  ;;  %2426 = vmatpush.bf16.msrb.mxu0 %v7453_v46  ;;  %v6977_v14 = vor.u32 %v9795_v10, %v6974_v11  ;;  %v7614_v15 = vld [vmem:[#allocation11 + $0x5e0] sm:$0xf0] }
  0xf2   :  { %v9931_v46 = vld [vmem:[#allocation11 + $0x504] sm:$0xf] }
  0xf3   :  { %v7521_v48 = vor.u32 %v9931_v46, %v7518_v47  ;;  %v7486_v53 = vld [vmem:[#allocation11 + $0x4e0] sm:$0xf0]  ;;  %v381_v46 = vperm.slane %v10889_v55, 2  ;;  %v7300_v47 = vld [vmem:[#allocation11 + $0x348] sm:$0xf] }
  0xf4   :  { %2413 = vmatpush.bf16.msra.mxu3 %v7165_v16  ;;  %2399 = vmatpush.bf16.msra.mxu2 %v6909_v19  ;;  %v7617_v16 = vor.u32 %v9955_v13, %v7614_v15  ;;  %v10003_v19 = vld [vmem:[#allocation11 + $0x744] sm:$0xf] }
  0xf5   :  { %2441 = vmatpush.bf16.msrb.mxu1 %v7677_v40  ;;  %2427 = vmatpush.bf16.msrb.mxu0 %v7421_v61  ;;  %v7809_v17 = vor.u32 %v10003_v19, %v7806_v21  ;;  %v9987_v40 = vld [vmem:[#allocation11 + $0x6c4] sm:$0xf]  ;;  %v380_v61 = vperm.slane %v10889_v55, 1 }
  0xf6   :  { %v7745_v42 = vor.u32 %v9987_v40, %v7742_v41  ;;  %v7678_v57 = vld [vmem:[#allocation11 + $0x660] sm:$0xf0]  ;;  %v7108_v41 = vld [vmem:[#allocation11 + $0x1c8] sm:$0xf] }
  0xf7   :  { %v9915_v59 = vld [vmem:[#allocation11 + $0x484] sm:$0xf] }
  0xf8   :  { %2414 = vmatpush.bf16.msra.mxu3 %v7133_v25  ;;  %2400 = vmatpush.bf16.msra.mxu2 %v6877_v26  ;;  %v6945_v25 = vor.u32 %v9787_v22, %v6942_v23  ;;  %v7582_v26 = vld [vmem:[#allocation11 + $0x5a0] sm:$0xf0]  ;;  %v7364_v23 = vld [vmem:[#allocation11 + $0x3c8] sm:$0xf] }
  0xf9   :  { %2442 = vmatpush.bf16.msrb.mxu1 %v7645_v52  ;;  %2428 = vmatpush.bf16.msrb.mxu0 %v7389_v9  ;;  %v9923_v52 = vld [vmem:[#allocation11 + $0x4c4] sm:$0xf] }
  0xfa   :  { %v7489_v54 = vor.u32 %v9923_v52, %v7486_v53  ;;  %v7646_v1 = vld [vmem:[#allocation11 + $0x620] sm:$0xf0] }
  0xfb   :  { %v7422_v5 = vld [vmem:[#allocation11 + $0x460] sm:$0xf0] }
  0xfc   :  { %2463 = vmatpush.bf16.msrb.mxu3 %v7361_v27  ;;  %2449 = vmatpush.bf16.msrb.mxu2 %v7105_v28  ;;  %v7585_v27 = vor.u32 %v9947_v24, %v7582_v26  ;;  %v9835_v28 = vld [vmem:[#allocation11 + $0x204] sm:$0xf]  ;;  %v9896_v24 = vld [vmem:[#allocation11 + $0x3e4] sm:$0xf0] }
  0xfd   :  { %2491 = vmatpush.bf16.msra.mxu1 %v7873_v60  ;;  %2477 = vmatpush.bf16.msra.mxu0 %v7617_v16  ;;  %v7137_v30 = vor.u32 %v9835_v28, %v7134_v29  ;;  %v7454_v60 = vld [vmem:[#allocation11 + $0x4a0] sm:$0xf0] }
  0xfe   :  { %v7457_v62 = vor.u32 %v9915_v59, %v7454_v60  ;;  %v9899_v10 = vld [vmem:[#allocation11 + $0x404] sm:$0xf] }
 0x100   :  { %2464 = vmatpush.bf16.msrb.mxu3 %v7329_v31  ;;  %2450 = vmatpush.bf16.msrb.mxu2 %v7073_v37  ;;  %v9995_v31 = vld [vmem:[#allocation11 + $0x704] sm:$0xf] }
 0x101   :  { %2492 = vmatpush.bf16.msra.mxu1 %v7841_v8  ;;  %2478 = vmatpush.bf16.msra.mxu0 %v7585_v27  ;;  %v7777_v33 = vor.u32 %v9995_v31, %v7774_v32  ;;  %v9939_v37 = vld [vmem:[#allocation11 + $0x544] sm:$0xf]  ;;  %v379_v8 = vperm.slane %v10889_v55, 0  ;;  %v7365_v32 = vor.u32 %v9896_v24, %v7364_v23 }
 0x102   :  { %v7553_v39 = vor.u32 %v9939_v37, %v7550_v38  ;;  %v7332_v37 = vld [vmem:[#allocation11 + $0x388] sm:$0xf] }
 0x103   :  { %v9888_v38 = vld [vmem:[#allocation11 + $0x3a4] sm:$0xf0] }
 0x104   :  { %2465 = vmatpush.bf16.msrb.mxu3 %v7297_v34  ;;  %2451 = vmatpush.bf16.msrb.mxu2 %v7041_v49  ;;  %v9779_v34 = vld [vmem:[#allocation11 + $0x44] sm:$0xf] }
 0x105   :  { %2493 = vmatpush.bf16.msra.mxu1 %v7809_v17  ;;  %v6913_v36 = vor.u32 %v9779_v34, %v6910_v35  ;;  %2479 = vmatpush.bf16.msra.mxu0 %v7553_v39  ;;  %v9979_v49 = vld [vmem:[#allocation11 + $0x684] sm:$0xf] }
 0x106   :  { %v7713_v51 = vor.u32 %v9979_v49, %v7710_v50 }
 0x108   :  { %2466 = vmatpush.bf16.msrb.mxu3 %v7265_v43  ;;  %2452 = vmatpush.bf16.msrb.mxu2 %v7009_v0  ;;  %v9771_v43 = vld [vmem:[#allocation11 + $0x4] sm:$0xf] }
 0x109   :  { %2494 = vmatpush.bf16.msra.mxu1 %v7777_v33  ;;  %v6881_v45 = vor.u32 %v9771_v43, %v6878_v44  ;;  %2480 = vmatpush.bf16.msra.mxu0 %v7521_v48  ;;  %v9963_v0 = vld [vmem:[#allocation11 + $0x604] sm:$0xf]  ;;  %v7333_v43 = vor.u32 %v9888_v38, %v7332_v37  ;;  %v9880_v48 = vld [vmem:[#allocation11 + $0x364] sm:$0xf0] }
 0x10a   :  { %v7649_v3 = vor.u32 %v9963_v0, %v7646_v1  ;;  %v7172_v37 = vld [vmem:[#allocation11 + $0x248] sm:$0xf] }
 0x10c   :  { %2467 = vmatpush.bf16.msrb.mxu3 %v7233_v56  ;;  %2453 = vmatpush.bf16.msrb.mxu2 %v6977_v14  ;;  %v9971_v56 = vld [vmem:[#allocation11 + $0x644] sm:$0xf] }
 0x10d   :  { %2495 = vmatpush.bf16.msra.mxu1 %v7745_v42  ;;  %v7681_v58 = vor.u32 %v9971_v56, %v7678_v57  ;;  %2481 = vmatpush.bf16.msra.mxu0 %v7489_v54  ;;  %v7390_v14 = vld [vmem:[#allocation11 + $0x420] sm:$0xf0]  ;;  %v9832_v42 = vld [vmem:[#allocation11 + $0x1e4] sm:$0xf0] }
 0x10e   :  { %v7393_v16 = vor.u32 %v9899_v10, %v7390_v14  ;;  %v7109_v50 = vor.u32 %v9832_v42, %v7108_v41  ;;  %v7076_v54 = vld [vmem:[#allocation11 + $0x188] sm:$0xf] }
 0x10f   :  { %v9824_v56 = vld [vmem:[#allocation11 + $0x1a4] sm:$0xf0] }
 0x110   :  { %2468 = vmatpush.bf16.msrb.mxu3 %v7201_v4  ;;  %2454 = vmatpush.bf16.msrb.mxu2 %v6945_v25  ;;  %v9907_v4 = vld [vmem:[#allocation11 + $0x444] sm:$0xf]  ;;  %v10024_v10 = vld [vmem:[#allocation11 + $0x7e4] sm:$0xf0] }
 0x111   :  { %2496 = vmatpush.bf16.msra.mxu1 %v7713_v51  ;;  %2482 = vmatpush.bf16.msra.mxu0 %v7457_v62  ;;  %v7425_v7 = vor.u32 %v9907_v4, %v7422_v5  ;;  %v9872_v62 = vld [vmem:[#allocation11 + $0x324] sm:$0xf0] }
 0x112   :  { %v7236_v5 = vld [vmem:[#allocation11 + $0x2c8] sm:$0xf] }
 0x113   :  { %v7812_v41 = vld [vmem:[#allocation11 + $0x748] sm:$0xf] }
 0x114   :  { %2469 = vmatpush.bf16.msrb.mxu3 %v7169_v20  ;;  %2455 = vmatpush.bf16.msrb.mxu2 %v6913_v36  ;;  %v10008_v42 = vld [vmem:[#allocation11 + $0x764] sm:$0xf0] }
 0x115   :  { %2497 = vmatpush.bf16.msra.mxu1 %v7681_v58  ;;  %2483 = vmatpush.bf16.msra.mxu0 %v7425_v7  ;;  %v7301_v58 = vor.u32 %v9880_v48, %v7300_v47  ;;  %v9792_v47 = vld [vmem:[#allocation11 + $0xa4] sm:$0xf0] }
 0x116   :  { %v7588_v48 = vld [vmem:[#allocation11 + $0x588] sm:$0xf] }
 0x118   :  { %2470 = vmatpush.bf16.msrb.mxu3 %v7137_v30  ;;  %2456 = vmatpush.bf16.msrb.mxu2 %v6881_v45  ;;  %v382_v30 = vperm.slane %v10889_v55, 3 }
 0x119   :  { %2498 = vmatpush.bf16.msra.mxu1 %v7649_v3  ;;  %2484 = vmatpush.bf16.msra.mxu0 %v7393_v16  ;;  %v9816_v3 = vld [vmem:[#allocation11 + $0x164] sm:$0xf0] }
 0x157   :  { %v744_v63 = vpop.f32.mrf.mxu0 }
 0x158   :  { %v758_v2 = vpop.f32.mrf.mxu1  ;;  %v745_v6 = vadd.f32 %v744_v63, %v380_v61  ;;  %v7077_v63 = vor.u32 %v9824_v56, %v7076_v54  ;;  %v9840_v54 = vld [vmem:[#allocation11 + $0x224] sm:$0xf0] }
 0x159   :  { %v7780_v56 = vld [vmem:[#allocation11 + $0x708] sm:$0xf] }
 0x15a   :  { %v759_v11 = vadd.f32 %v758_v2, %v745_v6  ;;  %v7044_v2 = vld [vmem:[#allocation11 + $0x148] sm:$0xf] }
 0x15b   :  { %v9864_v6 = vld [vmem:[#allocation11 + $0x2e4] sm:$0xf0] }
 0x15c   :  { %v820_v20 = vmul.f32 0.2, %v759_v11 }
 0x15d   :  { %v716_v9 = vpop.f32.mrf.mxu2 }
 0x15e   :  { %v730_v13 = vpop.f32.mrf.mxu3  ;;  %v717_v12 = vadd.f32 %v716_v9, %v379_v8  ;;  %v828_v26 = vmax.f32 %v759_v11, %v820_v20  ;;  %v7876_v9 = vld [vmem:[#allocation11 + $0x7c8] sm:$0xf]  ;;  %v7237_v20 = vor.u32 %v9864_v6, %v7236_v5 }
 0x15f   :  { %v746_v15 = vpop.f32.mrf.mxu0  ;;  %v9992_v5 = vld [vmem:[#allocation11 + $0x6e4] sm:$0xf0] }
 0x160   :  { %v747_v18 = vadd.f32 %v746_v15, %v380_v61  ;;  %v760_v19 = vpop.f32.mrf.mxu1  ;;  %v731_v17 = vadd.f32 %v730_v13, %v717_v12  ;;  %v7268_v61 = vld [vmem:[#allocation11 + $0x308] sm:$0xf]  ;;  %v7045_v13 = vor.u32 %v9816_v3, %v7044_v2 }
 0x161   :  { %v7269_v4 = vor.u32 %v9872_v62, %v7268_v61  ;;  %v7012_v12 = vld [vmem:[#allocation11 + $0x108] sm:$0xf]  ;;  %v7366_v61 = vld [vmem:[#allocation11 + $0x3e8] sm:$0xf0] }
 0x162   :  { %v761_v21 = vadd.f32 %v760_v19, %v747_v18  ;;  %v819_v33 = vmul.f32 0.2, %v731_v17  ;;  %v9808_v18 = vld [vmem:[#allocation11 + $0x124] sm:$0xf0] }
 0x163   :  { %v6916_v62 = vld [vmem:[#allocation11 + $0x48] sm:$0xf] }
 0x164   :  { %v824_v22 = vmul.f32 0.2, %v761_v21  ;;  %v827_v44 = vmax.f32 %v731_v17, %v819_v33  ;;  %v7204_v17 = vld [vmem:[#allocation11 + $0x288] sm:$0xf] }
 0x165   :  { %v718_v25 = vpop.f32.mrf.mxu2  ;;  %v9960_v33 = vld [vmem:[#allocation11 + $0x5e4] sm:$0xf0] }
 0x166   :  { %v832_v27 = vmax.f32 %v761_v21, %v824_v22  ;;  %v719_v28 = vadd.f32 %v718_v25, %v379_v8  ;;  %v732_v29 = vpop.f32.mrf.mxu3  ;;  %v7877_v21 = vor.u32 %v10024_v10, %v7876_v9  ;;  %v9856_v22 = vld [vmem:[#allocation11 + $0x2a4] sm:$0xf0]  ;;  %v7334_v9 = vld [vmem:[#allocation11 + $0x3a8] sm:$0xf0] }
 0x167   :  { %v800_v31 = vpop.f32.mrf.mxu0  ;;  %v6884_v10 = vld [vmem:[#allocation11 + $0x8] sm:$0xf] }
 0x168   :  { %v10894_v34 = vpack.c.bf16 %v832_v27, %v828_v26  ;;  %v733_v35 = vadd.f32 %v732_v29, %v719_v28  ;;  %v814_v36 = vpop.f32.mrf.mxu1  ;;  %v801_v40 = vadd.f32 %v800_v31, %v382_v30  ;;  %v7844_v26 = vld [vmem:[#allocation11 + $0x788] sm:$0xf]  ;;  %v7013_v28 = vor.u32 %v9808_v18, %v7012_v12  ;;  %v7110_v12 = vld [vmem:[#allocation11 + $0x1e8] sm:$0xf0] }
 0x169   :  { %v10016_v27 = vld [vmem:[#allocation11 + $0x7a4] sm:$0xf0] }
 0x16a   :  { %v823_v39 = vmul.f32 0.2, %v733_v35  ;;  %2415 = vmatmul.bf16.vlgmr.msra.gmra.mxu3 %v10894_v34  ;;  %v815_v52 = vadd.f32 %v814_v36, %v801_v40  ;;  %v6980_v29 = vld [vmem:[#allocation11 + $0xc8] sm:$0xf]  ;;  %v7845_v36 = vor.u32 %v10016_v27, %v7844_v26 }
 0x16b   :  { %2519 = vmatpush.bf16.msra.mxu3 %v7365_v32  ;;  %v7620_v32 = vld [vmem:[#allocation11 + $0x5c8] sm:$0xf] }
 0x16c   :  { %v831_v45 = vmax.f32 %v733_v35, %v823_v39  ;;  %v822_v0 = vmul.f32 0.2, %v815_v52  ;;  %v7205_v35 = vor.u32 %v9856_v22, %v7204_v17  ;;  %v9848_v40 = vld [vmem:[#allocation11 + $0x264] sm:$0xf0]  ;;  %v9876_v22 = vld [vmem:[#allocation11 + $0x34c] sm:$0xf] }
 0x16d   :  { %v772_v49 = vpop.f32.mrf.mxu2  ;;  %v7492_v26 = vld [vmem:[#allocation11 + $0x4c8] sm:$0xf] }
 0x16e   :  { %v10898_v51 = vpack.c.bf16 %v831_v45, %v827_v44  ;;  %v786_v53 = vpop.f32.mrf.mxu3  ;;  %v773_v59 = vadd.f32 %v772_v49, %v381_v46  ;;  %v830_v14 = vmax.f32 %v815_v52, %v822_v0  ;;  %v7621_v44 = vor.u32 %v9960_v33, %v7620_v32  ;;  %v6948_v45 = vld [vmem:[#allocation11 + $0x88] sm:$0xf] }
 0x16f   :  { %2520 = vmatpush.bf16.msra.mxu3 %v7333_v43  ;;  %v802_v57 = vpop.f32.mrf.mxu0  ;;  %v9952_v49 = vld [vmem:[#allocation11 + $0x5a4] sm:$0xf0]  ;;  %v7813_v52 = vor.u32 %v10008_v42, %v7812_v41  ;;  %v9812_v42 = vld [vmem:[#allocation11 + $0x14c] sm:$0xf] }
 0x170   :  { %v803_v60 = vadd.f32 %v802_v57, %v382_v30  ;;  %2401 = vmatmul.bf16.vlgmr.msra.gmra.mxu2 %v10898_v51  ;;  %v816_v55 = vpop.f32.mrf.mxu1  ;;  %v787_v7 = vadd.f32 %v786_v53, %v773_v59  ;;  %v9800_v30 = vld [vmem:[#allocation11 + $0xe4] sm:$0xf0]  ;;  %v7589_v59 = vor.u32 %v9952_v49, %v7588_v48  ;;  %v9860_v48 = vld [vmem:[#allocation11 + $0x2cc] sm:$0xf] }
 0x171   :  { %2505 = vmatpush.bf16.msra.mxu2 %v7109_v50  ;;  %v6981_v43 = vor.u32 %v9800_v30, %v6980_v29  ;;  %v7173_v50 = vor.u32 %v9848_v40, %v7172_v37  ;;  %v7140_v53 = vld [vmem:[#allocation11 + $0x208] sm:$0xf]  ;;  %v9820_v29 = vld [vmem:[#allocation11 + $0x18c] sm:$0xf] }
 0x172   :  { %v817_v1 = vadd.f32 %v816_v55, %v803_v60  ;;  %v821_v23 = vmul.f32 0.2, %v787_v7  ;;  %v10000_v57 = vld [vmem:[#allocation11 + $0x724] sm:$0xf0]  ;;  %v9892_v60 = vld [vmem:[#allocation11 + $0x3cc] sm:$0xf] }
 0x173   :  { %2521 = vmatpush.bf16.msra.mxu3 %v7301_v58  ;;  %v6949_v58 = vor.u32 %v9792_v47, %v6948_v45  ;;  %v9784_v55 = vld [vmem:[#allocation11 + $0x64] sm:$0xf0]  ;;  %v7781_v2 = vor.u32 %v10000_v57, %v7780_v56  ;;  %v7369_v3 = vor.u32 %v9892_v60, %v7366_v61  ;;  %v7078_v30 = vld [vmem:[#allocation11 + $0x1a8] sm:$0xf0] }
 0x174   :  { %v826_v8 = vmul.f32 0.2, %v817_v1  ;;  %v829_v38 = vmax.f32 %v787_v7, %v821_v23  ;;  %v9944_v0 = vld [vmem:[#allocation11 + $0x564] sm:$0xf0]  ;;  %v6917_v6 = vor.u32 %v9784_v55, %v6916_v62  ;;  %v7302_v23 = vld [vmem:[#allocation11 + $0x368] sm:$0xf0] }
 0x175   :  { %2506 = vmatpush.bf16.msra.mxu2 %v7077_v63  ;;  %v774_v11 = vpop.f32.mrf.mxu2  ;;  %v7556_v63 = vld [vmem:[#allocation11 + $0x548] sm:$0xf]  ;;  %v7270_v37 = vld [vmem:[#allocation11 + $0x328] sm:$0xf0] }
 0x176   :  { %v834_v15 = vmax.f32 %v817_v1, %v826_v8  ;;  %v775_v16 = vadd.f32 %v774_v11, %v381_v46  ;;  %v788_v19 = vpop.f32.mrf.mxu3  ;;  %v7141_v1 = vor.u32 %v9840_v54, %v7140_v53  ;;  %v7557_v7 = vor.u32 %v9944_v0, %v7556_v63  ;;  %v9884_v8 = vld [vmem:[#allocation11 + $0x38c] sm:$0xf]  ;;  %v9776_v11 = vld [vmem:[#allocation11 + $0x24] sm:$0xf0] }
 0x177   :  { %2522 = vmatpush.bf16.msra.mxu3 %v7269_v4  ;;  %v7748_v4 = vld [vmem:[#allocation11 + $0x6c8] sm:$0xf]  ;;  %v7337_v18 = vor.u32 %v9884_v8, %v7334_v9  ;;  %v7878_v53 = vld [vmem:[#allocation11 + $0x7e8] sm:$0xf0] }
 0x178   :  { %v10901_v24 = vpack.c.bf16 %v834_v15, %v830_v14  ;;  %v789_v25 = vadd.f32 %v788_v19, %v775_v16  ;;  %v9936_v14 = vld [vmem:[#allocation11 + $0x524] sm:$0xf0]  ;;  %v7749_v15 = vor.u32 %v9992_v5, %v7748_v4  ;;  %v9828_v16 = vld [vmem:[#allocation11 + $0x1cc] sm:$0xf] }
 0x179   :  { %2507 = vmatpush.bf16.msra.mxu2 %v7045_v13  ;;  %v7524_v13 = vld [vmem:[#allocation11 + $0x508] sm:$0xf]  ;;  %v7014_v60 = vld [vmem:[#allocation11 + $0x128] sm:$0xf0] }
 0x17a   :  { %v825_v31 = vmul.f32 0.2, %v789_v25  ;;  %2443 = vmatmul.bf16.vlgmr.msrb.gmra.mxu1 %v10901_v24  ;;  %2471 = vmatmul.bf16.vlgmr.msrb.gmra.mxu3 %v10894_v34  ;;  %v7716_v19 = vld [vmem:[#allocation11 + $0x688] sm:$0xf]  ;;  %v7525_v17 = vor.u32 %v9936_v14, %v7524_v13  ;;  %v9852_v55 = vld [vmem:[#allocation11 + $0x28c] sm:$0xf] }
 0x17b   :  { %2523 = vmatpush.bf16.msra.mxu3 %v7237_v20  ;;  %2547 = vmatpush.bf16.msrb.mxu1 %v7877_v21  ;;  %v9984_v20 = vld [vmem:[#allocation11 + $0x6a4] sm:$0xf0]  ;;  %v6885_v21 = vor.u32 %v9776_v11, %v6884_v10  ;;  %v7206_v0 = vld [vmem:[#allocation11 + $0x2a8] sm:$0xf0] }
 0x17c   :  { %v833_v39 = vmax.f32 %v789_v25, %v825_v31  ;;  %v7113_v25 = vor.u32 %v9828_v16, %v7110_v12  ;;  %v9928_v27 = vld [vmem:[#allocation11 + $0x4e4] sm:$0xf0]  ;;  %v7305_v31 = vor.u32 %v9876_v22, %v7302_v23  ;;  %v9956_v8 = vld [vmem:[#allocation11 + $0x5cc] sm:$0xf]  ;;  %v7209_v10 = vor.u32 %v9852_v55, %v7206_v0  ;;  %v7308_v55 = vld [vmem:[#allocation11 + $0x350] sm:$0xf] }
 0x17d   :  { %2508 = vmatpush.bf16.msra.mxu2 %v7013_v28  ;;  %v7717_v28 = vor.u32 %v9984_v20, %v7716_v19  ;;  %v7684_v32 = vld [vmem:[#allocation11 + $0x648] sm:$0xf]  ;;  %v7622_v9 = vld [vmem:[#allocation11 + $0x5e8] sm:$0xf0] }
 0x17e   :  { %v10905_v46 = vpack.c.bf16 %v833_v39, %v829_v38  ;;  %v9976_v33 = vld [vmem:[#allocation11 + $0x664] sm:$0xf0]  ;;  %v7081_v38 = vor.u32 %v9820_v29, %v7078_v30  ;;  %v9844_v13 = vld [vmem:[#allocation11 + $0x24c] sm:$0xf]  ;;  %v7625_v19 = vor.u32 %v9956_v8, %v7622_v9 }
 0x17f   :  { %2524 = vmatpush.bf16.msra.mxu3 %v7205_v35  ;;  %2548 = vmatpush.bf16.msrb.mxu1 %v7845_v36  ;;  %v7493_v35 = vor.u32 %v9928_v27, %v7492_v26  ;;  %v9868_v36 = vld [vmem:[#allocation11 + $0x30c] sm:$0xf]  ;;  %v7460_v39 = vld [vmem:[#allocation11 + $0x488] sm:$0xf]  ;;  %v7685_v41 = vor.u32 %v9976_v33, %v7684_v32  ;;  %v7372_v32 = vld [vmem:[#allocation11 + $0x3d0] sm:$0xf] }
 0x180   :  { %2429 = vmatmul.bf16.vlgmr.msrb.gmra.mxu0 %v10905_v46  ;;  %2457 = vmatmul.bf16.vlgmr.msrb.gmra.mxu2 %v10898_v51  ;;  %v9920_v40 = vld [vmem:[#allocation11 + $0x4a4] sm:$0xf0]  ;;  %v10004_v16 = vld [vmem:[#allocation11 + $0x74c] sm:$0xf]  ;;  %v9897_v33 = vld [vmem:[#allocation11 + $0x3ec] sm:$0xf0] }
 0x181   :  { %2509 = vmatpush.bf16.msra.mxu2 %v6981_v43  ;;  %2533 = vmatpush.bf16.msrb.mxu0 %v7621_v44  ;;  %v7046_v43 = vld [vmem:[#allocation11 + $0x168] sm:$0xf0]  ;;  %v7273_v44 = vor.u32 %v9868_v36, %v7270_v37  ;;  %v7652_v45 = vld [vmem:[#allocation11 + $0x608] sm:$0xf]  ;;  %v7461_v49 = vor.u32 %v9920_v40, %v7460_v39 }
 0x182   :  { %v9968_v47 = vld [vmem:[#allocation11 + $0x624] sm:$0xf0]  ;;  %v7049_v54 = vor.u32 %v9812_v42, %v7046_v43  ;;  %v7814_v12 = vld [vmem:[#allocation11 + $0x768] sm:$0xf0] }
 0x183   :  { %2525 = vmatpush.bf16.msra.mxu3 %v7173_v50  ;;  %2549 = vmatpush.bf16.msrb.mxu1 %v7813_v52  ;;  %v7238_v50 = vld [vmem:[#allocation11 + $0x2e8] sm:$0xf0]  ;;  %v7428_v56 = vld [vmem:[#allocation11 + $0x448] sm:$0xf] }
 0x184   :  { %v10020_v52 = vld [vmem:[#allocation11 + $0x7cc] sm:$0xf]  ;;  %v9912_v57 = vld [vmem:[#allocation11 + $0x464] sm:$0xf0]  ;;  %v7241_v61 = vor.u32 %v9860_v48, %v7238_v50  ;;  %v9889_v48 = vld [vmem:[#allocation11 + $0x3ac] sm:$0xf0] }
 0x185   :  { %2510 = vmatpush.bf16.msra.mxu2 %v6949_v58  ;;  %2534 = vmatpush.bf16.msrb.mxu0 %v7589_v59  ;;  %v7653_v58 = vor.u32 %v9968_v47, %v7652_v45  ;;  %v9804_v59 = vld [vmem:[#allocation11 + $0x10c] sm:$0xf]  ;;  %v7881_v62 = vor.u32 %v10020_v52, %v7878_v53  ;;  %v7429_v63 = vor.u32 %v9912_v57, %v7428_v56  ;;  %v7396_v4 = vld [vmem:[#allocation11 + $0x408] sm:$0xf]  ;;  %v7340_v47 = vld [vmem:[#allocation11 + $0x390] sm:$0xf] }
 0x186   :  { %v9904_v5 = vld [vmem:[#allocation11 + $0x424] sm:$0xf0]  ;;  %v9788_v20 = vld [vmem:[#allocation11 + $0x8c] sm:$0xf]  ;;  %v7116_v56 = vld [vmem:[#allocation11 + $0x1d0] sm:$0xf] }
 0x187   :  { %2526 = vmatpush.bf16.msra.mxu3 %v7141_v1  ;;  %2550 = vmatpush.bf16.msrb.mxu1 %v7781_v2  ;;  %v10012_v1 = vld [vmem:[#allocation11 + $0x78c] sm:$0xf]  ;;  %v7397_v14 = vor.u32 %v9904_v5, %v7396_v4  ;;  %v9833_v57 = vld [vmem:[#allocation11 + $0x1ec] sm:$0xf0] }
 0x188   :  { %v7846_v2 = vld [vmem:[#allocation11 + $0x7a8] sm:$0xf0]  ;;  %v7117_v0 = vor.u32 %v9833_v57, %v7116_v56  ;;  %v7084_v4 = vld [vmem:[#allocation11 + $0x190] sm:$0xf] }
 0x189   :  { %2511 = vmatpush.bf16.msra.mxu2 %v6917_v6  ;;  %2535 = vmatpush.bf16.msrb.mxu0 %v7557_v7  ;;  %v9796_v6 = vld [vmem:[#allocation11 + $0xcc] sm:$0xf]  ;;  %v7849_v11 = vor.u32 %v10012_v1, %v7846_v2  ;;  %v9825_v5 = vld [vmem:[#allocation11 + $0x1ac] sm:$0xf0] }
 0x18a   :  { %2499 = vmatmul.bf16.vlgmr.msra.gmra.mxu1 %v10901_v24  ;;  %2527 = vmatmul.bf16.vlgmr.msra.gmra.mxu3 %v10894_v34  ;;  %v6982_v7 = vld [vmem:[#allocation11 + $0xe8] sm:$0xf0] }
 0x18b   :  { %2575 = vmatpush.bf16.msrb.mxu3 %v7369_v3  ;;  %2551 = vmatpush.bf16.msrb.mxu1 %v7749_v15  ;;  %v7017_v3 = vor.u32 %v9804_v59, %v7014_v60  ;;  %v7174_v15 = vld [vmem:[#allocation11 + $0x268] sm:$0xf0] }
 0x18c   :  { %v7590_v22 = vld [vmem:[#allocation11 + $0x5a8] sm:$0xf0]  ;;  %v7177_v23 = vor.u32 %v9844_v13, %v7174_v15  ;;  %v7085_v13 = vor.u32 %v9825_v5, %v7084_v4  ;;  %v10001_v4 = vld [vmem:[#allocation11 + $0x72c] sm:$0xf0] }
 0x18d   :  { %2512 = vmatpush.bf16.msra.mxu2 %v6885_v21  ;;  %2536 = vmatpush.bf16.msrb.mxu0 %v7525_v17  ;;  %v6950_v21 = vld [vmem:[#allocation11 + $0xa8] sm:$0xf0] }
 0x18e   :  { %v9948_v17 = vld [vmem:[#allocation11 + $0x58c] sm:$0xf]  ;;  %v6953_v30 = vor.u32 %v9788_v20, %v6950_v21 }
 0x18f   :  { %2576 = vmatpush.bf16.msrb.mxu3 %v7337_v18  ;;  %2552 = vmatpush.bf16.msrb.mxu1 %v7717_v28  ;;  %v6985_v18 = vor.u32 %v9796_v6, %v6982_v7  ;;  %v9836_v26 = vld [vmem:[#allocation11 + $0x20c] sm:$0xf] }
 0x190   :  { %2485 = vmatmul.bf16.vlgmr.msra.gmra.mxu0 %v10905_v46  ;;  %2513 = vmatmul.bf16.vlgmr.msra.gmra.mxu2 %v10898_v51  ;;  %v7142_v27 = vld [vmem:[#allocation11 + $0x228] sm:$0xf0] }
 0x191   :  { %2561 = vmatpush.bf16.msrb.mxu2 %v7113_v25  ;;  %2537 = vmatpush.bf16.msrb.mxu0 %v7493_v35  ;;  %v7817_v25 = vor.u32 %v10004_v16, %v7814_v12  ;;  %v9996_v28 = vld [vmem:[#allocation11 + $0x70c] sm:$0xf]  ;;  %v7145_v39 = vor.u32 %v9836_v26, %v7142_v27  ;;  %v7052_v12 = vld [vmem:[#allocation11 + $0x150] sm:$0xf] }
 0x192   :  { %v7782_v29 = vld [vmem:[#allocation11 + $0x728] sm:$0xf0]  ;;  %v10025_v26 = vld [vmem:[#allocation11 + $0x7ec] sm:$0xf0] }
 0x193   :  { %2577 = vmatpush.bf16.msrb.mxu3 %v7305_v31  ;;  %2553 = vmatpush.bf16.msrb.mxu1 %v7685_v41  ;;  %v7593_v31 = vor.u32 %v9948_v17, %v7590_v22  ;;  %v9780_v35 = vld [vmem:[#allocation11 + $0x4c] sm:$0xf]  ;;  %v7785_v40 = vor.u32 %v9996_v28, %v7782_v29  ;;  %v7373_v41 = vor.u32 %v9897_v33, %v7372_v32  ;;  %v7244_v17 = vld [vmem:[#allocation11 + $0x2d0] sm:$0xf] }
 0x194   :  { %v6918_v36 = vld [vmem:[#allocation11 + $0x68] sm:$0xf0]  ;;  %v9809_v32 = vld [vmem:[#allocation11 + $0x12c] sm:$0xf0] }
 0x195   :  { %2562 = vmatpush.bf16.msrb.mxu2 %v7081_v38  ;;  %2538 = vmatpush.bf16.msrb.mxu0 %v7461_v49  ;;  %v9940_v37 = vld [vmem:[#allocation11 + $0x54c] sm:$0xf] }
 0x196   :  { %v7558_v38 = vld [vmem:[#allocation11 + $0x568] sm:$0xf0] }
 0x197   :  { %2578 = vmatpush.bf16.msrb.mxu3 %v7273_v44  ;;  %2554 = vmatpush.bf16.msrb.mxu1 %v7653_v58  ;;  %v9988_v42 = vld [vmem:[#allocation11 + $0x6cc] sm:$0xf]  ;;  %v6921_v44 = vor.u32 %v9780_v35, %v6918_v36  ;;  %v7561_v45 = vor.u32 %v9940_v37, %v7558_v38  ;;  %v7341_v58 = vor.u32 %v9889_v48, %v7340_v47  ;;  %v7212_v36 = vld [vmem:[#allocation11 + $0x290] sm:$0xf] }
 0x198   :  { %v7750_v43 = vld [vmem:[#allocation11 + $0x6e8] sm:$0xf0]  ;;  %v9857_v38 = vld [vmem:[#allocation11 + $0x2ac] sm:$0xf0] }
 0x199   :  { %2563 = vmatpush.bf16.msrb.mxu2 %v7049_v54  ;;  %2539 = vmatpush.bf16.msrb.mxu0 %v7429_v63  ;;  %v9772_v49 = vld [vmem:[#allocation11 + $0xc] sm:$0xf]  ;;  %v7753_v54 = vor.u32 %v9988_v42, %v7750_v43  ;;  %v9881_v63 = vld [vmem:[#allocation11 + $0x36c] sm:$0xf0] }
 0x19a   :  { %2555 = vmatmul.bf16.vlgmr.msrb.gmra.mxu1 %v10901_v24  ;;  %v6886_v50 = vld [vmem:[#allocation11 + $0x28] sm:$0xf0]  ;;  %v7309_v6 = vor.u32 %v9881_v63, %v7308_v55  ;;  %v7628_v47 = vld [vmem:[#allocation11 + $0x5d0] sm:$0xf] }
 0x19b   :  { %2579 = vmatpush.bf16.msrb.mxu3 %v7241_v61  ;;  %2603 = vmatpush.bf16.msra.mxu1 %v7881_v62  ;;  %v9932_v52 = vld [vmem:[#allocation11 + $0x50c] sm:$0xf]  ;;  %v6889_v61 = vor.u32 %v9772_v49, %v6886_v50  ;;  %v9961_v48 = vld [vmem:[#allocation11 + $0x5ec] sm:$0xf0]  ;;  %v7213_v49 = vor.u32 %v9857_v38, %v7212_v36  ;;  %v9877_v36 = vld [vmem:[#allocation11 + $0x354] sm:$0xf] }
 0x19c   :  { %v7526_v53 = vld [vmem:[#allocation11 + $0x528] sm:$0xf0]  ;;  %v7629_v57 = vor.u32 %v9961_v48, %v7628_v47  ;;  %v9953_v55 = vld [vmem:[#allocation11 + $0x5ac] sm:$0xf0]  ;;  %v7310_v38 = vld [vmem:[#allocation11 + $0x370] sm:$0xf0] }
 0x19d   :  { %2564 = vmatpush.bf16.msrb.mxu2 %v7017_v3  ;;  %2540 = vmatpush.bf16.msrb.mxu0 %v7397_v14  ;;  %v9980_v59 = vld [vmem:[#allocation11 + $0x68c] sm:$0xf]  ;;  %v7529_v62 = vor.u32 %v9932_v52, %v7526_v53  ;;  %v7180_v53 = vld [vmem:[#allocation11 + $0x250] sm:$0xf] }
 0x19e   :  { %v7718_v60 = vld [vmem:[#allocation11 + $0x6a8] sm:$0xf0]  ;;  %v7692_v47 = vld [vmem:[#allocation11 + $0x650] sm:$0xf] }
 0x19f   :  { %2580 = vmatpush.bf16.msrb.mxu3 %v7209_v10  ;;  %2604 = vmatpush.bf16.msra.mxu1 %v7849_v11  ;;  %v9924_v1 = vld [vmem:[#allocation11 + $0x4cc] sm:$0xf]  ;;  %v7721_v3 = vor.u32 %v9980_v59, %v7718_v60  ;;  %v7276_v10 = vld [vmem:[#allocation11 + $0x310] sm:$0xf] }
 0x1a0   :  { %2541 = vmatmul.bf16.vlgmr.msrb.gmra.mxu0 %v10905_v46  ;;  %v7494_v2 = vld [vmem:[#allocation11 + $0x4e8] sm:$0xf0]  ;;  %v9873_v11 = vld [vmem:[#allocation11 + $0x32c] sm:$0xf0] }
 0x1a1   :  { %2565 = vmatpush.bf16.msrb.mxu2 %v6985_v18  ;;  %2589 = vmatpush.bf16.msra.mxu0 %v7625_v19  ;;  %v9972_v7 = vld [vmem:[#allocation11 + $0x64c] sm:$0xf]  ;;  %v7497_v9 = vor.u32 %v9924_v1, %v7494_v2  ;;  %v9817_v18 = vld [vmem:[#allocation11 + $0x16c] sm:$0xf0]  ;;  %v7277_v19 = vor.u32 %v9873_v11, %v7276_v10 }
 0x1a2   :  { %v7686_v8 = vld [vmem:[#allocation11 + $0x668] sm:$0xf0]  ;;  %v7053_v27 = vor.u32 %v9817_v18, %v7052_v12  ;;  %v10009_v59 = vld [vmem:[#allocation11 + $0x76c] sm:$0xf0] }
 0x1a3   :  { %2581 = vmatpush.bf16.msrb.mxu3 %v7177_v23  ;;  %2605 = vmatpush.bf16.msra.mxu1 %v7817_v25  ;;  %v9916_v14 = vld [vmem:[#allocation11 + $0x48c] sm:$0xf]  ;;  %v7689_v16 = vor.u32 %v9972_v7, %v7686_v8  ;;  %v9865_v23 = vld [vmem:[#allocation11 + $0x2ec] sm:$0xf0]  ;;  %v9893_v7 = vld [vmem:[#allocation11 + $0x3d4] sm:$0xf] }
 0x1a4   :  { %v7462_v15 = vld [vmem:[#allocation11 + $0x4a8] sm:$0xf0]  ;;  %v7884_v25 = vld [vmem:[#allocation11 + $0x7d0] sm:$0xf]  ;;  %v7245_v33 = vor.u32 %v9865_v23, %v7244_v17  ;;  %v7374_v8 = vld [vmem:[#allocation11 + $0x3f0] sm:$0xf0] }
 0x1a5   :  { %2566 = vmatpush.bf16.msrb.mxu2 %v6953_v30  ;;  %2590 = vmatpush.bf16.msra.mxu0 %v7593_v31  ;;  %v9964_v20 = vld [vmem:[#allocation11 + $0x60c] sm:$0xf]  ;;  %v7465_v22 = vor.u32 %v9916_v14, %v7462_v15  ;;  %v7020_v31 = vld [vmem:[#allocation11 + $0x110] sm:$0xf]  ;;  %v7885_v35 = vor.u32 %v10025_v26, %v7884_v25  ;;  %v7342_v17 = vld [vmem:[#allocation11 + $0x3b0] sm:$0xf0] }
 0x1a6   :  { %v7654_v21 = vld [vmem:[#allocation11 + $0x628] sm:$0xf0]  ;;  %v6956_v60 = vld [vmem:[#allocation11 + $0x90] sm:$0xf] }
 0x1a7   :  { %2582 = vmatpush.bf16.msrb.mxu3 %v7145_v39  ;;  %2606 = vmatpush.bf16.msra.mxu1 %v7785_v40  ;;  %v9908_v28 = vld [vmem:[#allocation11 + $0x44c] sm:$0xf]  ;;  %v7657_v30 = vor.u32 %v9964_v20, %v7654_v21  ;;  %v7852_v39 = vld [vmem:[#allocation11 + $0x790] sm:$0xf]  ;;  %v9885_v21 = vld [vmem:[#allocation11 + $0x394] sm:$0xf] }
 0x1a8   :  { %v7430_v29 = vld [vmem:[#allocation11 + $0x468] sm:$0xf0]  ;;  %v10017_v40 = vld [vmem:[#allocation11 + $0x7ac] sm:$0xf0] }
 0x1a9   :  { %2567 = vmatpush.bf16.msrb.mxu2 %v6921_v44  ;;  %2591 = vmatpush.bf16.msra.mxu0 %v7561_v45  ;;  %v7433_v37 = vor.u32 %v9908_v28, %v7430_v29  ;;  %v9900_v42 = vld [vmem:[#allocation11 + $0x40c] sm:$0xf]  ;;  %v6988_v44 = vld [vmem:[#allocation11 + $0xd0] sm:$0xf]  ;;  %v7853_v50 = vor.u32 %v10017_v40, %v7852_v39  ;;  %v7118_v28 = vld [vmem:[#allocation11 + $0x1f0] sm:$0xf0] }
 0x1aa   :  { %2583 = vmatmul.bf16.vlgmr.msrb.gmra.mxu3 %v10894_v34  ;;  %v7398_v43 = vld [vmem:[#allocation11 + $0x428] sm:$0xf0]  ;;  %v9801_v45 = vld [vmem:[#allocation11 + $0xec] sm:$0xf0] }
 0x1ab   :  { %2631 = vmatpush.bf16.msra.mxu3 %v7373_v41  ;;  %2607 = vmatpush.bf16.msra.mxu1 %v7753_v54  ;;  %v7021_v41 = vor.u32 %v9809_v32, %v7020_v31  ;;  %v7401_v52 = vor.u32 %v9900_v42, %v7398_v43  ;;  %v9849_v54 = vld [vmem:[#allocation11 + $0x26c] sm:$0xf0]  ;;  %v6989_v56 = vor.u32 %v9801_v45, %v6988_v44  ;;  %v7086_v42 = vld [vmem:[#allocation11 + $0x1b0] sm:$0xf0] }
 0x1ac   :  { %v7181_v63 = vor.u32 %v9849_v54, %v7180_v53  ;;  %v9841_v2 = vld [vmem:[#allocation11 + $0x22c] sm:$0xf0]  ;;  %v7313_v44 = vor.u32 %v9877_v36, %v7310_v38  ;;  %v7598_v36 = vld [vmem:[#allocation11 + $0x5b0] sm:$0xf0] }
 0x1ad   :  { %2568 = vmatpush.bf16.msrb.mxu2 %v6889_v61  ;;  %2592 = vmatpush.bf16.msra.mxu0 %v7529_v62  ;;  %v9793_v61 = vld [vmem:[#allocation11 + $0xac] sm:$0xf0]  ;;  %v9837_v38 = vld [vmem:[#allocation11 + $0x214] sm:$0xf] }
 0x1ae   :  { %v7596_v62 = vld [vmem:[#allocation11 + $0x590] sm:$0xf]  ;;  %v6957_v5 = vor.u32 %v9793_v61, %v6956_v60 }
 0x1af   :  { %2632 = vmatpush.bf16.msra.mxu3 %v7341_v58  ;;  %2608 = vmatpush.bf16.msra.mxu1 %v7721_v3  ;;  %v7820_v58 = vld [vmem:[#allocation11 + $0x750] sm:$0xf] }
 0x1b0   :  { %2569 = vmatmul.bf16.vlgmr.msrb.gmra.mxu2 %v10898_v51  ;;  %v7821_v1 = vor.u32 %v10009_v59, %v7820_v58  ;;  %v7788_v3 = vld [vmem:[#allocation11 + $0x710] sm:$0xf] }
 0x1b1   :  { %2617 = vmatpush.bf16.msra.mxu2 %v7117_v0  ;;  %2593 = vmatpush.bf16.msra.mxu0 %v7497_v9  ;;  %v7148_v0 = vld [vmem:[#allocation11 + $0x210] sm:$0xf]  ;;  %v7789_v15 = vor.u32 %v10001_v4, %v7788_v3 }
 0x1b2   :  { %v6924_v9 = vld [vmem:[#allocation11 + $0x50] sm:$0xf]  ;;  %v7149_v14 = vor.u32 %v9841_v2, %v7148_v0  ;;  %v7886_v2 = vld [vmem:[#allocation11 + $0x7f0] sm:$0xf0] }
 0x1b3   :  { %2633 = vmatpush.bf16.msra.mxu3 %v7309_v6  ;;  %2609 = vmatpush.bf16.msra.mxu1 %v7689_v16  ;;  %v7597_v6 = vor.u32 %v9953_v55, %v7596_v62  ;;  %v9785_v10 = vld [vmem:[#allocation11 + $0x6c] sm:$0xf0]  ;;  %v7377_v16 = vor.u32 %v9893_v7, %v7374_v8  ;;  %v9861_v55 = vld [vmem:[#allocation11 + $0x2d4] sm:$0xf] }
 0x1b4   :  { %v7564_v11 = vld [vmem:[#allocation11 + $0x550] sm:$0xf] }
 0x1b5   :  { %2618 = vmatpush.bf16.msra.mxu2 %v7085_v13  ;;  %2594 = vmatpush.bf16.msra.mxu0 %v7465_v22  ;;  %v9945_v13 = vld [vmem:[#allocation11 + $0x56c] sm:$0xf0] }
 0x1b6   :  { %v7756_v12 = vld [vmem:[#allocation11 + $0x6d0] sm:$0xf]  ;;  %v7565_v20 = vor.u32 %v9945_v13, %v7564_v11  ;;  %v7214_v11 = vld [vmem:[#allocation11 + $0x2b0] sm:$0xf0] }
 0x1b7   :  { %2634 = vmatpush.bf16.msra.mxu3 %v7277_v19  ;;  %2610 = vmatpush.bf16.msra.mxu1 %v7657_v30  ;;  %v9993_v18 = vld [vmem:[#allocation11 + $0x6ec] sm:$0xf0]  ;;  %v6925_v19 = vor.u32 %v9785_v10, %v6924_v9  ;;  %v7345_v30 = vor.u32 %v9885_v21, %v7342_v17  ;;  %v9853_v10 = vld [vmem:[#allocation11 + $0x294] sm:$0xf] }
 0x1b8   :  { %v6892_v22 = vld [vmem:[#allocation11 + $0x10] sm:$0xf]  ;;  %v7757_v29 = vor.u32 %v9993_v18, %v7756_v12  ;;  %v9957_v21 = vld [vmem:[#allocation11 + $0x5d4] sm:$0xf] }
 0x1b9   :  { %2619 = vmatpush.bf16.msra.mxu2 %v7053_v27  ;;  %2595 = vmatpush.bf16.msra.mxu0 %v7433_v37  ;;  %v9777_v23 = vld [vmem:[#allocation11 + $0x2c] sm:$0xf0]  ;;  %v9829_v27 = vld [vmem:[#allocation11 + $0x1d4] sm:$0xf] }
 0x1ba   :  { %2611 = vmatmul.bf16.vlgmr.msra.gmra.mxu1 %v10901_v24  ;;  %v7532_v25 = vld [vmem:[#allocation11 + $0x510] sm:$0xf]  ;;  %v6893_v31 = vor.u32 %v9777_v23, %v6892_v22  ;;  %v7121_v37 = vor.u32 %v9829_v27, %v7118_v28  ;;  %v7630_v17 = vld [vmem:[#allocation11 + $0x5f0] sm:$0xf0]  ;;  %v7217_v22 = vor.u32 %v9853_v10, %v7214_v11  ;;  %v7316_v10 = vld [vmem:[#allocation11 + $0x358] sm:$0xf] }
 0x1bb   :  { %2635 = vmatpush.bf16.msra.mxu3 %v7245_v33  ;;  %2659 = vmatpush.bf16.msrb.mxu1 %v7885_v35  ;;  %v9937_v26 = vld [vmem:[#allocation11 + $0x52c] sm:$0xf0]  ;;  %v9845_v27 = vld [vmem:[#allocation11 + $0x254] sm:$0xf] }
 0x1bc   :  { %v7533_v32 = vor.u32 %v9937_v26, %v7532_v25  ;;  %v7724_v33 = vld [vmem:[#allocation11 + $0x690] sm:$0xf]  ;;  %v7182_v28 = vld [vmem:[#allocation11 + $0x270] sm:$0xf0] }
 0x1bd   :  { %2620 = vmatpush.bf16.msra.mxu2 %v7021_v41  ;;  %2596 = vmatpush.bf16.msra.mxu0 %v7401_v52  ;;  %v9985_v35 = vld [vmem:[#allocation11 + $0x6ac] sm:$0xf0]  ;;  %v9821_v41 = vld [vmem:[#allocation11 + $0x194] sm:$0xf] }
 0x1be   :  { %v7500_v39 = vld [vmem:[#allocation11 + $0x4d0] sm:$0xf]  ;;  %v7725_v43 = vor.u32 %v9985_v35, %v7724_v33  ;;  %v7278_v52 = vld [vmem:[#allocation11 + $0x330] sm:$0xf0] }
 0x1bf   :  { %2636 = vmatpush.bf16.msra.mxu3 %v7213_v49  ;;  %2660 = vmatpush.bf16.msrb.mxu1 %v7853_v50  ;;  %v9929_v40 = vld [vmem:[#allocation11 + $0x4ec] sm:$0xf0]  ;;  %v9869_v49 = vld [vmem:[#allocation11 + $0x314] sm:$0xf]  ;;  %v7089_v50 = vor.u32 %v9821_v41, %v7086_v42 }
 0x1c0   :  { %2597 = vmatmul.bf16.vlgmr.msra.gmra.mxu0 %v10905_v46  ;;  %v7501_v45 = vor.u32 %v9929_v40, %v7500_v39  ;;  %v9977_v48 = vld [vmem:[#allocation11 + $0x66c] sm:$0xf0]  ;;  %v7281_v60 = vor.u32 %v9869_v49, %v7278_v52  ;;  %v6958_v33 = vld [vmem:[#allocation11 + $0xb0] sm:$0xf0] }
 0x1c1   :  { %2621 = vmatpush.bf16.msra.mxu2 %v6989_v56  ;;  %2645 = vmatpush.bf16.msrb.mxu0 %v7629_v57  ;;  %v7468_v53 = vld [vmem:[#allocation11 + $0x490] sm:$0xf]  ;;  %v9813_v56 = vld [vmem:[#allocation11 + $0x154] sm:$0xf]  ;;  %v7693_v58 = vor.u32 %v9977_v48, %v7692_v47  ;;  %v9898_v47 = vld [vmem:[#allocation11 + $0x3f4] sm:$0xf0] }
 0x1c2   :  { %v9921_v54 = vld [vmem:[#allocation11 + $0x4ac] sm:$0xf0]  ;;  %v7054_v57 = vld [vmem:[#allocation11 + $0x170] sm:$0xf0] }
 0x1c3   :  { %2637 = vmatpush.bf16.msra.mxu3 %v7181_v63  ;;  %2661 = vmatpush.bf16.msrb.mxu1 %v7821_v1  ;;  %v7660_v59 = vld [vmem:[#allocation11 + $0x610] sm:$0xf]  ;;  %v7469_v61 = vor.u32 %v9921_v54, %v7468_v53  ;;  %v7246_v63 = vld [vmem:[#allocation11 + $0x2f0] sm:$0xf0]  ;;  %v7057_v0 = vor.u32 %v9813_v56, %v7054_v57 }
 0x1c4   :  { %v9969_v62 = vld [vmem:[#allocation11 + $0x62c] sm:$0xf0]  ;;  %v10021_v1 = vld [vmem:[#allocation11 + $0x7d4] sm:$0xf]  ;;  %v7249_v8 = vor.u32 %v9861_v55, %v7246_v63 }
 0x1c5   :  { %2622 = vmatpush.bf16.msra.mxu2 %v6957_v5  ;;  %2646 = vmatpush.bf16.msrb.mxu0 %v7597_v6  ;;  %v7436_v3 = vld [vmem:[#allocation11 + $0x450] sm:$0xf]  ;;  %v9805_v5 = vld [vmem:[#allocation11 + $0x114] sm:$0xf]  ;;  %v7661_v7 = vor.u32 %v9969_v62, %v7660_v59  ;;  %v7889_v9 = vor.u32 %v10021_v1, %v7886_v2  ;;  %v9890_v62 = vld [vmem:[#allocation11 + $0x3b4] sm:$0xf0] }
 0x1c6   :  { %v9913_v4 = vld [vmem:[#allocation11 + $0x46c] sm:$0xf0]  ;;  %v7022_v6 = vld [vmem:[#allocation11 + $0x130] sm:$0xf0]  ;;  %v7124_v2 = vld [vmem:[#allocation11 + $0x1d8] sm:$0xf] }
 0x1c7   :  { %2638 = vmatpush.bf16.msra.mxu3 %v7149_v14  ;;  %2662 = vmatpush.bf16.msrb.mxu1 %v7789_v15  ;;  %v7437_v13 = vor.u32 %v9913_v4, %v7436_v3  ;;  %v7025_v14 = vor.u32 %v9805_v5, %v7022_v6  ;;  %v10013_v15 = vld [vmem:[#allocation11 + $0x794] sm:$0xf]  ;;  %v7404_v12 = vld [vmem:[#allocation11 + $0x410] sm:$0xf]  ;;  %v9834_v3 = vld [vmem:[#allocation11 + $0x1f4] sm:$0xf0] }
 0x1c8   :  { %v9905_v18 = vld [vmem:[#allocation11 + $0x42c] sm:$0xf0]  ;;  %v9949_v35 = vld [vmem:[#allocation11 + $0x594] sm:$0xf]  ;;  %v7125_v11 = vor.u32 %v9834_v3, %v7124_v2  ;;  %v7188_v2 = vld [vmem:[#allocation11 + $0x258] sm:$0xf] }
 0x1c9   :  { %2623 = vmatpush.bf16.msra.mxu2 %v6925_v19  ;;  %2647 = vmatpush.bf16.msrb.mxu0 %v7565_v20  ;;  %v9797_v19 = vld [vmem:[#allocation11 + $0xd4] sm:$0xf]  ;;  %v7405_v25 = vor.u32 %v9905_v18, %v7404_v12  ;;  %v9826_v12 = vld [vmem:[#allocation11 + $0x1b4] sm:$0xf0] }
 0x1ca   :  { %2639 = vmatmul.bf16.vlgmr.msra.gmra.mxu3 %v10894_v34  ;;  %v6990_v20 = vld [vmem:[#allocation11 + $0xf0] sm:$0xf0]  ;;  %v9850_v3 = vld [vmem:[#allocation11 + $0x274] sm:$0xf0] }
 0x1cb   :  { %2687 = vmatpush.bf16.msrb.mxu3 %v7377_v16  ;;  %2663 = vmatpush.bf16.msrb.mxu1 %v7757_v29  ;;  %v7854_v16 = vld [vmem:[#allocation11 + $0x7b0] sm:$0xf0]  ;;  %v6993_v26 = vor.u32 %v9797_v19, %v6990_v20 }
 0x1cc   :  { %v7857_v23 = vor.u32 %v10013_v15, %v7854_v16  ;;  %v10005_v29 = vld [vmem:[#allocation11 + $0x754] sm:$0xf]  ;;  %v7092_v16 = vld [vmem:[#allocation11 + $0x198] sm:$0xf] }
 0x1cd   :  { %2624 = vmatpush.bf16.msra.mxu2 %v6893_v31  ;;  %2648 = vmatpush.bf16.msrb.mxu0 %v7533_v32  ;;  %v7822_v31 = vld [vmem:[#allocation11 + $0x770] sm:$0xf0] }
 0x1ce   :  { %v9789_v32 = vld [vmem:[#allocation11 + $0x94] sm:$0xf]  ;;  %v7825_v39 = vor.u32 %v10005_v29, %v7822_v31  ;;  %v9818_v29 = vld [vmem:[#allocation11 + $0x174] sm:$0xf0] }
 0x1cf   :  { %2688 = vmatpush.bf16.msrb.mxu3 %v7345_v30  ;;  %2664 = vmatpush.bf16.msrb.mxu1 %v7725_v43  ;;  %v7633_v30 = vor.u32 %v9957_v21, %v7630_v17  ;;  %v6961_v40 = vor.u32 %v9789_v32, %v6958_v33  ;;  %v7150_v41 = vld [vmem:[#allocation11 + $0x230] sm:$0xf0] }
 0x1d0   :  { %2625 = vmatmul.bf16.vlgmr.msra.gmra.mxu2 %v10898_v51  ;;  %v9997_v42 = vld [vmem:[#allocation11 + $0x714] sm:$0xf]  ;;  %v7153_v53 = vor.u32 %v9837_v38, %v7150_v41 }
 0x1d1   :  { %2673 = vmatpush.bf16.msrb.mxu2 %v7121_v37  ;;  %2649 = vmatpush.bf16.msrb.mxu0 %v7501_v45  ;;  %v7185_v37 = vor.u32 %v9845_v27, %v7182_v28  ;;  %v7790_v43 = vld [vmem:[#allocation11 + $0x730] sm:$0xf0]  ;;  %v7380_v45 = vld [vmem:[#allocation11 + $0x3d8] sm:$0xf] }
 0x1d2   :  { %v9781_v48 = vld [vmem:[#allocation11 + $0x54] sm:$0xf]  ;;  %v7793_v54 = vor.u32 %v9997_v42, %v7790_v43  ;;  %v7381_v56 = vor.u32 %v9898_v47, %v7380_v45  ;;  %v7060_v28 = vld [vmem:[#allocation11 + $0x158] sm:$0xf] }
 0x1d3   :  { %2689 = vmatpush.bf16.msrb.mxu3 %v7313_v44  ;;  %2665 = vmatpush.bf16.msrb.mxu1 %v7693_v58  ;;  %v7601_v44 = vor.u32 %v9949_v35, %v7598_v36  ;;  %v6926_v49 = vld [vmem:[#allocation11 + $0x70] sm:$0xf0]  ;;  %v7252_v36 = vld [vmem:[#allocation11 + $0x2d8] sm:$0xf]  ;;  %v7061_v38 = vor.u32 %v9818_v29, %v7060_v28 }
 0x1d4   :  { %v7566_v52 = vld [vmem:[#allocation11 + $0x570] sm:$0xf0]  ;;  %v6929_v59 = vor.u32 %v9781_v48, %v6926_v49  ;;  %v7028_v43 = vld [vmem:[#allocation11 + $0x118] sm:$0xf] }
 0x1d5   :  { %2674 = vmatpush.bf16.msrb.mxu2 %v7089_v50  ;;  %2650 = vmatpush.bf16.msrb.mxu0 %v7469_v61  ;;  %v9941_v50 = vld [vmem:[#allocation11 + $0x554] sm:$0xf]  ;;  %v7348_v61 = vld [vmem:[#allocation11 + $0x398] sm:$0xf] }
 0x1d6   :  { %v9989_v57 = vld [vmem:[#allocation11 + $0x6d4] sm:$0xf]  ;;  %v7349_v5 = vor.u32 %v9890_v62, %v7348_v61  ;;  %v7220_v49 = vld [vmem:[#allocation11 + $0x298] sm:$0xf] }
 0x1d7   :  { %2690 = vmatpush.bf16.msrb.mxu3 %v7281_v60  ;;  %2666 = vmatpush.bf16.msrb.mxu1 %v7661_v7  ;;  %v7758_v58 = vld [vmem:[#allocation11 + $0x6f0] sm:$0xf0]  ;;  %v7569_v60 = vor.u32 %v9941_v50, %v7566_v52  ;;  %v9858_v50 = vld [vmem:[#allocation11 + $0x2b4] sm:$0xf0] }
 0x1d8   :  { %v9773_v55 = vld [vmem:[#allocation11 + $0x14] sm:$0xf]  ;;  %v7761_v4 = vor.u32 %v9989_v57, %v7758_v58  ;;  %v7636_v61 = vld [vmem:[#allocation11 + $0x5d8] sm:$0xf] }
 0x1d9   :  { %2675 = vmatpush.bf16.msrb.mxu2 %v7057_v0  ;;  %2651 = vmatpush.bf16.msrb.mxu0 %v7437_v13  ;;  %v6894_v63 = vld [vmem:[#allocation11 + $0x30] sm:$0xf0]  ;;  %v9882_v13 = vld [vmem:[#allocation11 + $0x374] sm:$0xf0] }
 0x1da   :  { %2667 = vmatmul.bf16.vlgmr.msrb.gmra.mxu1 %v10901_v24  ;;  %v9933_v0 = vld [vmem:[#allocation11 + $0x514] sm:$0xf]  ;;  %v6897_v6 = vor.u32 %v9773_v55, %v6894_v63  ;;  %v7317_v19 = vor.u32 %v9882_v13, %v7316_v10  ;;  %v9962_v62 = vld [vmem:[#allocation11 + $0x5f4] sm:$0xf0]  ;;  %v7221_v55 = vor.u32 %v9858_v50, %v7220_v49 }
 0x1db   :  { %2691 = vmatpush.bf16.msrb.mxu3 %v7249_v8  ;;  %2715 = vmatpush.bf16.msra.mxu1 %v7889_v9  ;;  %v7534_v1 = vld [vmem:[#allocation11 + $0x530] sm:$0xf0]  ;;  %v9954_v10 = vld [vmem:[#allocation11 + $0x5b4] sm:$0xf0] }
 0x1dc   :  { %v7537_v7 = vor.u32 %v9933_v0, %v7534_v1  ;;  %v9981_v8 = vld [vmem:[#allocation11 + $0x694] sm:$0xf]  ;;  %v7156_v13 = vld [vmem:[#allocation11 + $0x218] sm:$0xf] }
 0x1dd   :  { %2676 = vmatpush.bf16.msrb.mxu2 %v7025_v14  ;;  %2652 = vmatpush.bf16.msrb.mxu0 %v7405_v25  ;;  %v7726_v9 = vld [vmem:[#allocation11 + $0x6b0] sm:$0xf0]  ;;  %v9874_v25 = vld [vmem:[#allocation11 + $0x334] sm:$0xf0] }
 0x1de   :  { %v9925_v14 = vld [vmem:[#allocation11 + $0x4d4] sm:$0xf]  ;;  %v7729_v18 = vor.u32 %v9981_v8, %v7726_v9  ;;  %v9794_v8 = vld [vmem:[#allocation11 + $0xb4] sm:$0xf0] }
 0x1df   :  { %2692 = vmatpush.bf16.msrb.mxu3 %v7217_v22  ;;  %2716 = vmatpush.bf16.msra.mxu1 %v7857_v23  ;;  %v7502_v15 = vld [vmem:[#allocation11 + $0x4f0] sm:$0xf0]  ;;  %v7284_v22 = vld [vmem:[#allocation11 + $0x318] sm:$0xf]  ;;  %v7093_v23 = vor.u32 %v9826_v12, %v7092_v16 }
 0x1e0   :  { %2653 = vmatmul.bf16.vlgmr.msrb.gmra.mxu0 %v10905_v46  ;;  %v7505_v20 = vor.u32 %v9925_v14, %v7502_v15  ;;  %v9973_v21 = vld [vmem:[#allocation11 + $0x654] sm:$0xf]  ;;  %v7285_v32 = vor.u32 %v9874_v25, %v7284_v22  ;;  %v7604_v9 = vld [vmem:[#allocation11 + $0x598] sm:$0xf] }
 0x1e1   :  { %2677 = vmatpush.bf16.msrb.mxu2 %v6993_v26  ;;  %2701 = vmatpush.bf16.msra.mxu0 %v7633_v30  ;;  %v7694_v17 = vld [vmem:[#allocation11 + $0x670] sm:$0xf0]  ;;  %v9842_v12 = vld [vmem:[#allocation11 + $0x234] sm:$0xf0] }
 0x1e2   :  { %v9917_v26 = vld [vmem:[#allocation11 + $0x494] sm:$0xf]  ;;  %v7697_v30 = vor.u32 %v9973_v21, %v7694_v17  ;;  %v9894_v21 = vld [vmem:[#allocation11 + $0x3dc] sm:$0xf]  ;;  %v6932_v22 = vld [vmem:[#allocation11 + $0x58] sm:$0xf] }
 0x1e3   :  { %2693 = vmatpush.bf16.msrb.mxu3 %v7185_v37  ;;  %2717 = vmatpush.bf16.msra.mxu1 %v7825_v39  ;;  %v7470_v27 = vld [vmem:[#allocation11 + $0x4b0] sm:$0xf0]  ;;  %v9866_v37 = vld [vmem:[#allocation11 + $0x2f4] sm:$0xf0]  ;;  %v7382_v17 = vld [vmem:[#allocation11 + $0x3f8] sm:$0xf0] }
 0x1e4   :  { %v9965_v31 = vld [vmem:[#allocation11 + $0x614] sm:$0xf]  ;;  %v7473_v33 = vor.u32 %v9917_v26, %v7470_v27  ;;  %v7892_v39 = vld [vmem:[#allocation11 + $0x7d8] sm:$0xf]  ;;  %v7253_v47 = vor.u32 %v9866_v37, %v7252_v36  ;;  %v7157_v27 = vor.u32 %v9842_v12, %v7156_v13  ;;  %v7385_v29 = vor.u32 %v9894_v21, %v7382_v17  ;;  %v7350_v36 = vld [vmem:[#allocation11 + $0x3b8] sm:$0xf0] }
 0x1e5   :  { %2678 = vmatpush.bf16.msrb.mxu2 %v6961_v40  ;;  %2702 = vmatpush.bf16.msra.mxu0 %v7601_v44  ;;  %v7662_v35 = vld [vmem:[#allocation11 + $0x630] sm:$0xf0]  ;;  %v10026_v40 = vld [vmem:[#allocation11 + $0x7f4] sm:$0xf0]  ;;  %v10022_v21 = vld [vmem:[#allocation11 + $0x7dc] sm:$0xf] }
 0x1e6   :  { %v9909_v41 = vld [vmem:[#allocation11 + $0x454] sm:$0xf]  ;;  %v9810_v44 = vld [vmem:[#allocation11 + $0x134] sm:$0xf0]  ;;  %v7665_v45 = vor.u32 %v9965_v31, %v7662_v35  ;;  %v7893_v48 = vor.u32 %v10026_v40, %v7892_v39  ;;  %v9886_v35 = vld [vmem:[#allocation11 + $0x39c] sm:$0xf] }
 0x1e7   :  { %2694 = vmatpush.bf16.msrb.mxu3 %v7153_v53  ;;  %2718 = vmatpush.bf16.msra.mxu1 %v7793_v54  ;;  %v7438_v42 = vld [vmem:[#allocation11 + $0x470] sm:$0xf0]  ;;  %v7029_v53 = vor.u32 %v9810_v44, %v7028_v43  ;;  %v7860_v54 = vld [vmem:[#allocation11 + $0x798] sm:$0xf]  ;;  %v7126_v43 = vld [vmem:[#allocation11 + $0x1f8] sm:$0xf0] }
 0x1e8   :  { %v7441_v52 = vor.u32 %v9909_v41, %v7438_v42  ;;  %v9901_v57 = vld [vmem:[#allocation11 + $0x414] sm:$0xf]  ;;  %v7572_v25 = vld [vmem:[#allocation11 + $0x558] sm:$0xf]  ;;  %v9830_v42 = vld [vmem:[#allocation11 + $0x1dc] sm:$0xf] }
 0x1e9   :  { %2679 = vmatpush.bf16.msrb.mxu2 %v6929_v59  ;;  %2703 = vmatpush.bf16.msra.mxu0 %v7569_v60  ;;  %v7406_v58 = vld [vmem:[#allocation11 + $0x430] sm:$0xf0]  ;;  %v6996_v59 = vld [vmem:[#allocation11 + $0xd8] sm:$0xf]  ;;  %v7894_v17 = vld [vmem:[#allocation11 + $0x7f8] sm:$0xf0] }
 0x1ea   :  { %2695 = vmatmul.bf16.vlgmr.msrb.gmra.mxu3 %v10894_v34  ;;  %v9802_v60 = vld [vmem:[#allocation11 + $0xf4] sm:$0xf0]  ;;  %v7409_v0 = vor.u32 %v9901_v57, %v7406_v58  ;;  %v7129_v57 = vor.u32 %v9830_v42, %v7126_v43  ;;  %v7318_v58 = vld [vmem:[#allocation11 + $0x378] sm:$0xf0] }
 0x1eb   :  { %2743 = vmatpush.bf16.msra.mxu3 %v7381_v56  ;;  %2719 = vmatpush.bf16.msra.mxu1 %v7761_v4  ;;  %v10018_v56 = vld [vmem:[#allocation11 + $0x7b4] sm:$0xf0]  ;;  %v6997_v1 = vor.u32 %v9802_v60, %v6996_v59  ;;  %v9798_v43 = vld [vmem:[#allocation11 + $0xdc] sm:$0xf] }
 0x1ec   :  { %v7861_v63 = vor.u32 %v10018_v56, %v7860_v54  ;;  %v7828_v4 = vld [vmem:[#allocation11 + $0x758] sm:$0xf] }
 0x1ed   :  { %2680 = vmatpush.bf16.msrb.mxu2 %v6897_v6  ;;  %2704 = vmatpush.bf16.msra.mxu0 %v7537_v7  ;;  %v10010_v6 = vld [vmem:[#allocation11 + $0x774] sm:$0xf0] }
 0x1ee   :  { %v6964_v7 = vld [vmem:[#allocation11 + $0x98] sm:$0xf]  ;;  %v7829_v15 = vor.u32 %v10010_v6, %v7828_v4 }
 0x1ef   :  { %2744 = vmatpush.bf16.msra.mxu3 %v7349_v5  ;;  %2720 = vmatpush.bf16.msra.mxu1 %v7729_v18  ;;  %v7637_v5 = vor.u32 %v9962_v62, %v7636_v61  ;;  %v6965_v16 = vor.u32 %v9794_v8, %v6964_v7  ;;  %v7796_v18 = vld [vmem:[#allocation11 + $0x718] sm:$0xf]  ;;  %v9822_v61 = vld [vmem:[#allocation11 + $0x19c] sm:$0xf] }
 0x1f0   :  { %2681 = vmatmul.bf16.vlgmr.msrb.gmra.mxu2 %v10898_v51  ;;  %v9946_v26 = vld [vmem:[#allocation11 + $0x574] sm:$0xf0]  ;;  %v7094_v62 = vld [vmem:[#allocation11 + $0x1b8] sm:$0xf0] }
 0x1f1   :  { %2729 = vmatpush.bf16.msra.mxu2 %v7125_v11  ;;  %2705 = vmatpush.bf16.msra.mxu0 %v7505_v20  ;;  %v7189_v11 = vor.u32 %v9850_v3, %v7188_v2  ;;  %v7605_v20 = vor.u32 %v9954_v10, %v7604_v9  ;;  %v9994_v31 = vld [vmem:[#allocation11 + $0x6f4] sm:$0xf0]  ;;  %v9870_v3 = vld [vmem:[#allocation11 + $0x31c] sm:$0xf]  ;;  %v7097_v4 = vor.u32 %v9822_v61, %v7094_v62 }
 0x1f2   :  { %v6900_v37 = vld [vmem:[#allocation11 + $0x18] sm:$0xf]  ;;  %v9814_v8 = vld [vmem:[#allocation11 + $0x15c] sm:$0xf] }
 0x1f3   :  { %2745 = vmatpush.bf16.msra.mxu3 %v7317_v19  ;;  %2721 = vmatpush.bf16.msra.mxu1 %v7697_v30  ;;  %v10926_v14 = vpop.f32.mrf.mxu2  ;;  %v10002_v19 = vld [vmem:[#allocation11 + $0x734] sm:$0xf0]  ;;  %v7062_v9 = vld [vmem:[#allocation11 + $0x178] sm:$0xf0] }
 0x1f4   :  { %v7797_v28 = vor.u32 %v10002_v19, %v7796_v18  ;;  %v7764_v30 = vld [vmem:[#allocation11 + $0x6d8] sm:$0xf]  ;;  %v9862_v18 = vld [vmem:[#allocation11 + $0x2dc] sm:$0xf] }
 0x1f5   :  { %2730 = vmatpush.bf16.msra.mxu2 %v7093_v23  ;;  %2706 = vmatpush.bf16.msra.mxu0 %v7473_v33  ;;  %v9786_v23 = vld [vmem:[#allocation11 + $0x74] sm:$0xf0]  ;;  %v7573_v33 = vor.u32 %v9946_v26, %v7572_v25  ;;  %v7765_v44 = vor.u32 %v9994_v31, %v7764_v30  ;;  %v7254_v19 = vld [vmem:[#allocation11 + $0x2f8] sm:$0xf0] }
 0x1f6   :  { %v9778_v39 = vld [vmem:[#allocation11 + $0x34] sm:$0xf0]  ;;  %v9806_v26 = vld [vmem:[#allocation11 + $0x11c] sm:$0xf]  ;;  %v7257_v31 = vor.u32 %v9862_v18, %v7254_v19 }
 0x1f7   :  { %2746 = vmatpush.bf16.msra.mxu3 %v7285_v32  ;;  %2722 = vmatpush.bf16.msra.mxu1 %v7665_v45  ;;  %v6933_v32 = vor.u32 %v9786_v23, %v6932_v22  ;;  %v7540_v40 = vld [vmem:[#allocation11 + $0x518] sm:$0xf]  ;;  %v7353_v45 = vor.u32 %v9886_v35, %v7350_v36  ;;  %v7222_v35 = vld [vmem:[#allocation11 + $0x2b8] sm:$0xf0] }
 0x1f8   :  { %v9938_v41 = vld [vmem:[#allocation11 + $0x534] sm:$0xf0]  ;;  %v7830_v62 = vld [vmem:[#allocation11 + $0x778] sm:$0xf0] }
 0x1f9   :  { %2731 = vmatpush.bf16.msra.mxu2 %v7061_v38  ;;  %2707 = vmatpush.bf16.msra.mxu0 %v7441_v52  ;;  %v10929_v38 = vpop.f32.mrf.mxu3  ;;  %v7541_v49 = vor.u32 %v9938_v41, %v7540_v40  ;;  %v7732_v50 = vld [vmem:[#allocation11 + $0x698] sm:$0xf]  ;;  %v7862_v40 = vld [vmem:[#allocation11 + $0x7b8] sm:$0xf0] }
 0x1fa   :  { %2723 = vmatmul.bf16.vlgmr.msra.gmra.mxu1 %v10901_v24  ;;  %v9986_v52 = vld [vmem:[#allocation11 + $0x6b4] sm:$0xf0]  ;;  %v9782_v18 = vld [vmem:[#allocation11 + $0x5c] sm:$0xf] }
 0x1fb   :  { %2747 = vmatpush.bf16.msra.mxu3 %v7253_v47  ;;  %2771 = vmatpush.bf16.msrb.mxu1 %v7893_v48  ;;  %v10931_v47 = vpop.f32.mrf.mxu1  ;;  %v6901_v48 = vor.u32 %v9778_v39, %v6900_v37  ;;  %v10933_v54 = vpop.f32.mrf.mxu2  ;;  %v7508_v59 = vld [vmem:[#allocation11 + $0x4d8] sm:$0xf]  ;;  %v10014_v39 = vld [vmem:[#allocation11 + $0x79c] sm:$0xf] }
 0x1fc   :  { %v9930_v60 = vld [vmem:[#allocation11 + $0x4f4] sm:$0xf0]  ;;  %v6934_v19 = vld [vmem:[#allocation11 + $0x78] sm:$0xf0] }
 0x1fd   :  { %2732 = vmatpush.bf16.msra.mxu2 %v7029_v53  ;;  %2708 = vmatpush.bf16.msra.mxu0 %v7409_v0  ;;  %v9878_v53 = vld [vmem:[#allocation11 + $0x35c] sm:$0xf]  ;;  %v10935_v56 = vpop.f32.mrf.mxu0  ;;  %v7509_v0 = vor.u32 %v9930_v60, %v7508_v59  ;;  %v9978_v2 = vld [vmem:[#allocation11 + $0x674] sm:$0xf0] }
 0x1fe   :  { %v7476_v6 = vld [vmem:[#allocation11 + $0x498] sm:$0xf]  ;;  %v7190_v59 = vld [vmem:[#allocation11 + $0x278] sm:$0xf0] }
 0x1ff   :  { %2748 = vmatpush.bf16.msra.mxu3 %v7221_v55  ;;  %2772 = vmatpush.bf16.msrb.mxu1 %v7861_v63  ;;  %v7733_v55 = vor.u32 %v9986_v52, %v7732_v50  ;;  %v7321_v63 = vor.u32 %v9878_v53, %v7318_v58  ;;  %v9922_v7 = vld [vmem:[#allocation11 + $0x4b4] sm:$0xf0]  ;;  %v7865_v50 = vor.u32 %v10014_v39, %v7862_v40  ;;  %v9846_v58 = vld [vmem:[#allocation11 + $0x25c] sm:$0xf] }
 0x200   :  { %2709 = vmatmul.bf16.vlgmr.msra.gmra.mxu0 %v10905_v46  ;;  %v7668_v13 = vld [vmem:[#allocation11 + $0x618] sm:$0xf]  ;;  %v10006_v60 = vld [vmem:[#allocation11 + $0x75c] sm:$0xf] }
 0x201   :  { %2733 = vmatpush.bf16.msra.mxu2 %v6997_v1  ;;  %2757 = vmatpush.bf16.msrb.mxu0 %v7637_v5  ;;  %v7700_v1 = vld [vmem:[#allocation11 + $0x658] sm:$0xf]  ;;  %v7286_v5 = vld [vmem:[#allocation11 + $0x338] sm:$0xf0]  ;;  %v10938_v10 = vpop.f32.mrf.mxu3 }
 0x202   :  { %v9970_v12 = vld [vmem:[#allocation11 + $0x634] sm:$0xf0]  ;;  %v9934_v39 = vld [vmem:[#allocation11 + $0x51c] sm:$0xf] }
 0x203   :  { %2749 = vmatpush.bf16.msra.mxu3 %v7189_v11  ;;  %2773 = vmatpush.bf16.msrb.mxu1 %v7829_v15  ;;  %v7701_v11 = vor.u32 %v9978_v2, %v7700_v1  ;;  %v7289_v15 = vor.u32 %v9870_v3, %v7286_v5  ;;  %v7444_v22 = vld [vmem:[#allocation11 + $0x458] sm:$0xf]  ;;  %v10941_v23 = vpop.f32.mrf.mxu1  ;;  %v7669_v30 = vor.u32 %v9970_v12, %v7668_v13  ;;  %v7606_v1 = vld [vmem:[#allocation11 + $0x5b8] sm:$0xf0]  ;;  %v10135_v12 = vld [vmem:[#allocation14 + $0x360] sm:$0xf0] }
 0x204   :  { %v9914_v25 = vld [vmem:[#allocation11 + $0x474] sm:$0xf0]  ;;  %v7193_v3 = vor.u32 %v9846_v58, %v7190_v59  ;;  %v7798_v13 = vld [vmem:[#allocation11 + $0x738] sm:$0xf0]  ;;  %v8264_v59 = vld [vmem:[#allocation14 + $0x2d8] sm:$0xf] }
 0x205   :  { %2734 = vmatpush.bf16.msra.mxu2 %v6965_v16  ;;  %2758 = vmatpush.bf16.msrb.mxu0 %v7605_v20  ;;  %v7477_v16 = vor.u32 %v9922_v7, %v7476_v6  ;;  %v7065_v20 = vor.u32 %v9814_v8, %v7062_v9  ;;  %v7445_v36 = vor.u32 %v9914_v25, %v7444_v22  ;;  %v7412_v41 = vld [vmem:[#allocation11 + $0x418] sm:$0xf]  ;;  %v7158_v9 = vld [vmem:[#allocation11 + $0x238] sm:$0xf0] }
 0x206   :  { %v9906_v42 = vld [vmem:[#allocation11 + $0x434] sm:$0xf0]  ;;  %v7833_v7 = vor.u32 %v10006_v60, %v7830_v62  ;;  %v7542_v40 = vld [vmem:[#allocation11 + $0x538] sm:$0xf0] }
 0x207   :  { %2750 = vmatpush.bf16.msra.mxu3 %v7157_v27  ;;  %2774 = vmatpush.bf16.msrb.mxu1 %v7797_v28  ;;  %v7030_v27 = vld [vmem:[#allocation11 + $0x138] sm:$0xf0]  ;;  %v10943_v28 = vpop.f32.mrf.mxu2  ;;  %v7413_v53 = vor.u32 %v9906_v42, %v7412_v41  ;;  %v10959_v41 = vld [vmem:[#allocation13] sm:$0xff]  ;;  %v8096_v42 = vld [vmem:[#allocation14 + $0x188] sm:$0xf] }
 0x208   :  { %v7033_v37 = vor.u32 %v9806_v26, %v7030_v27  ;;  %v9990_v26 = vld [vmem:[#allocation11 + $0x6dc] sm:$0xf] }
 0x209   :  { %2735 = vmatpush.bf16.msra.mxu2 %v6933_v32  ;;  %2759 = vmatpush.bf16.msrb.mxu0 %v7573_v33  ;;  %v7897_v32 = vor.u32 %v10022_v21, %v7894_v17  ;;  %v9854_v33 = vld [vmem:[#allocation11 + $0x29c] sm:$0xf]  ;;  %v10947_v52 = vpop.f32.mrf.mxu3 }
 0x20a   :  { %2751 = vmatmul.bf16.vlgmr.msra.gmra.mxu3 %v10894_v34  ;;  %v7574_v21 = vld [vmem:[#allocation11 + $0x578] sm:$0xf0] }
 0x20b   :  { %2799 = vmatpush.bf16.msrb.mxu3 %v7385_v29  ;;  %2775 = vmatpush.bf16.msrb.mxu1 %v7765_v44  ;;  %v10945_v29 = vpop.f32.mrf.mxu0  ;;  %v6998_v44 = vld [vmem:[#allocation11 + $0xf8] sm:$0xf0]  ;;  %v10950_v2 = vpop.f32.mrf.mxu1 }
 0x20c   :  { %v7766_v27 = vld [vmem:[#allocation11 + $0x6f8] sm:$0xf0] }
 0x20d   :  { %2736 = vmatpush.bf16.msra.mxu2 %v6901_v48  ;;  %2760 = vmatpush.bf16.msrb.mxu0 %v7541_v49  ;;  %v7638_v48 = vld [vmem:[#allocation11 + $0x5f8] sm:$0xf0]  ;;  %v7225_v49 = vor.u32 %v9854_v33, %v7222_v35  ;;  %v10128_v33 = vld [vmem:[#allocation14 + $0x328] sm:$0xf0] }
 0x20e   :  { %v9774_v35 = vld [vmem:[#allocation11 + $0x1c] sm:$0xf] }
 0x20f   :  { %2800 = vmatpush.bf16.msrb.mxu3 %v7353_v45  ;;  %2776 = vmatpush.bf16.msrb.mxu1 %v7733_v55  ;;  %v9958_v45 = vld [vmem:[#allocation11 + $0x5dc] sm:$0xf]  ;;  %v10952_v5 = vpop.f32.mrf.mxu2 }
 0x210   :  { %2737 = vmatmul.bf16.vlgmr.msra.gmra.mxu2 %v10898_v51  ;;  %v7641_v61 = vor.u32 %v9958_v45, %v7638_v48  ;;  %v9790_v55 = vld [vmem:[#allocation11 + $0x9c] sm:$0xf]  ;;  %v7769_v45 = vor.u32 %v9990_v26, %v7766_v27 }
 0x211   :  { %2785 = vmatpush.bf16.msrb.mxu2 %v7129_v57  ;;  %2761 = vmatpush.bf16.msrb.mxu0 %v7509_v0  ;;  %v7001_v57 = vor.u32 %v9798_v43, %v6998_v44  ;;  %v9950_v0 = vld [vmem:[#allocation11 + $0x59c] sm:$0xf]  ;;  %v10079_v43 = vld [vmem:[#allocation14 + $0x1a0] sm:$0xf0]  ;;  %v1098_v44 = vperm.slane %v10959_v41, 1 }
 0x212   :  { %v7734_v58 = vld [vmem:[#allocation11 + $0x6b8] sm:$0xf0]  ;;  %v8097_v62 = vor.u32 %v10079_v43, %v8096_v42  ;;  %v10058_v43 = vld [vmem:[#allocation14 + $0xf8] sm:$0xf0] }
 0x213   :  { %2801 = vmatpush.bf16.msrb.mxu3 %v7321_v63  ;;  %2777 = vmatpush.bf16.msrb.mxu1 %v7701_v11  ;;  %v6966_v63 = vld [vmem:[#allocation11 + $0xb8] sm:$0xf0]  ;;  %v10954_v6 = vpop.f32.mrf.mxu0 }
 0x214   :  { %v6969_v8 = vor.u32 %v9790_v55, %v6966_v63  ;;  %v9998_v11 = vld [vmem:[#allocation11 + $0x71c] sm:$0xf] }
 0x215   :  { %2786 = vmatpush.bf16.msrb.mxu2 %v7097_v4  ;;  %2762 = vmatpush.bf16.msrb.mxu0 %v7477_v16  ;;  %v9838_v4 = vld [vmem:[#allocation11 + $0x21c] sm:$0xf]  ;;  %v8320_v16 = vld [vmem:[#allocation14 + $0x348] sm:$0xf]  ;;  %v7801_v22 = vor.u32 %v9998_v11, %v7798_v13 }
 0x216   :  { %v7161_v17 = vor.u32 %v9838_v4, %v7158_v9  ;;  %v8321_v25 = vor.u32 %v10135_v12, %v8320_v16  ;;  %v10121_v55 = vld [vmem:[#allocation14 + $0x2f0] sm:$0xf0]  ;;  %v1097_v4 = vperm.slane %v10959_v41, 0  ;;  %v10114_v12 = vld [vmem:[#allocation14 + $0x2b8] sm:$0xf0] }
 0x217   :  { %2802 = vmatpush.bf16.msrb.mxu3 %v7289_v15  ;;  %2778 = vmatpush.bf16.msrb.mxu1 %v7669_v30  ;;  %v7609_v15 = vor.u32 %v9950_v0, %v7606_v1  ;;  %v6937_v30 = vor.u32 %v9782_v18, %v6934_v19  ;;  %v10964_v60 = vpop.f32.mrf.mxu2  ;;  %v9926_v63 = vld [vmem:[#allocation11 + $0x4dc] sm:$0xf]  ;;  %v8068_v1 = vld [vmem:[#allocation14 + $0x150] sm:$0xf] }
 0x218   :  { %v7510_v0 = vld [vmem:[#allocation11 + $0x4f8] sm:$0xf0] }
 0x219   :  { %2787 = vmatpush.bf16.msrb.mxu2 %v7065_v20  ;;  %2763 = vmatpush.bf16.msrb.mxu0 %v7445_v36  ;;  %v9942_v20 = vld [vmem:[#allocation11 + $0x55c] sm:$0xf]  ;;  %v10957_v36 = vpop.f32.mrf.mxu3  ;;  %v7513_v9 = vor.u32 %v9926_v63, %v7510_v0 }
 0x21a   :  { %2779 = vmatmul.bf16.vlgmr.msrb.gmra.mxu1 %v10901_v24  ;;  %v9974_v11 = vld [vmem:[#allocation11 + $0x65c] sm:$0xf] }
 0x21b   :  { %2803 = vmatpush.bf16.msrb.mxu3 %v7257_v31  ;;  %2827 = vmatpush.bf16.msra.mxu1 %v7897_v32  ;;  %v7577_v31 = vor.u32 %v9942_v20, %v7574_v21  ;;  %v8292_v32 = vld [vmem:[#allocation14 + $0x310] sm:$0xf]  ;;  %v7702_v13 = vld [vmem:[#allocation11 + $0x678] sm:$0xf0]  ;;  %v8040_v20 = vld [vmem:[#allocation14 + $0x118] sm:$0xf] }
 0x21c   :  { %v8293_v48 = vor.u32 %v10128_v33, %v8292_v32  ;;  %v9918_v18 = vld [vmem:[#allocation11 + $0x49c] sm:$0xf]  ;;  %v10107_v32 = vld [vmem:[#allocation14 + $0x280] sm:$0xf0]  ;;  %v2403_v33 = vadd.f32 %v10926_v14, %v1097_v4 }
 0x21d   :  { %2788 = vmatpush.bf16.msrb.mxu2 %v7033_v37  ;;  %2764 = vmatpush.bf16.msrb.mxu0 %v7413_v53  ;;  %v6902_v37 = vld [vmem:[#allocation11 + $0x38] sm:$0xf0]  ;;  %v7545_v53 = vor.u32 %v9934_v39, %v7542_v40  ;;  %v8012_v40 = vld [vmem:[#allocation14 + $0xe0] sm:$0xf] }
 0x21e   :  { %v7478_v19 = vld [vmem:[#allocation11 + $0x4b8] sm:$0xf0] }
 0x21f   :  { %2804 = vmatpush.bf16.msrb.mxu3 %v7225_v49  ;;  %2828 = vmatpush.bf16.msra.mxu1 %v7865_v50  ;;  %v10962_v49 = vpop.f32.mrf.mxu1  ;;  %v6905_v50 = vor.u32 %v9774_v35, %v6902_v37  ;;  %v10065_v21 = vld [vmem:[#allocation14 + $0x130] sm:$0xf0] }
 0x220   :  { %2765 = vmatmul.bf16.vlgmr.msrb.gmra.mxu0 %v10905_v46  ;;  %v9966_v26 = vld [vmem:[#allocation11 + $0x61c] sm:$0xf] }
 0x221   :  { %2789 = vmatpush.bf16.msrb.mxu2 %v7001_v57  ;;  %2813 = vmatpush.bf16.msra.mxu0 %v7641_v61  ;;  %v9982_v57 = vld [vmem:[#allocation11 + $0x69c] sm:$0xf]  ;;  %v10966_v61 = vpop.f32.mrf.mxu0 }
 0x222   :  { %v9910_v37 = vld [vmem:[#allocation11 + $0x45c] sm:$0xf] }
 0x223   :  { %2805 = vmatpush.bf16.msrb.mxu3 %v7193_v3  ;;  %2829 = vmatpush.bf16.msra.mxu1 %v7833_v7  ;;  %v10072_v3 = vld [vmem:[#allocation14 + $0x168] sm:$0xf0]  ;;  %v7737_v7 = vor.u32 %v9982_v57, %v7734_v58  ;;  %v7446_v39 = vld [vmem:[#allocation11 + $0x478] sm:$0xf0] }
 0x224   :  { %v8069_v16 = vor.u32 %v10072_v3, %v8068_v1  ;;  %v7449_v58 = vor.u32 %v9910_v37, %v7446_v39  ;;  %v9902_v63 = vld [vmem:[#allocation11 + $0x41c] sm:$0xf]  ;;  %v7984_v1 = vld [vmem:[#allocation14 + $0xa8] sm:$0xf] }
 0x225   :  { %2790 = vmatpush.bf16.msrb.mxu2 %v6969_v8  ;;  %2814 = vmatpush.bf16.msra.mxu0 %v7609_v15  ;;  %v8265_v8 = vor.u32 %v10121_v55, %v8264_v59  ;;  %v8236_v15 = vld [vmem:[#allocation14 + $0x2a0] sm:$0xf]  ;;  %v10100_v59 = vld [vmem:[#allocation14 + $0x248] sm:$0xf0] }
 0x226   :  { %v8237_v27 = vor.u32 %v10114_v12, %v8236_v15 }
 0x227   :  { %2806 = vmatpush.bf16.msrb.mxu3 %v7161_v17  ;;  %2830 = vmatpush.bf16.msra.mxu1 %v7801_v22  ;;  %v2461_v17 = vadd.f32 %v10952_v5, %v1098_v44  ;;  %v10972_v22 = vpop.f32.mrf.mxu3  ;;  %v8041_v5 = vor.u32 %v10065_v21, %v8040_v20  ;;  %v10978_v42 = vpop.f32.mrf.mxu1  ;;  %v8516_v21 = vld [vmem:[#allocation14 + $0x4d0] sm:$0xf] }
 0x229   :  { %2791 = vmatpush.bf16.msrb.mxu2 %v6937_v30  ;;  %2815 = vmatpush.bf16.msra.mxu0 %v7577_v31  ;;  %v7670_v30 = vld [vmem:[#allocation11 + $0x638] sm:$0xf0]  ;;  %v8208_v31 = vld [vmem:[#allocation14 + $0x268] sm:$0xf]  ;;  %v10984_v14 = vpop.f32.mrf.mxu0 }
 0x22a   :  { %2807 = vmatmul.bf16.vlgmr.msrb.gmra.mxu3 %v10894_v34  ;;  %v2459_v34 = vadd.f32 %v10943_v28, %v1098_v44  ;;  %v7481_v28 = vor.u32 %v9918_v18, %v7478_v19  ;;  %v8768_v44 = vld [vmem:[#allocation14 + $0x6c8] sm:$0xf]  ;;  %v8209_v57 = vor.u32 %v10107_v32, %v8208_v31  ;;  %v10093_v18 = vld [vmem:[#allocation14 + $0x210] sm:$0xf0]  ;;  %v7956_v19 = vld [vmem:[#allocation14 + $0x70] sm:$0xf] }
 0x22b   :  { %5727 = vmatpush.bf16.msra.mxu3 %v8321_v25  ;;  %2831 = vmatpush.bf16.msra.mxu1 %v7769_v45  ;;  %v7705_v25 = vor.u32 %v9974_v11, %v7702_v13  ;;  %v10247_v45 = vld [vmem:[#allocation14 + $0x6e0] sm:$0xf0]  ;;  %v10240_v13 = vld [vmem:[#allocation14 + $0x6a8] sm:$0xf0]  ;;  %v1100_v31 = vperm.slane %v10959_v41, 3 }
 0x22c   :  { %v2473_v35 = vadd.f32 %v10947_v52, %v2459_v34  ;;  %v7673_v52 = vor.u32 %v9966_v26, %v7670_v30  ;;  %v8769_v0 = vor.u32 %v10247_v45, %v8768_v44  ;;  %v8488_v44 = vld [vmem:[#allocation14 + $0x498] sm:$0xf]  ;;  %v10177_v45 = vld [vmem:[#allocation14 + $0x4b0] sm:$0xf0] }
 0x22d   :  { %2792 = vmatpush.bf16.msrb.mxu2 %v6905_v50  ;;  %2816 = vmatpush.bf16.msra.mxu0 %v7545_v53  ;;  %v2475_v50 = vadd.f32 %v10957_v36, %v2461_v17  ;;  %v10982_v53 = vpop.f32.mrf.mxu2  ;;  %v7414_v36 = vld [vmem:[#allocation11 + $0x438] sm:$0xf0]  ;;  %v10184_v17 = vld [vmem:[#allocation14 + $0x4e8] sm:$0xf0] }
 0x22e   :  { %v7417_v34 = vor.u32 %v9902_v63, %v7414_v36  ;;  %v8517_v39 = vor.u32 %v10184_v17, %v8516_v21  ;;  %v8489_v63 = vor.u32 %v10177_v45, %v8488_v44  ;;  %v7900_v36 = vld [vmem:[#allocation14] sm:$0xf] }
 0x22f   :  { %5728 = vmatpush.bf16.msra.mxu3 %v8293_v48  ;;  %2832 = vmatpush.bf16.msra.mxu1 %v7737_v7  ;;  %v2487_v48 = vadd.f32 %v10954_v6, %v2473_v35  ;;  %v2489_v55 = vadd.f32 %v10966_v61, %v2475_v50  ;;  %v8013_v6 = vor.u32 %v10058_v43, %v8012_v40  ;;  %v8544_v7 = vld [vmem:[#allocation14 + $0x508] sm:$0xf]  ;;  %v11004_v30 = vpop.f32.mrf.mxu1  ;;  %v7928_v40 = vld [vmem:[#allocation14 + $0x38] sm:$0xf]  ;;  %v10226_v50 = vld [vmem:[#allocation14 + $0x638] sm:$0xf0] }
 0x230   :  { %2793 = vmatmul.bf16.vlgmr.msrb.gmra.mxu2 %v10898_v51  ;;  %v2405_v51 = vadd.f32 %v10933_v54, %v1097_v4  ;;  %v8180_v54 = vld [vmem:[#allocation14 + $0x230] sm:$0xf]  ;;  %v10051_v4 = vld [vmem:[#allocation14 + $0xc0] sm:$0xf0] }
 0x231   :  { %5713 = vmatpush.bf16.msra.mxu2 %v8097_v62  ;;  %2817 = vmatpush.bf16.msra.mxu0 %v7513_v9  ;;  %v2417_v62 = vadd.f32 %v10929_v38, %v2403_v33  ;;  %v10991_v11 = vadd.f32 %v10950_v2, %v2487_v48  ;;  %v8740_v38 = vld [vmem:[#allocation14 + $0x690] sm:$0xf]  ;;  %v8181_v15 = vor.u32 %v10100_v59, %v8180_v54  ;;  %v8152_v2 = vld [vmem:[#allocation14 + $0x1f8] sm:$0xf]  ;;  %v10086_v33 = vld [vmem:[#allocation14 + $0x1d8] sm:$0xf0]  ;;  %v11011_v37 = vpop.f32.mrf.mxu0 }
 0x232   :  { %v2419_v3 = vadd.f32 %v10938_v10, %v2405_v51  ;;  %v10997_v10 = vpop.f32.mrf.mxu3  ;;  %v8741_v20 = vor.u32 %v10240_v13, %v8740_v38  ;;  %v8153_v32 = vor.u32 %v10093_v18, %v8152_v2  ;;  %v10037_v51 = vld [vmem:[#allocation14 + $0x50] sm:$0xf0]  ;;  %v8684_v48 = vld [vmem:[#allocation14 + $0x620] sm:$0xf]  ;;  %v10303_v13 = vld [vmem:[#allocation14 + $0x8a0] sm:$0xf0] }
 0x233   :  { %5729 = vmatpush.bf16.msra.mxu3 %v8265_v8  ;;  %2833 = vmatpush.bf16.msra.mxu1 %v7705_v25  ;;  %v10191_v8 = vld [vmem:[#allocation14 + $0x520] sm:$0xf0]  ;;  %v2431_v9 = vadd.f32 %v10935_v56, %v2417_v62  ;;  %v7985_v56 = vor.u32 %v10051_v4, %v7984_v1  ;;  %v2842_v25 = vmul.f32 0.2, %v10991_v11  ;;  %v8685_v1 = vor.u32 %v10226_v50, %v8684_v48  ;;  %v10170_v4 = vld [vmem:[#allocation14 + $0x478] sm:$0xf0] }
 0x234   :  { %v2433_v61 = vadd.f32 %v10945_v29, %v2419_v3  ;;  %v8545_v12 = vor.u32 %v10191_v8, %v8544_v7  ;;  %v10044_v29 = vld [vmem:[#allocation14 + $0x88] sm:$0xf0]  ;;  %v8460_v3 = vld [vmem:[#allocation14 + $0x460] sm:$0xf]  ;;  %v8992_v7 = vld [vmem:[#allocation14 + $0x888] sm:$0xf] }
 0x235   :  { %5714 = vmatpush.bf16.msra.mxu2 %v8069_v16  ;;  %2818 = vmatpush.bf16.msra.mxu0 %v7481_v28  ;;  %v10995_v16 = vadd.f32 %v10962_v49, %v2489_v55  ;;  %v2570_v26 = vpop.f32.mrf.mxu2  ;;  %v8712_v49 = vld [vmem:[#allocation14 + $0x658] sm:$0xf]  ;;  %v11008_v35 = vadd.f32 %v10931_v47, %v2431_v9  ;;  %v9216_v47 = vld [vmem:[#allocation14 + $0xa48] sm:$0xf]  ;;  %v2858_v9 = vmax.f32 %v10991_v11, %v2842_v25  ;;  %v10352_v2 = vld [vmem:[#allocation14 + $0xa28] sm:$0xf0] }
 0x236   :  { %v11002_v28 = vadd.f32 %v10941_v23, %v2433_v61  ;;  %v7957_v23 = vor.u32 %v10044_v29, %v7956_v19  ;;  %v8656_v61 = vld [vmem:[#allocation14 + $0x5e8] sm:$0xf]  ;;  %v8461_v29 = vor.u32 %v10170_v4, %v8460_v3  ;;  %v8993_v21 = vor.u32 %v10303_v13, %v8992_v7  ;;  %v8404_v48 = vld [vmem:[#allocation14 + $0x3f0] sm:$0xf]  ;;  %v10156_v50 = vld [vmem:[#allocation14 + $0x408] sm:$0xf0] }
 0x237   :  { %5730 = vmatpush.bf16.msra.mxu3 %v8237_v27  ;;  %2834 = vmatpush.bf16.msra.mxu1 %v7673_v52  ;;  %v10233_v27 = vld [vmem:[#allocation14 + $0x670] sm:$0xf0]  ;;  %v10359_v52 = vld [vmem:[#allocation14 + $0xa60] sm:$0xf0]  ;;  %v2841_v59 = vmul.f32 0.2, %v11008_v35 }
 0x238   :  { %v8713_v43 = vor.u32 %v10233_v27, %v8712_v49  ;;  %v9217_v8 = vor.u32 %v10359_v52, %v9216_v47  ;;  %v8432_v25 = vld [vmem:[#allocation14 + $0x428] sm:$0xf]  ;;  %v8964_v49 = vld [vmem:[#allocation14 + $0x850] sm:$0xf]  ;;  %v8936_v47 = vld [vmem:[#allocation14 + $0x818] sm:$0xf] }
 0x239   :  { %5715 = vmatpush.bf16.msra.mxu2 %v8041_v5  ;;  %2819 = vmatpush.bf16.msra.mxu0 %v7449_v58  ;;  %v2850_v5 = vmul.f32 0.2, %v10995_v16  ;;  %v1099_v58 = vperm.slane %v10959_v41, 2  ;;  %v10289_v52 = vld [vmem:[#allocation14 + $0x830] sm:$0xf0] }
 0x23a   :  { %2835 = vmatmul.bf16.vlgmr.msra.gmra.mxu1 %v10901_v24  ;;  %v8124_v24 = vld [vmem:[#allocation14 + $0x1c0] sm:$0xf]  ;;  %v2584_v55 = vpop.f32.mrf.mxu3  ;;  %v8376_v3 = vld [vmem:[#allocation14 + $0x3b8] sm:$0xf]  ;;  %v10149_v4 = vld [vmem:[#allocation14 + $0x3d0] sm:$0xf0] }
 0x23b   :  { %5731 = vmatpush.bf16.msra.mxu3 %v8209_v57  ;;  %5755 = vmatpush.bf16.msrb.mxu1 %v8769_v0  ;;  %v2849_v57 = vmul.f32 0.2, %v11002_v28  ;;  %v8125_v54 = vor.u32 %v10086_v33, %v8124_v24  ;;  %v2866_v62 = vmax.f32 %v10995_v16, %v2850_v5  ;;  %v2571_v0 = vadd.f32 %v2570_v26, %v1100_v31  ;;  %v10163_v26 = vld [vmem:[#allocation14 + $0x440] sm:$0xf0]  ;;  %v10212_v24 = vld [vmem:[#allocation14 + $0x5c8] sm:$0xf0] }
 0x23c   :  { %v2517_v38 = vadd.f32 %v10982_v53, %v1099_v58  ;;  %v2515_v16 = vadd.f32 %v10964_v60, %v1099_v58  ;;  %v2857_v60 = vmax.f32 %v11008_v35, %v2841_v59  ;;  %v8433_v35 = vor.u32 %v10163_v26, %v8432_v25  ;;  %v10205_v58 = vld [vmem:[#allocation14 + $0x590] sm:$0xf0] }
 0x23d   :  { %5716 = vmatpush.bf16.msra.mxu2 %v8013_v6  ;;  %2820 = vmatpush.bf16.msra.mxu0 %v7417_v34  ;;  %v7929_v6 = vor.u32 %v10037_v51, %v7928_v40  ;;  %v2865_v34 = vmax.f32 %v11002_v28, %v2849_v57  ;;  %v11024_v18 = vpack.c.bf16 %v2866_v62, %v2858_v9  ;;  %v2572_v19 = vpop.f32.mrf.mxu2  ;;  %v10296_v28 = vld [vmem:[#allocation14 + $0x868] sm:$0xf0]  ;;  %v10345_v40 = vld [vmem:[#allocation14 + $0x9f0] sm:$0xf0]  ;;  %v8600_v57 = vld [vmem:[#allocation14 + $0x578] sm:$0xf] }
 0x23e   :  { %v2585_v53 = vadd.f32 %v2584_v55, %v2571_v0  ;;  %v2531_v27 = vadd.f32 %v10997_v10, %v2517_v38  ;;  %v2573_v5 = vadd.f32 %v2572_v19, %v1100_v31  ;;  %v2529_v10 = vadd.f32 %v10972_v22, %v2515_v16  ;;  %v9132_v22 = vld [vmem:[#allocation14 + $0x9a0] sm:$0xf]  ;;  %v10338_v55 = vld [vmem:[#allocation14 + $0x9b8] sm:$0xf0]  ;;  %v10331_v16 = vld [vmem:[#allocation14 + $0x980] sm:$0xf0] }
 0x23f   :  { %5732 = vmatpush.bf16.msra.mxu3 %v8181_v15  ;;  %5756 = vmatpush.bf16.msrb.mxu1 %v8741_v20  ;;  %v10219_v15 = vld [vmem:[#allocation14 + $0x600] sm:$0xf0]  ;;  %v2598_v20 = vpop.f32.mrf.mxu0  ;;  %v11031_v51 = vpack.c.bf16 %v2865_v34, %v2857_v60  ;;  %v8965_v44 = vor.u32 %v10296_v28, %v8964_v49  ;;  %v8937_v0 = vor.u32 %v10289_v52, %v8936_v47  ;;  %v8572_v9 = vld [vmem:[#allocation14 + $0x540] sm:$0xf]  ;;  %v10198_v38 = vld [vmem:[#allocation14 + $0x558] sm:$0xf0] }
 0x240   :  { %2821 = vmatmul.bf16.vlgmr.msra.gmra.mxu0 %v10905_v46  ;;  %v10030_v46 = vld [vmem:[#allocation14 + $0x18] sm:$0xf0]  ;;  %v8657_v17 = vor.u32 %v10219_v15, %v8656_v61  ;;  %v9133_v13 = vor.u32 %v10338_v55, %v9132_v22  ;;  %v9104_v34 = vld [vmem:[#allocation14 + $0x968] sm:$0xf]  ;;  %v9076_v49 = vld [vmem:[#allocation14 + $0x930] sm:$0xf] }
 0x241   :  { %5717 = vmatpush.bf16.msra.mxu2 %v7985_v56  ;;  %5741 = vmatpush.bf16.msrb.mxu0 %v8545_v12  ;;  %v2612_v56 = vpop.f32.mrf.mxu1  ;;  %v9188_v12 = vld [vmem:[#allocation14 + $0xa10] sm:$0xf]  ;;  %v7901_v11 = vor.u32 %v10030_v46, %v7900_v36  ;;  %v8405_v36 = vor.u32 %v10156_v50, %v8404_v48  ;;  %v10324_v60 = vld [vmem:[#allocation14 + $0x948] sm:$0xf0]  ;;  %v8824_v52 = vld [vmem:[#allocation14 + $0x738] sm:$0xf] }
 0x242   :  { %v9189_v33 = vor.u32 %v10352_v2, %v9188_v12  ;;  %v2586_v31 = vpop.f32.mrf.mxu3  ;;  %v8377_v12 = vor.u32 %v10149_v4, %v8376_v3  ;;  %v9412_v47 = vld [vmem:[#allocation14 + $0xbd0] sm:$0xf]  ;;  %v10132_v22 = vld [vmem:[#allocation14 + $0x34c] sm:$0xf]  ;;  %v8322_v55 = vld [vmem:[#allocation14 + $0x364] sm:$0xf0] }
 0x243   :  { %5733 = vmatpush.bf16.msra.mxu3 %v8153_v32  ;;  %5757 = vmatpush.bf16.msrb.mxu1 %v8713_v43  ;;  %v8628_v32 = vld [vmem:[#allocation14 + $0x5b0] sm:$0xf]  ;;  %v2545_v43 = vadd.f32 %v11011_v37, %v2531_v27  ;;  %v2543_v37 = vadd.f32 %v10984_v14, %v2529_v10  ;;  %v2587_v62 = vadd.f32 %v2586_v31, %v2573_v5  ;;  %v8908_v14 = vld [vmem:[#allocation14 + $0x7e0] sm:$0xf]  ;;  %v10415_v5 = vld [vmem:[#allocation14 + $0xc20] sm:$0xf0] }
 0x244   :  { %v8629_v45 = vor.u32 %v10212_v24, %v8628_v32  ;;  %v9048_v10 = vld [vmem:[#allocation14 + $0x8f8] sm:$0xf]  ;;  %v10408_v31 = vld [vmem:[#allocation14 + $0xbe8] sm:$0xf0] }
 0x245   :  { %5718 = vmatpush.bf16.msra.mxu2 %v7957_v23  ;;  %5742 = vmatpush.bf16.msrb.mxu0 %v8517_v39  ;;  %v2599_v23 = vadd.f32 %v2598_v20, %v2585_v53  ;;  %v9160_v39 = vld [vmem:[#allocation14 + $0x9d8] sm:$0xf]  ;;  %v8573_v20 = vor.u32 %v10198_v38, %v8572_v9  ;;  %v8880_v53 = vld [vmem:[#allocation14 + $0x7a8] sm:$0xf]  ;;  %v8325_v9 = vor.u32 %v10132_v22, %v8322_v55  ;;  %v10125_v38 = vld [vmem:[#allocation14 + $0x314] sm:$0xf] }
 0x246   :  { %v10373_v22 = vld [vmem:[#allocation14 + $0xad0] sm:$0xf0] }
 0x247   :  { %5734 = vmatpush.bf16.msra.mxu3 %v8125_v54  ;;  %5758 = vmatpush.bf16.msrb.mxu1 %v8685_v1  ;;  %v9161_v54 = vor.u32 %v10345_v40, %v9160_v39  ;;  %v2613_v59 = vadd.f32 %v2612_v56, %v2599_v23  ;;  %v8601_v1 = vor.u32 %v10205_v58, %v8600_v57  ;;  %v8852_v23 = vld [vmem:[#allocation14 + $0x770] sm:$0xf]  ;;  %v10268_v39 = vld [vmem:[#allocation14 + $0x788] sm:$0xf0]  ;;  %v10261_v57 = vld [vmem:[#allocation14 + $0x750] sm:$0xf0] }
 0x248   :  { %v9077_v40 = vor.u32 %v10324_v60, %v9076_v49  ;;  %v8853_v50 = vor.u32 %v10268_v39, %v8852_v23  ;;  %v8238_v23 = vld [vmem:[#allocation14 + $0x2bc] sm:$0xf0] }
 0x249   :  { %5719 = vmatpush.bf16.msra.mxu2 %v7929_v6  ;;  %5743 = vmatpush.bf16.msrb.mxu0 %v8489_v63  ;;  %v11038_v6 = vadd.f32 %v11004_v30, %v2545_v43  ;;  %v2600_v63 = vpop.f32.mrf.mxu0  ;;  %v2614_v7 = vpop.f32.mrf.mxu1  ;;  %v2557_v30 = vadd.f32 %v10978_v42, %v2543_v37  ;;  %v2844_v61 = vmul.f32 0.2, %v2613_v59  ;;  %v1101_v37 = vperm.slane %v10959_v41, 4 }
 0x24a   :  { %5735 = vmatmul.bf16.vlgmr.msra.gmra.mxu3 %v11024_v18  ;;  %v2601_v46 = vadd.f32 %v2600_v63, %v2587_v62  ;;  %v10310_v62 = vld [vmem:[#allocation14 + $0x8d8] sm:$0xf0]  ;;  %v9384_v63 = vld [vmem:[#allocation14 + $0xb98] sm:$0xf] }
 0x24b   :  { %5783 = vmatpush.bf16.msrb.mxu3 %v9217_v8  ;;  %5759 = vmatpush.bf16.msrb.mxu1 %v8657_v17  ;;  %v10282_v8 = vld [vmem:[#allocation14 + $0x7f8] sm:$0xf0]  ;;  %v2851_v56 = vmul.f32 0.2, %v11038_v6  ;;  %v9105_v17 = vor.u32 %v10331_v16, %v9104_v34  ;;  %v2843_v42 = vmul.f32 0.2, %v2557_v30  ;;  %v2860_v25 = vmax.f32 %v2613_v59, %v2844_v61 }
 0x24c   :  { %v2615_v15 = vadd.f32 %v2614_v7, %v2601_v46  ;;  %v8909_v19 = vor.u32 %v10282_v8, %v8908_v14  ;;  %v9020_v59 = vld [vmem:[#allocation14 + $0x8c0] sm:$0xf]  ;;  %v10076_v7 = vld [vmem:[#allocation14 + $0x18c] sm:$0xf]  ;;  %v8098_v8 = vld [vmem:[#allocation14 + $0x1a4] sm:$0xf0] }
 0x24d   :  { %5720 = vmatpush.bf16.msra.mxu2 %v7901_v11  ;;  %5744 = vmatpush.bf16.msrb.mxu0 %v8461_v29  ;;  %v8348_v11 = vld [vmem:[#allocation14 + $0x380] sm:$0xf]  ;;  %v10142_v29 = vld [vmem:[#allocation14 + $0x398] sm:$0xf0]  ;;  %v2867_v28 = vmax.f32 %v11038_v6, %v2851_v56  ;;  %v8825_v6 = vor.u32 %v10261_v57, %v8824_v52  ;;  %v2640_v46 = vpop.f32.mrf.mxu3  ;;  %v9021_v3 = vor.u32 %v10310_v62, %v9020_v59  ;;  %v9272_v62 = vld [vmem:[#allocation14 + $0xab8] sm:$0xf] }
 0x24e   :  { %v2852_v2 = vmul.f32 0.2, %v2615_v15  ;;  %v8349_v27 = vor.u32 %v10142_v29, %v8348_v11  ;;  %v10394_v34 = vld [vmem:[#allocation14 + $0xb78] sm:$0xf0]  ;;  %v8070_v11 = vld [vmem:[#allocation14 + $0x16c] sm:$0xf0] }
 0x24f   :  { %5784 = vmatpush.bf16.msrb.mxu3 %v9189_v33  ;;  %5760 = vmatpush.bf16.msrb.mxu1 %v8629_v45  ;;  %v9440_v33 = vld [vmem:[#allocation14 + $0xc08] sm:$0xf] }
 0x250   :  { %5721 = vmatmul.bf16.vlgmr.msra.gmra.mxu2 %v11031_v51  ;;  %v2868_v26 = vmax.f32 %v2615_v15, %v2852_v2  ;;  %v9441_v43 = vor.u32 %v10415_v5, %v9440_v33  ;;  %v9356_v15 = vld [vmem:[#allocation14 + $0xb60] sm:$0xf]  ;;  %v10111_v5 = vld [vmem:[#allocation14 + $0x2a4] sm:$0xf] }
 0x251   :  { %5769 = vmatpush.bf16.msrb.mxu2 %v8993_v21  ;;  %5745 = vmatpush.bf16.msrb.mxu0 %v8433_v35  ;;  %v10275_v21 = vld [vmem:[#allocation14 + $0x7c0] sm:$0xf0]  ;;  %v2859_v35 = vmax.f32 %v2557_v30, %v2843_v42  ;;  %v9357_v2 = vor.u32 %v10394_v34, %v9356_v15  ;;  %v8241_v52 = vor.u32 %v10111_v5, %v8238_v23  ;;  %v10090_v34 = vld [vmem:[#allocation14 + $0x1fc] sm:$0xf]  ;;  %v1102_v5 = vperm.slane %v10959_v41, 5 }
 0x252   :  { %v11043_v32 = vpack.c.bf16 %v2868_v26, %v2860_v25  ;;  %v8881_v24 = vor.u32 %v10275_v21, %v8880_v53  ;;  %v10118_v53 = vld [vmem:[#allocation14 + $0x2dc] sm:$0xf]  ;;  %v8266_v21 = vld [vmem:[#allocation14 + $0x2f4] sm:$0xf0]  ;;  %v9328_v25 = vld [vmem:[#allocation14 + $0xb28] sm:$0xf] }
 0x253   :  { %5785 = vmatpush.bf16.msrb.mxu3 %v9161_v54  ;;  %5761 = vmatpush.bf16.msrb.mxu1 %v8601_v1  ;;  %v2626_v45 = vpop.f32.mrf.mxu2  ;;  %v11046_v48 = vpack.c.bf16 %v2867_v28, %v2859_v35  ;;  %v9413_v54 = vor.u32 %v10408_v31, %v9412_v47  ;;  %v10254_v1 = vld [vmem:[#allocation14 + $0x718] sm:$0xf0]  ;;  %v10387_v26 = vld [vmem:[#allocation14 + $0xb40] sm:$0xf0]  ;;  %v8042_v28 = vld [vmem:[#allocation14 + $0x134] sm:$0xf0] }
 0x254   :  { %v2627_v14 = vadd.f32 %v2626_v45, %v1101_v37  ;;  %v9329_v60 = vor.u32 %v10387_v26, %v9328_v25  ;;  %v10380_v35 = vld [vmem:[#allocation14 + $0xb08] sm:$0xf0]  ;;  %v10055_v47 = vld [vmem:[#allocation14 + $0xe4] sm:$0xf]  ;;  %v8014_v31 = vld [vmem:[#allocation14 + $0xfc] sm:$0xf0] }
 0x255   :  { %5770 = vmatpush.bf16.msrb.mxu2 %v8965_v44  ;;  %5746 = vmatpush.bf16.msrb.mxu0 %v8405_v36  ;;  %v10317_v44 = vld [vmem:[#allocation14 + $0x910] sm:$0xf0]  ;;  %v2642_v33 = vpop.f32.mrf.mxu3  ;;  %v8017_v55 = vor.u32 %v10055_v47, %v8014_v31  ;;  %v10034_v25 = vld [vmem:[#allocation14 + $0x3c] sm:$0xf]  ;;  %v7930_v26 = vld [vmem:[#allocation14 + $0x54] sm:$0xf0] }
 0x256   :  { %v9049_v58 = vor.u32 %v10317_v44, %v9048_v10  ;;  %v10401_v36 = vld [vmem:[#allocation14 + $0xbb0] sm:$0xf0]  ;;  %v7933_v23 = vor.u32 %v10034_v25, %v7930_v26  ;;  %v10300_v31 = vld [vmem:[#allocation14 + $0x88c] sm:$0xf]  ;;  %v8910_v25 = vld [vmem:[#allocation14 + $0x7fc] sm:$0xf0] }
 0x257   :  { %5786 = vmatpush.bf16.msrb.mxu3 %v9133_v13  ;;  %5762 = vmatpush.bf16.msrb.mxu1 %v8573_v20  ;;  %v9385_v4 = vor.u32 %v10401_v36, %v9384_v63  ;;  %v8294_v13 = vld [vmem:[#allocation14 + $0x32c] sm:$0xf0]  ;;  %v2668_v30 = vpop.f32.mrf.mxu1  ;;  %v10069_v20 = vld [vmem:[#allocation14 + $0x154] sm:$0xf]  ;;  %v10048_v36 = vld [vmem:[#allocation14 + $0xac] sm:$0xf] }
 0x258   :  { %v8297_v29 = vor.u32 %v10125_v38, %v8294_v13  ;;  %v8073_v49 = vor.u32 %v10069_v20, %v8070_v11  ;;  %v10041_v38 = vld [vmem:[#allocation14 + $0x74] sm:$0xf]  ;;  %v7958_v13 = vld [vmem:[#allocation14 + $0x8c] sm:$0xf0]  ;;  %v8546_v20 = vld [vmem:[#allocation14 + $0x524] sm:$0xf0] }
 0x259   :  { %5771 = vmatpush.bf16.msrb.mxu2 %v8937_v0  ;;  %5747 = vmatpush.bf16.msrb.mxu0 %v8377_v12  ;;  %v8796_v0 = vld [vmem:[#allocation14 + $0x700] sm:$0xf]  ;;  %v8101_v12 = vor.u32 %v10076_v7, %v8098_v8  ;;  %v10366_v8 = vld [vmem:[#allocation14 + $0xa98] sm:$0xf0] }
 0x25a   :  { %5763 = vmatmul.bf16.vlgmr.msrb.gmra.mxu1 %v11043_v32  ;;  %v8797_v61 = vor.u32 %v10254_v1, %v8796_v0  ;;  %v10097_v1 = vld [vmem:[#allocation14 + $0x234] sm:$0xf]  ;;  %v9244_v7 = vld [vmem:[#allocation14 + $0xa80] sm:$0xf] }
 0x25b   :  { %5787 = vmatpush.bf16.msrb.mxu3 %v9105_v17  ;;  %v2628_v16 = vpop.f32.mrf.mxu2 }
 0x25c   :  { %v2629_v17 = vadd.f32 %v2628_v16, %v1101_v37  ;;  %v9664_v16 = vld [vmem:[#allocation14 + $0xdc8] sm:$0xf] }
 0x25d   :  { %5772 = vmatpush.bf16.msrb.mxu2 %v8909_v19  ;;  %5748 = vmatpush.bf16.msrb.mxu0 %v8349_v27  ;;  %v2654_v56 = vpop.f32.mrf.mxu0  ;;  %v2641_v19 = vadd.f32 %v2640_v46, %v2627_v14  ;;  %v10062_v27 = vld [vmem:[#allocation14 + $0x11c] sm:$0xf]  ;;  %v7986_v46 = vld [vmem:[#allocation14 + $0xc4] sm:$0xf0] }
 0x25e   :  { %v8045_v44 = vor.u32 %v10062_v27, %v8042_v28  ;;  %v8518_v27 = vld [vmem:[#allocation14 + $0x4ec] sm:$0xf0]  ;;  %v10083_v28 = vld [vmem:[#allocation14 + $0x1c4] sm:$0xf] }
 0x25f   :  { %5788 = vmatpush.bf16.msrb.mxu3 %v9077_v40  ;;  %v2655_v42 = vadd.f32 %v2654_v56, %v2641_v19  ;;  %v2643_v40 = vadd.f32 %v2642_v33, %v2629_v17  ;;  %v2670_v57 = vpop.f32.mrf.mxu1  ;;  %v10471_v56 = vld [vmem:[#allocation14 + $0xde0] sm:$0xf0]  ;;  %v10188_v19 = vld [vmem:[#allocation14 + $0x50c] sm:$0xf] }
 0x260   :  { %5749 = vmatmul.bf16.vlgmr.msrb.gmra.mxu0 %v11046_v48  ;;  %v8549_v11 = vor.u32 %v10188_v19, %v8546_v20  ;;  %v10464_v17 = vld [vmem:[#allocation14 + $0xda8] sm:$0xf0]  ;;  %v10153_v20 = vld [vmem:[#allocation14 + $0x3f4] sm:$0xf] }
 0x261   :  { %5773 = vmatpush.bf16.msrb.mxu2 %v8881_v24  ;;  %5797 = vmatpush.bf16.msra.mxu0 %v9441_v43  ;;  %v8269_v24 = vor.u32 %v10118_v53, %v8266_v21  ;;  %v2669_v39 = vadd.f32 %v2668_v30, %v2655_v42  ;;  %v9300_v43 = vld [vmem:[#allocation14 + $0xaf0] sm:$0xf]  ;;  %v9245_v30 = vor.u32 %v10366_v8, %v9244_v7  ;;  %v10181_v42 = vld [vmem:[#allocation14 + $0x4d4] sm:$0xf]  ;;  %v10443_v7 = vld [vmem:[#allocation14 + $0xd00] sm:$0xf0] }
 0x262   :  { %v9301_v45 = vor.u32 %v10380_v35, %v9300_v43  ;;  %v7961_v53 = vor.u32 %v10041_v38, %v7958_v13  ;;  %v9636_v21 = vld [vmem:[#allocation14 + $0xd90] sm:$0xf]  ;;  %v8521_v33 = vor.u32 %v10181_v42, %v8518_v27  ;;  %v10174_v43 = vld [vmem:[#allocation14 + $0x49c] sm:$0xf]  ;;  %v10027_v35 = vld [vmem:[#allocation14 + $0x4] sm:$0xf] }
 0x263   :  { %5789 = vmatpush.bf16.msrb.mxu3 %v9049_v58  ;;  %v10104_v58 = vld [vmem:[#allocation14 + $0x26c] sm:$0xf]  ;;  %v2845_v37 = vmul.f32 0.2, %v2669_v39  ;;  %v10286_v13 = vld [vmem:[#allocation14 + $0x81c] sm:$0xf] }
 0x264   :  { %v10160_v8 = vld [vmem:[#allocation14 + $0x42c] sm:$0xf]  ;;  %v10279_v42 = vld [vmem:[#allocation14 + $0x7e4] sm:$0xf] }
 0x265   :  { %5774 = vmatpush.bf16.msrb.mxu2 %v8853_v50  ;;  %5798 = vmatpush.bf16.msra.mxu0 %v9413_v54  ;;  %v2656_v10 = vpop.f32.mrf.mxu0  ;;  %v8210_v54 = vld [vmem:[#allocation14 + $0x284] sm:$0xf0]  ;;  %v10436_v19 = vld [vmem:[#allocation14 + $0xcc8] sm:$0xf0] }
 0x266   :  { %v2657_v50 = vadd.f32 %v2656_v10, %v2643_v40  ;;  %v8213_v0 = vor.u32 %v10104_v58, %v8210_v54  ;;  %v10457_v40 = vld [vmem:[#allocation14 + $0xd70] sm:$0xf0]  ;;  %v7902_v10 = vld [vmem:[#allocation14 + $0x1c] sm:$0xf0] }
 0x267   :  { %5790 = vmatpush.bf16.msrb.mxu3 %v9021_v3  ;;  %v8182_v3 = vld [vmem:[#allocation14 + $0x24c] sm:$0xf0]  ;;  %v7905_v41 = vor.u32 %v10027_v35, %v7902_v10  ;;  %v9580_v54 = vld [vmem:[#allocation14 + $0xd20] sm:$0xf]  ;;  %v8378_v35 = vld [vmem:[#allocation14 + $0x3d4] sm:$0xf0] }
 0x268   :  { %v2671_v59 = vadd.f32 %v2670_v57, %v2657_v50  ;;  %v8185_v15 = vor.u32 %v10097_v1, %v8182_v3  ;;  %v8490_v50 = vld [vmem:[#allocation14 + $0x4b4] sm:$0xf0] }
 0x269   :  { %5775 = vmatpush.bf16.msrb.mxu2 %v8825_v6  ;;  %5799 = vmatpush.bf16.msra.mxu0 %v9385_v4  ;;  %v9273_v6 = vor.u32 %v10373_v22, %v9272_v62  ;;  %v2861_v4 = vmax.f32 %v2669_v39, %v2845_v37  ;;  %v9608_v39 = vld [vmem:[#allocation14 + $0xd58] sm:$0xf]  ;;  %v8493_v57 = vor.u32 %v10174_v43, %v8490_v50  ;;  %v10450_v37 = vld [vmem:[#allocation14 + $0xd38] sm:$0xf0]  ;;  %v9218_v50 = vld [vmem:[#allocation14 + $0xa64] sm:$0xf0] }
 0x26a   :  { %v2853_v63 = vmul.f32 0.2, %v2671_v59 }
 0x26b   :  { %5839 = vmatpush.bf16.msra.mxu3 %v8325_v9  ;;  %v7989_v9 = vor.u32 %v10048_v36, %v7986_v46  ;;  %v8462_v36 = vld [vmem:[#allocation14 + $0x47c] sm:$0xf0] }
 0x26c   :  { %v2869_v14 = vmax.f32 %v2671_v59, %v2853_v63  ;;  %v10167_v59 = vld [vmem:[#allocation14 + $0x464] sm:$0xf]  ;;  %v9581_v63 = vor.u32 %v10450_v37, %v9580_v54  ;;  %v8350_v37 = vld [vmem:[#allocation14 + $0x39c] sm:$0xf0] }
 0x26d   :  { %5776 = vmatpush.bf16.msrb.mxu2 %v8797_v61  ;;  %5800 = vmatpush.bf16.msra.mxu0 %v9357_v2  ;;  %v9665_v2 = vor.u32 %v10471_v56, %v9664_v16  ;;  %v2696_v47 = vpop.f32.mrf.mxu3  ;;  %v8465_v1 = vor.u32 %v10167_v59, %v8462_v36  ;;  %v9190_v36 = vld [vmem:[#allocation14 + $0xa2c] sm:$0xf0] }
 0x26e   :  { %v11050_v61 = vpack.c.bf16 %v2869_v14, %v2861_v4  ;;  %v9552_v14 = vld [vmem:[#allocation14 + $0xce8] sm:$0xf] }
 0x26f   :  { %5840 = vmatpush.bf16.msra.mxu3 %v8297_v29  ;;  %5811 = vmatpush.bf16.msra.mxu1 %v9665_v2  ;;  %v9524_v2 = vld [vmem:[#allocation14 + $0xcb0] sm:$0xf] }
 0x270   :  { %5777 = vmatmul.bf16.vlgmr.msrb.gmra.mxu2 %v11050_v61 }
 0x271   :  { %5825 = vmatpush.bf16.msra.mxu2 %v8101_v12  ;;  %5801 = vmatpush.bf16.msra.mxu0 %v9329_v60  ;;  %v8154_v12 = vld [vmem:[#allocation14 + $0x214] sm:$0xf0]  ;;  %v9637_v60 = vor.u32 %v10464_v17, %v9636_v21  ;;  %v8406_v21 = vld [vmem:[#allocation14 + $0x40c] sm:$0xf0] }
 0x272   :  { %v8409_v26 = vor.u32 %v10153_v20, %v8406_v21  ;;  %v10251_v20 = vld [vmem:[#allocation14 + $0x704] sm:$0xf]  ;;  %v8104_v21 = vld [vmem:[#allocation14 + $0x190] sm:$0xf] }
 0x273   :  { %5841 = vmatpush.bf16.msra.mxu3 %v8269_v24  ;;  %v2682_v29 = vpop.f32.mrf.mxu2  ;;  %v8126_v24 = vld [vmem:[#allocation14 + $0x1dc] sm:$0xf0]  ;;  %5812 = vmatpush.bf16.msra.mxu1 %v9637_v60  ;;  %v10272_v60 = vld [vmem:[#allocation14 + $0x7ac] sm:$0xf] }
 0x274   :  { %v2683_v58 = vadd.f32 %v2682_v29, %v1102_v5 }
 0x275   :  { %5826 = vmatpush.bf16.msra.mxu2 %v8073_v49  ;;  %5802 = vmatpush.bf16.msra.mxu0 %v9301_v45  ;;  %v8157_v49 = vor.u32 %v10090_v34, %v8154_v12  ;;  %v9609_v45 = vor.u32 %v10457_v40, %v9608_v39  ;;  %v8434_v34 = vld [vmem:[#allocation14 + $0x444] sm:$0xf0]  ;;  %v2698_v56 = vpop.f32.mrf.mxu3  ;;  %v8913_v39 = vor.u32 %v10279_v42, %v8910_v25 }
 0x276   :  { %v2697_v3 = vadd.f32 %v2696_v47, %v2683_v58  ;;  %v8437_v16 = vor.u32 %v10160_v8, %v8434_v34  ;;  %v8882_v40 = vld [vmem:[#allocation14 + $0x7c4] sm:$0xf0]  ;;  %v10258_v8 = vld [vmem:[#allocation14 + $0x73c] sm:$0xf] }
 0x277   :  { %5842 = vmatpush.bf16.msra.mxu3 %v8241_v52  ;;  %v8994_v52 = vld [vmem:[#allocation14 + $0x8a4] sm:$0xf0]  ;;  %5813 = vmatpush.bf16.msra.mxu1 %v9609_v45  ;;  %v2724_v62 = vpop.f32.mrf.mxu1  ;;  %v10356_v45 = vld [vmem:[#allocation14 + $0xa4c] sm:$0xf]  ;;  %v8885_v47 = vor.u32 %v10272_v60, %v8882_v40  ;;  %v11058_v34 = vld [vmem:[#allocation13] sm:$0xff] }
 0x278   :  { %v8997_v22 = vor.u32 %v10300_v31, %v8994_v52  ;;  %v9468_v31 = vld [vmem:[#allocation14 + $0xc40] sm:$0xf]  ;;  %v10422_v52 = vld [vmem:[#allocation14 + $0xc58] sm:$0xf0]  ;;  %v9221_v59 = vor.u32 %v10356_v45, %v9218_v50  ;;  %v10223_v60 = vld [vmem:[#allocation14 + $0x624] sm:$0xf] }
 0x279   :  { %5827 = vmatpush.bf16.msra.mxu2 %v8045_v44  ;;  %5803 = vmatpush.bf16.msra.mxu0 %v9273_v6  ;;  %v8129_v44 = vor.u32 %v10083_v28, %v8126_v24  ;;  %v8966_v6 = vld [vmem:[#allocation14 + $0x86c] sm:$0xf0]  ;;  %v9496_v28 = vld [vmem:[#allocation14 + $0xc78] sm:$0xf]  ;;  %v10429_v24 = vld [vmem:[#allocation14 + $0xc90] sm:$0xf0]  ;;  %v9469_v54 = vor.u32 %v10422_v52, %v9468_v31 }
 0x27a   :  { %v9497_v43 = vor.u32 %v10429_v24, %v9496_v28  ;;  %v10073_v40 = vld [vmem:[#allocation14 + $0x170] sm:$0xf0]  ;;  %v10216_v45 = vld [vmem:[#allocation14 + $0x5ec] sm:$0xf]  ;;  %v8658_v50 = vld [vmem:[#allocation14 + $0x604] sm:$0xf0] }
 0x27b   :  { %5843 = vmatpush.bf16.msra.mxu3 %v8213_v0  ;;  %v2684_v46 = vpop.f32.mrf.mxu2  ;;  %5814 = vmatpush.bf16.msra.mxu1 %v9581_v63  ;;  %v10321_v52 = vld [vmem:[#allocation14 + $0x934] sm:$0xf] }
 0x27d   :  { %5828 = vmatpush.bf16.msra.mxu2 %v8017_v55  ;;  %5804 = vmatpush.bf16.msra.mxu0 %v9245_v30  ;;  %v10293_v55 = vld [vmem:[#allocation14 + $0x854] sm:$0xf]  ;;  %v2710_v0 = vpop.f32.mrf.mxu0  ;;  %v8938_v30 = vld [vmem:[#allocation14 + $0x834] sm:$0xf0] }
 0x27e   :  { %v8969_v4 = vor.u32 %v10293_v55, %v8966_v6  ;;  %v2711_v38 = vadd.f32 %v2710_v0, %v2697_v3  ;;  %v8941_v12 = vor.u32 %v10286_v13, %v8938_v30  ;;  %v10349_v55 = vld [vmem:[#allocation14 + $0xa14] sm:$0xf]  ;;  %v8770_v0 = vld [vmem:[#allocation14 + $0x6e4] sm:$0xf0]  ;;  %v10342_v13 = vld [vmem:[#allocation14 + $0x9dc] sm:$0xf] }
 0x27f   :  { %5844 = vmatpush.bf16.msra.mxu3 %v8185_v15  ;;  %v9553_v15 = vor.u32 %v10443_v7, %v9552_v14  ;;  %v2726_v27 = vpop.f32.mrf.mxu1  ;;  %v9193_v7 = vor.u32 %v10349_v55, %v9190_v36  ;;  %v9162_v30 = vld [vmem:[#allocation14 + $0x9f4] sm:$0xf0] }
 0x281   :  { %5829 = vmatpush.bf16.msra.mxu2 %v7989_v9  ;;  %5853 = vmatpush.bf16.msrb.mxu0 %v8549_v11  ;;  %v2685_v9 = vadd.f32 %v2684_v46, %v1102_v5  ;;  %v2725_v11 = vadd.f32 %v2724_v62, %v2711_v38  ;;  %v10265_v62 = vld [vmem:[#allocation14 + $0x774] sm:$0xf]  ;;  %v10244_v46 = vld [vmem:[#allocation14 + $0x6cc] sm:$0xf]  ;;  %v8742_v38 = vld [vmem:[#allocation14 + $0x6ac] sm:$0xf0] }
 0x282   :  { %5815 = vmatpush.bf16.msra.mxu1 %v9553_v15 }
 0x283   :  { %5845 = vmatpush.bf16.msra.mxu3 %v8157_v49  ;;  %v2699_v29 = vadd.f32 %v2698_v56, %v2685_v9  ;;  %v2846_v5 = vmul.f32 0.2, %v2725_v11  ;;  %v8826_v9 = vld [vmem:[#allocation14 + $0x754] sm:$0xf0] }
 0x284   :  { %v8829_v56 = vor.u32 %v10258_v8, %v8826_v9 }
 0x285   :  { %5830 = vmatpush.bf16.msra.mxu2 %v7961_v53  ;;  %5854 = vmatpush.bf16.msrb.mxu0 %v8521_v33  ;;  %v9525_v53 = vor.u32 %v10436_v19, %v9524_v2  ;;  %v2712_v17 = vpop.f32.mrf.mxu0  ;;  %v10146_v33 = vld [vmem:[#allocation14 + $0x3bc] sm:$0xf]  ;;  %v2862_v58 = vmax.f32 %v2725_v11, %v2846_v5  ;;  %v8714_v2 = vld [vmem:[#allocation14 + $0x674] sm:$0xf0]  ;;  %v9165_v19 = vor.u32 %v10342_v13, %v9162_v30  ;;  %v8798_v11 = vld [vmem:[#allocation14 + $0x71c] sm:$0xf0] }
 0x286   :  { %v2713_v49 = vadd.f32 %v2712_v17, %v2699_v29  ;;  %v8381_v10 = vor.u32 %v10146_v33, %v8378_v35  ;;  %v10335_v29 = vld [vmem:[#allocation14 + $0x9a4] sm:$0xf]  ;;  %v10080_v17 = vld [vmem:[#allocation14 + $0x1a8] sm:$0xf0]  ;;  %v8602_v13 = vld [vmem:[#allocation14 + $0x594] sm:$0xf0] }
 0x287   :  { %5846 = vmatpush.bf16.msra.mxu3 %v8129_v44  ;;  %5816 = vmatpush.bf16.msra.mxu1 %v9525_v53  ;;  %v9134_v53 = vld [vmem:[#allocation14 + $0x9bc] sm:$0xf0]  ;;  %v8105_v24 = vor.u32 %v10080_v17, %v8104_v21  ;;  %v10328_v33 = vld [vmem:[#allocation14 + $0x96c] sm:$0xf]  ;;  %v9442_v21 = vld [vmem:[#allocation14 + $0xc24] sm:$0xf0] }
 0x288   :  { %v9137_v28 = vor.u32 %v10335_v29, %v9134_v53  ;;  %v10412_v29 = vld [vmem:[#allocation14 + $0xc0c] sm:$0xf]  ;;  %v8328_v17 = vld [vmem:[#allocation14 + $0x350] sm:$0xf] }
 0x289   :  { %5831 = vmatpush.bf16.msra.mxu2 %v7933_v23  ;;  %5855 = vmatpush.bf16.msrb.mxu0 %v8493_v57  ;;  %v2727_v23 = vadd.f32 %v2726_v27, %v2713_v49  ;;  %v10139_v57 = vld [vmem:[#allocation14 + $0x384] sm:$0xf]  ;;  %v8801_v49 = vor.u32 %v10251_v20, %v8798_v11  ;;  %v8686_v27 = vld [vmem:[#allocation14 + $0x63c] sm:$0xf0]  ;;  %v10052_v11 = vld [vmem:[#allocation14 + $0xc8] sm:$0xf0] }
 0x28a   :  { %v8353_v6 = vor.u32 %v10139_v57, %v8350_v37  ;;  %v10066_v37 = vld [vmem:[#allocation14 + $0x138] sm:$0xf0] }
 0x28b   :  { %v2854_v44 = vmul.f32 0.2, %v2727_v23  ;;  %5817 = vmatpush.bf16.msra.mxu1 %v9497_v43  ;;  %v8689_v43 = vor.u32 %v10223_v60, %v8686_v27 }
 0x28d   :  { %5832 = vmatpush.bf16.msra.mxu2 %v7905_v41  ;;  %5856 = vmatpush.bf16.msrb.mxu0 %v8465_v1  ;;  %v2870_v41 = vmax.f32 %v2727_v23, %v2854_v44  ;;  %v8773_v1 = vor.u32 %v10244_v46, %v8770_v0  ;;  %v2752_v25 = vpop.f32.mrf.mxu3  ;;  %v9106_v23 = vld [vmem:[#allocation14 + $0x984] sm:$0xf0]  ;;  %v10314_v46 = vld [vmem:[#allocation14 + $0x8fc] sm:$0xf] }
 0x28f   :  { %v11055_v63 = vpack.c.bf16 %v2870_v41, %v2862_v58  ;;  %5818 = vmatpush.bf16.msra.mxu1 %v9469_v54  ;;  %v9078_v41 = vld [vmem:[#allocation14 + $0x94c] sm:$0xf0]  ;;  %v8048_v54 = vld [vmem:[#allocation14 + $0x120] sm:$0xf] }
 0x290   :  { %5833 = vmatmul.bf16.vlgmr.msra.gmra.mxu2 %v11031_v51  ;;  %v8049_v36 = vor.u32 %v10066_v37, %v8048_v54  ;;  %v10122_v54 = vld [vmem:[#allocation14 + $0x2f8] sm:$0xf0] }
 0x291   :  { %5881 = vmatpush.bf16.msrb.mxu2 %v8997_v22  ;;  %5857 = vmatpush.bf16.msrb.mxu0 %v8437_v16  ;;  %v8854_v22 = vld [vmem:[#allocation14 + $0x78c] sm:$0xf0]  ;;  %v1103_v16 = vperm.slane %v11058_v34, 6  ;;  %v10398_v37 = vld [vmem:[#allocation14 + $0xb9c] sm:$0xf] }
 0x292   :  { %5791 = vmatmul.bf16.vlgmr.msrb.gmra.mxu3 %v11055_v63  ;;  %v8857_v3 = vor.u32 %v10265_v62, %v8854_v22  ;;  %v10209_v62 = vld [vmem:[#allocation14 + $0x5b4] sm:$0xf]  ;;  %v8630_v22 = vld [vmem:[#allocation14 + $0x5cc] sm:$0xf0] }
 0x293   :  { %v2738_v14 = vpop.f32.mrf.mxu2  ;;  %5895 = vmatpush.bf16.msrb.mxu3 %v9221_v59  ;;  %5867 = vmatpush.bf16.msrb.mxu1 %v8773_v1  ;;  %v8661_v59 = vor.u32 %v10216_v45, %v8658_v50  ;;  %v9414_v45 = vld [vmem:[#allocation14 + $0xbec] sm:$0xf0] }
 0x295   :  { %5882 = vmatpush.bf16.msrb.mxu2 %v8969_v4  ;;  %5858 = vmatpush.bf16.msrb.mxu0 %v8409_v26  ;;  %v10237_v4 = vld [vmem:[#allocation14 + $0x694] sm:$0xf]  ;;  %v2739_v26 = vadd.f32 %v2738_v14, %v1103_v16  ;;  %v2754_v55 = vpop.f32.mrf.mxu3  ;;  %v10059_v14 = vld [vmem:[#allocation14 + $0x100] sm:$0xf0] }
 0x296   :  { %v8745_v15 = vor.u32 %v10237_v4, %v8742_v38  ;;  %v8020_v4 = vld [vmem:[#allocation14 + $0xe8] sm:$0xf]  ;;  %v10202_v38 = vld [vmem:[#allocation14 + $0x57c] sm:$0xf] }
 0x297   :  { %5896 = vmatpush.bf16.msrb.mxu3 %v9193_v7  ;;  %v2780_v5 = vpop.f32.mrf.mxu1  ;;  %v2753_v44 = vadd.f32 %v2752_v25, %v2739_v26  ;;  %v8633_v7 = vor.u32 %v10209_v62, %v8630_v22  ;;  %v8605_v53 = vor.u32 %v10202_v38, %v8602_v13  ;;  %v10195_v26 = vld [vmem:[#allocation14 + $0x544] sm:$0xf]  ;;  %v1104_v62 = vperm.slane %v11058_v34, 7 }
 0x298   :  { %5868 = vmatpush.bf16.msrb.mxu1 %v8745_v15 }
 0x299   :  { %5883 = vmatpush.bf16.msrb.mxu2 %v8941_v12  ;;  %5859 = vmatpush.bf16.msrb.mxu0 %v8381_v10  ;;  %v10230_v12 = vld [vmem:[#allocation14 + $0x65c] sm:$0xf] }
 0x29a   :  { %v8717_v42 = vor.u32 %v10230_v12, %v8714_v2  ;;  %v9022_v12 = vld [vmem:[#allocation14 + $0x8dc] sm:$0xf0]  ;;  %v7992_v2 = vld [vmem:[#allocation14 + $0xb0] sm:$0xf] }
 0x29b   :  { %5897 = vmatpush.bf16.msrb.mxu3 %v9165_v19  ;;  %v2740_v35 = vpop.f32.mrf.mxu2  ;;  %v7993_v27 = vor.u32 %v10052_v11, %v7992_v2  ;;  %v8972_v11 = vld [vmem:[#allocation14 + $0x858] sm:$0xf] }
 0x29c   :  { %5869 = vmatpush.bf16.msrb.mxu1 %v8717_v42  ;;  %v2741_v57 = vadd.f32 %v2740_v35, %v1103_v16  ;;  %v8021_v16 = vor.u32 %v10059_v14, %v8020_v4  ;;  %v10136_v42 = vld [vmem:[#allocation14 + $0x368] sm:$0xf0] }
 0x29d   :  { %5884 = vmatpush.bf16.msrb.mxu2 %v8913_v39  ;;  %5860 = vmatpush.bf16.msrb.mxu0 %v8353_v6  ;;  %v8076_v39 = vld [vmem:[#allocation14 + $0x158] sm:$0xf]  ;;  %v2766_v10 = vpop.f32.mrf.mxu0  ;;  %v9081_v6 = vor.u32 %v10321_v52, %v9078_v41  ;;  %v7936_v52 = vld [vmem:[#allocation14 + $0x40] sm:$0xf]  ;;  %v10304_v4 = vld [vmem:[#allocation14 + $0x8a8] sm:$0xf0] }
 0x29e   :  { %v8077_v31 = vor.u32 %v10073_v40, %v8076_v39  ;;  %v2767_v58 = vadd.f32 %v2766_v10, %v2753_v44  ;;  %v2755_v1 = vadd.f32 %v2754_v55, %v2741_v57  ;;  %v9445_v39 = vor.u32 %v10412_v29, %v9442_v21  ;;  %v8300_v40 = vld [vmem:[#allocation14 + $0x318] sm:$0xf]  ;;  %v10405_v44 = vld [vmem:[#allocation14 + $0xbd4] sm:$0xf]  ;;  %v10038_v57 = vld [vmem:[#allocation14 + $0x58] sm:$0xf0] }
 0x29f   :  { %5898 = vmatpush.bf16.msrb.mxu3 %v9137_v28  ;;  %v2782_v30 = vpop.f32.mrf.mxu1  ;;  %v8272_v41 = vld [vmem:[#allocation14 + $0x2e0] sm:$0xf]  ;;  %v7937_v22 = vor.u32 %v10038_v57, %v7936_v52  ;;  %v10297_v29 = vld [vmem:[#allocation14 + $0x870] sm:$0xf0]  ;;  %v8916_v52 = vld [vmem:[#allocation14 + $0x7e8] sm:$0xf] }
 0x2a0   :  { %5870 = vmatpush.bf16.msrb.mxu1 %v8689_v43  ;;  %v2781_v0 = vadd.f32 %v2780_v5, %v2767_v58  ;;  %v7964_v5 = vld [vmem:[#allocation14 + $0x78] sm:$0xf]  ;;  %v10129_v43 = vld [vmem:[#allocation14 + $0x330] sm:$0xf0]  ;;  %v9417_v58 = vor.u32 %v10405_v44, %v9414_v45  ;;  %v8273_v55 = vor.u32 %v10122_v54, %v8272_v41  ;;  %v10370_v44 = vld [vmem:[#allocation14 + $0xabc] sm:$0xf] }
 0x2a1   :  { %5885 = vmatpush.bf16.msrb.mxu2 %v8885_v47  ;;  %v9109_v47 = vor.u32 %v10328_v33, %v9106_v23  ;;  %v8329_v33 = vor.u32 %v10136_v42, %v8328_v17  ;;  %v10045_v23 = vld [vmem:[#allocation14 + $0x90] sm:$0xf0]  ;;  %v8160_v45 = vld [vmem:[#allocation14 + $0x200] sm:$0xf]  ;;  %v10283_v57 = vld [vmem:[#allocation14 + $0x800] sm:$0xf0] }
 0x2a2   :  { %5847 = vmatmul.bf16.vlgmr.msra.gmra.mxu3 %v11024_v18  ;;  %v2847_v19 = vmul.f32 0.2, %v2781_v0  ;;  %v7965_v50 = vor.u32 %v10045_v23, %v7964_v5  ;;  %v10377_v17 = vld [vmem:[#allocation14 + $0xaf4] sm:$0xf] }
 0x2a3   :  { %5899 = vmatpush.bf16.msrb.mxu3 %v9109_v47 }
 0x2a4   :  { %5871 = vmatpush.bf16.msrb.mxu1 %v8661_v59  ;;  %v2863_v28 = vmax.f32 %v2781_v0, %v2847_v19  ;;  %v9386_v59 = vld [vmem:[#allocation14 + $0xbb4] sm:$0xf0] }
 0x2a5   :  { %5886 = vmatpush.bf16.msrb.mxu2 %v8857_v3  ;;  %v9050_v3 = vld [vmem:[#allocation14 + $0x914] sm:$0xf0]  ;;  %v2768_v8 = vpop.f32.mrf.mxu0  ;;  %v9389_v0 = vor.u32 %v10398_v37, %v9386_v59  ;;  %v10363_v37 = vld [vmem:[#allocation14 + $0xa84] sm:$0xf]  ;;  %v9246_v59 = vld [vmem:[#allocation14 + $0xa9c] sm:$0xf0] }
 0x2a6   :  { %v2769_v9 = vadd.f32 %v2768_v8, %v2755_v1  ;;  %v9053_v15 = vor.u32 %v10314_v46, %v9050_v3  ;;  %v8244_v46 = vld [vmem:[#allocation14 + $0x2a8] sm:$0xf]  ;;  %v10115_v1 = vld [vmem:[#allocation14 + $0x2c0] sm:$0xf0]  ;;  %v9000_v3 = vld [vmem:[#allocation14 + $0x890] sm:$0xf] }
 0x2a7   :  { %5900 = vmatpush.bf16.msrb.mxu3 %v9081_v6  ;;  %v7908_v6 = vld [vmem:[#allocation14 + $0x8] sm:$0xf]  ;;  %v9358_v8 = vld [vmem:[#allocation14 + $0xb7c] sm:$0xf0]  ;;  %v8245_v34 = vor.u32 %v10115_v1, %v8244_v46  ;;  %v9001_v13 = vor.u32 %v10304_v4, %v9000_v3  ;;  %v10087_v46 = vld [vmem:[#allocation14 + $0x1e0] sm:$0xf0] }
 0x2a8   :  { %v2783_v20 = vadd.f32 %v2782_v30, %v2769_v9  ;;  %5872 = vmatpush.bf16.msrb.mxu1 %v8633_v7  ;;  %v10391_v7 = vld [vmem:[#allocation14 + $0xb64] sm:$0xf]  ;;  %v10276_v1 = vld [vmem:[#allocation14 + $0x7c8] sm:$0xf0] }
 0x2a9   :  { %5887 = vmatpush.bf16.msrb.mxu2 %v8829_v56  ;;  %v10307_v56 = vld [vmem:[#allocation14 + $0x8c4] sm:$0xf]  ;;  %v10468_v3 = vld [vmem:[#allocation14 + $0xdcc] sm:$0xf] }
 0x2aa   :  { %v2855_v25 = vmul.f32 0.2, %v2783_v20  ;;  %v9025_v60 = vor.u32 %v10307_v56, %v9022_v12  ;;  %v8216_v56 = vld [vmem:[#allocation14 + $0x270] sm:$0xf]  ;;  %v10108_v12 = vld [vmem:[#allocation14 + $0x288] sm:$0xf0] }
 0x2ab   :  { %5901 = vmatpush.bf16.msrb.mxu3 %v9053_v15  ;;  %v9361_v15 = vor.u32 %v10391_v7, %v9358_v8  ;;  %v8217_v21 = vor.u32 %v10108_v12, %v8216_v56  ;;  %v10192_v7 = vld [vmem:[#allocation14 + $0x528] sm:$0xf0]  ;;  %v9249_v8 = vor.u32 %v10363_v37, %v9246_v59  ;;  %v8860_v12 = vld [vmem:[#allocation14 + $0x778] sm:$0xf]  ;;  %v9582_v37 = vld [vmem:[#allocation14 + $0xd3c] sm:$0xf0] }
 0x2ac   :  { %5873 = vmatpush.bf16.msrb.mxu1 %v8605_v53  ;;  %v9140_v59 = vld [vmem:[#allocation14 + $0x9a8] sm:$0xf] }
 0x2ad   :  { %5888 = vmatpush.bf16.msrb.mxu2 %v8801_v49  ;;  %v8574_v49 = vld [vmem:[#allocation14 + $0x55c] sm:$0xf0]  ;;  %v2808_v14 = vpop.f32.mrf.mxu3 }
 0x2ae   :  { %v8577_v35 = vor.u32 %v10195_v26, %v8574_v49  ;;  %v8973_v49 = vor.u32 %v10297_v29, %v8972_v11  ;;  %v10461_v29 = vld [vmem:[#allocation14 + $0xd94] sm:$0xf] }
 0x2af   :  { %5902 = vmatpush.bf16.msrb.mxu3 %v9025_v60  ;;  %v9302_v60 = vld [vmem:[#allocation14 + $0xb0c] sm:$0xf0] }
 0x2b0   :  { %5889 = vmatmul.bf16.vlgmr.msrb.gmra.mxu2 %v11050_v61  ;;  %5874 = vmatpush.bf16.msrb.mxu1 %v8577_v35  ;;  %v9305_v23 = vor.u32 %v10377_v17, %v9302_v60  ;;  %v9638_v17 = vld [vmem:[#allocation14 + $0xdac] sm:$0xf0]  ;;  %v8832_v60 = vld [vmem:[#allocation14 + $0x740] sm:$0xf] }
 0x2b1   :  { %5937 = vmatpush.bf16.msra.mxu2 %v8105_v24  ;;  %v2871_v24 = vmax.f32 %v2783_v20, %v2855_v25  ;;  %v9330_v20 = vld [vmem:[#allocation14 + $0xb44] sm:$0xf0] }
 0x2b2   :  { %5903 = vmatmul.bf16.vlgmr.msrb.gmra.mxu3 %v11055_v63 }
 0x2b3   :  { %v11063_v10 = vpack.c.bf16 %v2871_v24, %v2863_v28  ;;  %v2794_v47 = vpop.f32.mrf.mxu2  ;;  %5951 = vmatpush.bf16.msra.mxu3 %v8329_v33  ;;  %v10101_v28 = vld [vmem:[#allocation14 + $0x250] sm:$0xf0]  ;;  %v8944_v24 = vld [vmem:[#allocation14 + $0x820] sm:$0xf]  ;;  %v10290_v33 = vld [vmem:[#allocation14 + $0x838] sm:$0xf0] }
 0x2b4   :  { %v2795_v9 = vadd.f32 %v2794_v47, %v1104_v62  ;;  %v8945_v35 = vor.u32 %v10290_v33, %v8944_v24  ;;  %v10454_v33 = vld [vmem:[#allocation14 + $0xd5c] sm:$0xf] }
 0x2b5   :  { %5938 = vmatpush.bf16.msra.mxu2 %v8077_v31  ;;  %5805 = vmatmul.bf16.vlgmr.msra.gmra.mxu0 %v11063_v10  ;;  %v8301_v31 = vor.u32 %v10129_v43, %v8300_v40  ;;  %v2810_v5 = vpop.f32.mrf.mxu3 }
 0x2b6   :  { %5909 = vmatpush.bf16.msra.mxu0 %v9445_v39  ;;  %v2809_v53 = vadd.f32 %v2808_v14, %v2795_v9  ;;  %v8552_v14 = vld [vmem:[#allocation14 + $0x510] sm:$0xf] }
 0x2b7   :  { %5952 = vmatpush.bf16.msra.mxu3 %v8301_v31  ;;  %v2836_v30 = vpop.f32.mrf.mxu1  ;;  %v9274_v31 = vld [vmem:[#allocation14 + $0xad4] sm:$0xf0]  ;;  %v8553_v56 = vor.u32 %v10192_v7, %v8552_v14  ;;  %v9112_v14 = vld [vmem:[#allocation14 + $0x970] sm:$0xf]  ;;  %v10332_v7 = vld [vmem:[#allocation14 + $0x988] sm:$0xf0] }
 0x2b9   :  { %5939 = vmatpush.bf16.msra.mxu2 %v8049_v36  ;;  %v10031_v36 = vld [vmem:[#allocation14 + $0x20] sm:$0xf0] }
 0x2ba   :  { %5910 = vmatpush.bf16.msra.mxu0 %v9417_v58  ;;  %v7909_v38 = vor.u32 %v10031_v36, %v7908_v6  ;;  %v8917_v6 = vor.u32 %v10283_v57, %v8916_v52  ;;  %v8132_v36 = vld [vmem:[#allocation14 + $0x1c8] sm:$0xf] }
 0x2bb   :  { %5953 = vmatpush.bf16.msra.mxu3 %v8273_v55  ;;  %v2796_v2 = vpop.f32.mrf.mxu2  ;;  %v9277_v55 = vor.u32 %v10370_v44, %v9274_v31  ;;  %v8133_v9 = vor.u32 %v10087_v46, %v8132_v36  ;;  %v8804_v44 = vld [vmem:[#allocation14 + $0x708] sm:$0xf] }
 0x2bc   :  { %v2797_v42 = vadd.f32 %v2796_v2, %v1104_v62  ;;  %v10269_v2 = vld [vmem:[#allocation14 + $0x790] sm:$0xf0]  ;;  %v8468_v31 = vld [vmem:[#allocation14 + $0x468] sm:$0xf] }
 0x2bd   :  { %5940 = vmatpush.bf16.msra.mxu2 %v8021_v16  ;;  %v10384_v16 = vld [vmem:[#allocation14 + $0xb2c] sm:$0xf]  ;;  %v2822_v19 = vpop.f32.mrf.mxu0 }
 0x2be   :  { %5911 = vmatpush.bf16.msra.mxu0 %v9389_v0  ;;  %v2823_v25 = vadd.f32 %v2822_v19, %v2809_v53  ;;  %v9333_v26 = vor.u32 %v10384_v16, %v9330_v20  ;;  %v2811_v43 = vadd.f32 %v2810_v5, %v2797_v42  ;;  %v8888_v0 = vld [vmem:[#allocation14 + $0x7b0] sm:$0xf]  ;;  %v8524_v53 = vld [vmem:[#allocation14 + $0x4d8] sm:$0xf]  ;;  %v8496_v5 = vld [vmem:[#allocation14 + $0x4a0] sm:$0xf] }
 0x2bf   :  { %5954 = vmatpush.bf16.msra.mxu3 %v8245_v34  ;;  %v2838_v41 = vpop.f32.mrf.mxu1  ;;  %v9224_v34 = vld [vmem:[#allocation14 + $0xa50] sm:$0xf]  ;;  %v8889_v16 = vor.u32 %v10276_v1, %v8888_v0  ;;  %v9196_v42 = vld [vmem:[#allocation14 + $0xa18] sm:$0xf]  ;;  %v10440_v0 = vld [vmem:[#allocation14 + $0xcec] sm:$0xf] }
 0x2c0   :  { %v2837_v40 = vadd.f32 %v2836_v30, %v2823_v25  ;;  %v10353_v25 = vld [vmem:[#allocation14 + $0xa30] sm:$0xf0]  ;;  %v8440_v1 = vld [vmem:[#allocation14 + $0x430] sm:$0xf] }
 0x2c1   :  { %5941 = vmatpush.bf16.msra.mxu2 %v7993_v27  ;;  %v8188_v27 = vld [vmem:[#allocation14 + $0x238] sm:$0xf]  ;;  %v9197_v24 = vor.u32 %v10353_v25, %v9196_v42  ;;  %v10426_v42 = vld [vmem:[#allocation14 + $0xc7c] sm:$0xf]  ;;  %v8384_v25 = vld [vmem:[#allocation14 + $0x3c0] sm:$0xf] }
 0x2c2   :  { %5912 = vmatpush.bf16.msra.mxu0 %v9361_v15  ;;  %v8189_v39 = vor.u32 %v10101_v28, %v8188_v27  ;;  %v2848_v62 = vmul.f32 0.2, %v2837_v40  ;;  %v10262_v27 = vld [vmem:[#allocation14 + $0x758] sm:$0xf0]  ;;  %v9641_v28 = vor.u32 %v10461_v29, %v9638_v17  ;;  %v8050_v29 = vld [vmem:[#allocation14 + $0x13c] sm:$0xf0] }
 0x2c3   :  { %5955 = vmatpush.bf16.msra.mxu3 %v8217_v21  ;;  %v10185_v21 = vld [vmem:[#allocation14 + $0x4f0] sm:$0xf0] }
 0x2c4   :  { %v2864_v30 = vmax.f32 %v2837_v40, %v2848_v62  ;;  %v9168_v40 = vld [vmem:[#allocation14 + $0x9e0] sm:$0xf]  ;;  %v10339_v62 = vld [vmem:[#allocation14 + $0x9c0] sm:$0xf0] }
 0x2c5   :  { %5942 = vmatpush.bf16.msra.mxu2 %v7965_v50  ;;  %5861 = vmatmul.bf16.vlgmr.msrb.gmra.mxu0 %v11046_v48  ;;  %v10094_v50 = vld [vmem:[#allocation14 + $0x218] sm:$0xf0]  ;;  %v2824_v47 = vpop.f32.mrf.mxu0  ;;  %v9141_v46 = vor.u32 %v10339_v62, %v9140_v59  ;;  %v10133_v59 = vld [vmem:[#allocation14 + $0x354] sm:$0xf]  ;;  %v8330_v62 = vld [vmem:[#allocation14 + $0x36c] sm:$0xf0] }
 0x2c6   :  { %5913 = vmatpush.bf16.msra.mxu0 %v9333_v26  ;;  %v2825_v58 = vadd.f32 %v2824_v47, %v2811_v43  ;;  %v8161_v54 = vor.u32 %v10094_v50, %v8160_v45  ;;  %v8861_v26 = vor.u32 %v10269_v2, %v8860_v12  ;;  %v10346_v43 = vld [vmem:[#allocation14 + $0x9f8] sm:$0xf0]  ;;  %v10255_v50 = vld [vmem:[#allocation14 + $0x720] sm:$0xf0]  ;;  %v9526_v12 = vld [vmem:[#allocation14 + $0xccc] sm:$0xf0] }
 0x2c7   :  { %5956 = vmatpush.bf16.msra.mxu3 %v8189_v39  ;;  %v9610_v39 = vld [vmem:[#allocation14 + $0xd74] sm:$0xf0]  ;;  %v10447_v47 = vld [vmem:[#allocation14 + $0xd24] sm:$0xf]  ;;  %v9169_v57 = vor.u32 %v10346_v43, %v9168_v40 }
 0x2c8   :  { %v9613_v52 = vor.u32 %v10454_v33, %v9610_v39  ;;  %v9585_v36 = vor.u32 %v10447_v47, %v9582_v37  ;;  %v9084_v2 = vld [vmem:[#allocation14 + $0x938] sm:$0xf]  ;;  %v8022_v33 = vld [vmem:[#allocation14 + $0x104] sm:$0xf0]  ;;  %v9470_v39 = vld [vmem:[#allocation14 + $0xc5c] sm:$0xf0] }
 0x2c9   :  { %5943 = vmatpush.bf16.msra.mxu2 %v7937_v22  ;;  %v2839_v22 = vadd.f32 %v2838_v41, %v2825_v58  ;;  %v10171_v58 = vld [vmem:[#allocation14 + $0x480] sm:$0xf0]  ;;  %v10077_v41 = vld [vmem:[#allocation14 + $0x194] sm:$0xf]  ;;  %v10416_v37 = vld [vmem:[#allocation14 + $0xc28] sm:$0xf0] }
 0x2ca   :  { %5914 = vmatpush.bf16.msra.mxu0 %v9305_v23  ;;  %v10178_v23 = vld [vmem:[#allocation14 + $0x4b8] sm:$0xf0]  ;;  %v10311_v47 = vld [vmem:[#allocation14 + $0x8e0] sm:$0xf0] }
 0x2cb   :  { %v2856_v4 = vmul.f32 0.2, %v2839_v22  ;;  %5957 = vmatpush.bf16.msra.mxu3 %v8161_v54  ;;  %v8497_v45 = vor.u32 %v10178_v23, %v8496_v5  ;;  %v8106_v54 = vld [vmem:[#allocation14 + $0x1ac] sm:$0xf0]  ;;  %v10419_v23 = vld [vmem:[#allocation14 + $0xc44] sm:$0xf] }
 0x2cd   :  { %5944 = vmatpush.bf16.msra.mxu2 %v7909_v38  ;;  %v9666_v38 = vld [vmem:[#allocation14 + $0xde4] sm:$0xf0]  ;;  %v2872_v15 = vmax.f32 %v2839_v22, %v2856_v4  ;;  %v8805_v22 = vor.u32 %v10255_v50, %v8804_v44  ;;  %v10143_v44 = vld [vmem:[#allocation14 + $0x3a0] sm:$0xf0] }
 0x2ce   :  { %5915 = vmatpush.bf16.msra.mxu0 %v9277_v55  ;;  %v9669_v20 = vor.u32 %v10468_v3, %v9666_v38  ;;  %v8469_v55 = vor.u32 %v10171_v58, %v8468_v31  ;;  %v10164_v3 = vld [vmem:[#allocation14 + $0x448] sm:$0xf0]  ;;  %v9554_v4 = vld [vmem:[#allocation14 + $0xd04] sm:$0xf0]  ;;  %v10049_v31 = vld [vmem:[#allocation14 + $0xb4] sm:$0xf] }
 0x2cf   :  { %v11070_v19 = vpack.c.bf16 %v2872_v15, %v2864_v30  ;;  %5958 = vmatpush.bf16.msra.mxu3 %v8133_v9  ;;  %v8078_v9 = vld [vmem:[#allocation14 + $0x174] sm:$0xf0]  ;;  %v8441_v38 = vor.u32 %v10164_v3, %v8440_v1  ;;  %v10433_v30 = vld [vmem:[#allocation14 + $0xcb4] sm:$0xf]  ;;  %v10248_v58 = vld [vmem:[#allocation14 + $0x6e8] sm:$0xf0]  ;;  %v8333_v3 = vor.u32 %v10133_v59, %v8330_v62 }
 0x2d0   :  { %5945 = vmatmul.bf16.vlgmr.msra.gmra.mxu2 %v11031_v51  ;;  %v8412_v15 = vld [vmem:[#allocation14 + $0x3f8] sm:$0xf] }
 0x2d1   :  { %5993 = vmatpush.bf16.msrb.mxu2 %v9001_v13  ;;  %v10360_v13 = vld [vmem:[#allocation14 + $0xa68] sm:$0xf0]  ;;  %5819 = vmatmul.bf16.vlgmr.msra.gmra.mxu1 %v11070_v19 }
 0x2d2   :  { %v9225_v11 = vor.u32 %v10360_v13, %v9224_v34  ;;  %5916 = vmatpush.bf16.msra.mxu0 %v9249_v8  ;;  %5923 = vmatpush.bf16.msra.mxu1 %v9669_v20  ;;  %v10070_v8 = vld [vmem:[#allocation14 + $0x15c] sm:$0xf]  ;;  %v9557_v34 = vor.u32 %v10440_v0, %v9554_v4  ;;  %v9113_v13 = vor.u32 %v10332_v7, %v9112_v14  ;;  %v10325_v20 = vld [vmem:[#allocation14 + $0x950] sm:$0xf0]  ;;  %v7966_v0 = vld [vmem:[#allocation14 + $0x94] sm:$0xf0] }
 0x2d3   :  { %5959 = vmatmul.bf16.vlgmr.msra.gmra.mxu3 %v11024_v18  ;;  %v9085_v17 = vor.u32 %v10325_v20, %v9084_v2  ;;  %v8748_v4 = vld [vmem:[#allocation14 + $0x698] sm:$0xf]  ;;  %v10241_v14 = vld [vmem:[#allocation14 + $0x6b0] sm:$0xf0]  ;;  %v10234_v2 = vld [vmem:[#allocation14 + $0x678] sm:$0xf0] }
 0x2d4   :  { %6007 = vmatpush.bf16.msrb.mxu3 %v9225_v11  ;;  %v10063_v11 = vld [vmem:[#allocation14 + $0x124] sm:$0xf]  ;;  %v9420_v7 = vld [vmem:[#allocation14 + $0xbd8] sm:$0xf]  ;;  %v9392_v20 = vld [vmem:[#allocation14 + $0xba0] sm:$0xf] }
 0x2d5   :  { %5994 = vmatpush.bf16.msrb.mxu2 %v8973_v49  ;;  %v8525_v49 = vor.u32 %v10185_v21, %v8524_v53  ;;  %5917 = vmatmul.bf16.vlgmr.msra.gmra.mxu0 %v11063_v10  ;;  %v9529_v21 = vor.u32 %v10433_v30, %v9526_v12  ;;  %v10035_v30 = vld [vmem:[#allocation14 + $0x44] sm:$0xf]  ;;  %v8720_v12 = vld [vmem:[#allocation14 + $0x660] sm:$0xf] }
 0x2d6   :  { %5965 = vmatpush.bf16.msrb.mxu0 %v8553_v56  ;;  %5924 = vmatpush.bf16.msra.mxu1 %v9641_v28  ;;  %v8081_v56 = vor.u32 %v10070_v8, %v8078_v9  ;;  %v10318_v28 = vld [vmem:[#allocation14 + $0x918] sm:$0xf0]  ;;  %v10409_v8 = vld [vmem:[#allocation14 + $0xbf0] sm:$0xf0] }
 0x2d7   :  { %v10126_v9 = vld [vmem:[#allocation14 + $0x31c] sm:$0xf] }
 0x2d8   :  { %6008 = vmatpush.bf16.msrb.mxu3 %v9197_v24  ;;  %v10056_v24 = vld [vmem:[#allocation14 + $0xec] sm:$0xf] }
 0x2d9   :  { %5995 = vmatpush.bf16.msrb.mxu2 %v8945_v35  ;;  %v8833_v35 = vor.u32 %v10262_v27, %v8832_v60  ;;  %v9498_v60 = vld [vmem:[#allocation14 + $0xc94] sm:$0xf0]  ;;  %v9056_v27 = vld [vmem:[#allocation14 + $0x900] sm:$0xf]  ;;  %v8025_v50 = vor.u32 %v10056_v24, %v8022_v33  ;;  %v10395_v24 = vld [vmem:[#allocation14 + $0xb80] sm:$0xf0] }
 0x2da   :  { %5966 = vmatpush.bf16.msrb.mxu0 %v8525_v49  ;;  %5925 = vmatpush.bf16.msra.mxu1 %v9613_v52  ;;  %v8053_v49 = vor.u32 %v10063_v11, %v8050_v29  ;;  %v9501_v40 = vor.u32 %v10426_v42, %v9498_v60  ;;  %v9057_v43 = vor.u32 %v10318_v28, %v9056_v27  ;;  %v7994_v52 = vld [vmem:[#allocation14 + $0xcc] sm:$0xf0]  ;;  %v10402_v11 = vld [vmem:[#allocation14 + $0xbb8] sm:$0xf0]  ;;  %v10119_v29 = vld [vmem:[#allocation14 + $0x2e4] sm:$0xf] }
 0x2db   :  { %v10028_v42 = vld [vmem:[#allocation14 + $0xc] sm:$0xf]  ;;  %v8692_v60 = vld [vmem:[#allocation14 + $0x628] sm:$0xf]  ;;  %v10227_v27 = vld [vmem:[#allocation14 + $0x640] sm:$0xf0] }
 0x2dc   :  { %6009 = vmatpush.bf16.msrb.mxu3 %v9169_v57  ;;  %v8776_v57 = vld [vmem:[#allocation14 + $0x6d0] sm:$0xf]  ;;  %v9364_v28 = vld [vmem:[#allocation14 + $0xb68] sm:$0xf]  ;;  %v10112_v33 = vld [vmem:[#allocation14 + $0x2ac] sm:$0xf] }
 0x2dd   :  { %5996 = vmatpush.bf16.msrb.mxu2 %v8917_v6  ;;  %v8109_v6 = vor.u32 %v10077_v41, %v8106_v54  ;;  %v9448_v41 = vld [vmem:[#allocation14 + $0xc10] sm:$0xf] }
 0x2de   :  { %5967 = vmatpush.bf16.msrb.mxu0 %v8497_v45  ;;  %5926 = vmatpush.bf16.msra.mxu1 %v9585_v36  ;;  %v9028_v45 = vld [vmem:[#allocation14 + $0x8c8] sm:$0xf]  ;;  %v8777_v36 = vor.u32 %v10248_v58, %v8776_v57  ;;  %v9449_v1 = vor.u32 %v10416_v37, %v9448_v41  ;;  %v10105_v57 = vld [vmem:[#allocation14 + $0x274] sm:$0xf]  ;;  %v8218_v58 = vld [vmem:[#allocation14 + $0x28c] sm:$0xf0] }
 0x2df   :  { %v10294_v41 = vld [vmem:[#allocation14 + $0x85c] sm:$0xf]  ;;  %v8221_v62 = vor.u32 %v10105_v57, %v8218_v58  ;;  %v10465_v57 = vld [vmem:[#allocation14 + $0xdb0] sm:$0xf0] }
 0x2e0   :  { %6010 = vmatpush.bf16.msrb.mxu3 %v9141_v46  ;;  %v10042_v46 = vld [vmem:[#allocation14 + $0x7c] sm:$0xf] }
 0x2e1   :  { %5997 = vmatpush.bf16.msrb.mxu2 %v8889_v16  ;;  %v10157_v16 = vld [vmem:[#allocation14 + $0x410] sm:$0xf0]  ;;  %5875 = vmatmul.bf16.vlgmr.msrb.gmra.mxu1 %v11043_v32  ;;  %v10182_v58 = vld [vmem:[#allocation14 + $0x4dc] sm:$0xf] }
 0x2e2   :  { %5968 = vmatpush.bf16.msrb.mxu0 %v8469_v55  ;;  %v8413_v53 = vor.u32 %v10157_v16, %v8412_v15  ;;  %5927 = vmatpush.bf16.msra.mxu1 %v9557_v34  ;;  %v9029_v55 = vor.u32 %v10311_v47, %v9028_v45  ;;  %v7969_v34 = vor.u32 %v10042_v46, %v7966_v0  ;;  %v7938_v15 = vld [vmem:[#allocation14 + $0x5c] sm:$0xf0]  ;;  %v8664_v45 = vld [vmem:[#allocation14 + $0x5f0] sm:$0xf]  ;;  %v10381_v46 = vld [vmem:[#allocation14 + $0xb10] sm:$0xf0] }
 0x2e3   :  { %v9421_v16 = vor.u32 %v10409_v8, %v9420_v7  ;;  %v9336_v47 = vld [vmem:[#allocation14 + $0xb30] sm:$0xf]  ;;  %v10098_v0 = vld [vmem:[#allocation14 + $0x23c] sm:$0xf] }
 0x2e4   :  { %6011 = vmatpush.bf16.msrb.mxu3 %v9113_v13  ;;  %v8749_v13 = vor.u32 %v10241_v14, %v8748_v4  ;;  %v8946_v4 = vld [vmem:[#allocation14 + $0x83c] sm:$0xf0] }
 0x2e5   :  { %5998 = vmatpush.bf16.msrb.mxu2 %v8861_v26  ;;  %v10150_v26 = vld [vmem:[#allocation14 + $0x3d8] sm:$0xf0] }
 0x2e6   :  { %5969 = vmatpush.bf16.msrb.mxu0 %v8441_v38  ;;  %v8385_v5 = vor.u32 %v10150_v26, %v8384_v25  ;;  %5928 = vmatpush.bf16.msra.mxu1 %v9529_v21  ;;  %v8302_v38 = vld [vmem:[#allocation14 + $0x334] sm:$0xf0]  ;;  %v7941_v21 = vor.u32 %v10035_v30, %v7938_v15  ;;  %v7910_v25 = vld [vmem:[#allocation14 + $0x24] sm:$0xf0]  ;;  %v9393_v26 = vor.u32 %v10402_v11, %v9392_v20  ;;  %v10374_v30 = vld [vmem:[#allocation14 + $0xad8] sm:$0xf0] }
 0x2e7   :  { %v10091_v15 = vld [vmem:[#allocation14 + $0x204] sm:$0xf]  ;;  %v8580_v20 = vld [vmem:[#allocation14 + $0x548] sm:$0xf] }
 0x2e8   :  { %6012 = vmatpush.bf16.msrb.mxu3 %v9085_v17  ;;  %v8721_v17 = vor.u32 %v10234_v2, %v8720_v12  ;;  %v8918_v12 = vld [vmem:[#allocation14 + $0x804] sm:$0xf0]  ;;  %v10199_v11 = vld [vmem:[#allocation14 + $0x560] sm:$0xf0] }
 0x2e9   :  { %5999 = vmatpush.bf16.msrb.mxu2 %v8833_v35  ;;  %v8356_v35 = vld [vmem:[#allocation14 + $0x388] sm:$0xf] }
 0x2ea   :  { %5970 = vmatpush.bf16.msrb.mxu0 %v8413_v53  ;;  %v8357_v54 = vor.u32 %v10143_v44, %v8356_v35  ;;  %5929 = vmatpush.bf16.msra.mxu1 %v9501_v40  ;;  %v8274_v53 = vld [vmem:[#allocation14 + $0x2fc] sm:$0xf0]  ;;  %v7913_v40 = vor.u32 %v10028_v42, %v7910_v25  ;;  %v9365_v35 = vor.u32 %v10395_v24, %v9364_v28  ;;  %v10084_v42 = vld [vmem:[#allocation14 + $0x1cc] sm:$0xf]  ;;  %v10189_v24 = vld [vmem:[#allocation14 + $0x514] sm:$0xf] }
 0x2eb   :  { %v10472_v28 = vld [vmem:[#allocation14 + $0xde8] sm:$0xf0] }
 0x2ec   :  { %6013 = vmatpush.bf16.msrb.mxu3 %v9057_v43  ;;  %v8693_v43 = vor.u32 %v10227_v27, %v8692_v60  ;;  %v8890_v60 = vld [vmem:[#allocation14 + $0x7cc] sm:$0xf0] }
 0x2ed   :  { %6000 = vmatpush.bf16.msrb.mxu2 %v8805_v22  ;;  %v9473_v22 = vor.u32 %v10419_v23, %v9470_v39  ;;  %v10301_v23 = vld [vmem:[#allocation14 + $0x894] sm:$0xf]  ;;  %v9002_v39 = vld [vmem:[#allocation14 + $0x8ac] sm:$0xf0] }
 0x2ee   :  { %5971 = vmatpush.bf16.msrb.mxu0 %v8385_v5  ;;  %v8246_v5 = vld [vmem:[#allocation14 + $0x2c4] sm:$0xf0]  ;;  %v9672_v27 = vld [vmem:[#allocation14 + $0xdd0] sm:$0xf] }
 0x2ef   :  { %5930 = vmatpush.bf16.msra.mxu1 %v9473_v22  ;;  %v8249_v44 = vor.u32 %v10112_v33, %v8246_v5  ;;  %v8636_v22 = vld [vmem:[#allocation14 + $0x5b8] sm:$0xf]  ;;  %v8581_v33 = vor.u32 %v10199_v11, %v8580_v20  ;;  %v8554_v5 = vld [vmem:[#allocation14 + $0x52c] sm:$0xf0]  ;;  %v10081_v11 = vld [vmem:[#allocation14 + $0x1b0] sm:$0xf0] }
 0x2f0   :  { %6001 = vmatmul.bf16.vlgmr.msrb.gmra.mxu2 %v11050_v61  ;;  %6014 = vmatpush.bf16.msrb.mxu3 %v9029_v55  ;;  %v10213_v55 = vld [vmem:[#allocation14 + $0x5d0] sm:$0xf0]  ;;  %v8112_v20 = vld [vmem:[#allocation14 + $0x198] sm:$0xf] }
 0x2f1   :  { %6049 = vmatpush.bf16.msra.mxu2 %v8109_v6  ;;  %v7997_v6 = vor.u32 %v10049_v31, %v7994_v52  ;;  %v9005_v31 = vor.u32 %v10301_v23, %v9002_v39  ;;  %v10388_v52 = vld [vmem:[#allocation14 + $0xb48] sm:$0xf0]  ;;  %v8637_v14 = vor.u32 %v10213_v55, %v8636_v22  ;;  %v10357_v23 = vld [vmem:[#allocation14 + $0xa54] sm:$0xf]  ;;  %v9226_v39 = vld [vmem:[#allocation14 + $0xa6c] sm:$0xf0] }
 0x2f2   :  { %5972 = vmatpush.bf16.msrb.mxu0 %v8357_v54  ;;  %5931 = vmatmul.bf16.vlgmr.msra.gmra.mxu1 %v11070_v19  ;;  %v8974_v54 = vld [vmem:[#allocation14 + $0x874] sm:$0xf0]  ;;  %v9337_v59 = vor.u32 %v10388_v52, %v9336_v47  ;;  %v8557_v47 = vor.u32 %v10189_v24, %v8554_v5  ;;  %v10259_v22 = vld [vmem:[#allocation14 + $0x744] sm:$0xf]  ;;  %v8834_v55 = vld [vmem:[#allocation14 + $0x75c] sm:$0xf0] }
 0x2f3   :  { %5979 = vmatpush.bf16.msrb.mxu1 %v8777_v36  ;;  %6015 = vmatmul.bf16.vlgmr.msrb.gmra.mxu3 %v11055_v63  ;;  %v8977_v36 = vor.u32 %v10294_v41, %v8974_v54  ;;  %v9644_v52 = vld [vmem:[#allocation14 + $0xd98] sm:$0xf]  ;;  %v10350_v54 = vld [vmem:[#allocation14 + $0xa1c] sm:$0xf]  ;;  %v8084_v24 = vld [vmem:[#allocation14 + $0x160] sm:$0xf] }
 0x2f4   :  { %6063 = vmatpush.bf16.msra.mxu3 %v8333_v3  ;;  %v10287_v3 = vld [vmem:[#allocation14 + $0x824] sm:$0xf]  ;;  %v8526_v41 = vld [vmem:[#allocation14 + $0x4f4] sm:$0xf0] }
 0x2f5   :  { %6050 = vmatpush.bf16.msra.mxu2 %v8081_v56  ;;  %v8305_v56 = vor.u32 %v10126_v9, %v8302_v38  ;;  %5973 = vmatmul.bf16.vlgmr.msrb.gmra.mxu0 %v11046_v48  ;;  %v8608_v9 = vld [vmem:[#allocation14 + $0x580] sm:$0xf]  ;;  %v10206_v38 = vld [vmem:[#allocation14 + $0x598] sm:$0xf0] }
 0x2f6   :  { %6021 = vmatpush.bf16.msra.mxu0 %v9449_v1  ;;  %v8190_v1 = vld [vmem:[#allocation14 + $0x254] sm:$0xf0]  ;;  %v8609_v2 = vor.u32 %v10206_v38, %v8608_v9  ;;  %v10252_v9 = vld [vmem:[#allocation14 + $0x70c] sm:$0xf]  ;;  %v8806_v38 = vld [vmem:[#allocation14 + $0x724] sm:$0xf0] }
 0x2f7   :  { %5980 = vmatpush.bf16.msrb.mxu1 %v8749_v13  ;;  %v8193_v8 = vor.u32 %v10098_v0, %v8190_v1  ;;  %v8949_v13 = vor.u32 %v10287_v3, %v8946_v4  ;;  %v10458_v0 = vld [vmem:[#allocation14 + $0xd78] sm:$0xf0]  ;;  %v10175_v1 = vld [vmem:[#allocation14 + $0x4a4] sm:$0xf]  ;;  %v8498_v3 = vld [vmem:[#allocation14 + $0x4bc] sm:$0xf0] }
 0x2f8   :  { %6064 = vmatpush.bf16.msra.mxu3 %v8305_v56  ;;  %v10280_v56 = vld [vmem:[#allocation14 + $0x7ec] sm:$0xf]  ;;  %v10343_v4 = vld [vmem:[#allocation14 + $0x9e4] sm:$0xf] }
 0x2f9   :  { %6051 = vmatpush.bf16.msra.mxu2 %v8053_v49  ;;  %v8277_v49 = vor.u32 %v10119_v29, %v8274_v53  ;;  %v8921_v25 = vor.u32 %v10280_v56, %v8918_v12  ;;  %v8470_v56 = vld [vmem:[#allocation14 + $0x484] sm:$0xf0]  ;;  %v10336_v12 = vld [vmem:[#allocation14 + $0x9ac] sm:$0xf] }
 0x2fa   :  { %6022 = vmatpush.bf16.msra.mxu0 %v9421_v16  ;;  %v8162_v16 = vld [vmem:[#allocation14 + $0x21c] sm:$0xf0] }
 0x2fb   :  { %5981 = vmatpush.bf16.msrb.mxu1 %v8721_v17  ;;  %v8165_v53 = vor.u32 %v10091_v15, %v8162_v16  ;;  %v10367_v17 = vld [vmem:[#allocation14 + $0xaa0] sm:$0xf0]  ;;  %v10168_v16 = vld [vmem:[#allocation14 + $0x46c] sm:$0xf] }
 0x2fc   :  { %6065 = vmatpush.bf16.msra.mxu3 %v8277_v49  ;;  %v10273_v49 = vld [vmem:[#allocation14 + $0x7b4] sm:$0xf]  ;;  %v10451_v15 = vld [vmem:[#allocation14 + $0xd40] sm:$0xf0] }
 0x2fd   :  { %6052 = vmatpush.bf16.msra.mxu2 %v8025_v50  ;;  %v10220_v50 = vld [vmem:[#allocation14 + $0x608] sm:$0xf0] }
 0x2fe   :  { %6023 = vmatpush.bf16.msra.mxu0 %v9393_v26  ;;  %v8665_v37 = vor.u32 %v10220_v50, %v8664_v45  ;;  %v8134_v26 = vld [vmem:[#allocation14 + $0x1e4] sm:$0xf0]  ;;  %v10266_v45 = vld [vmem:[#allocation14 + $0x77c] sm:$0xf]  ;;  %v8862_v50 = vld [vmem:[#allocation14 + $0x794] sm:$0xf0] }
 0x2ff   :  { %5982 = vmatpush.bf16.msrb.mxu1 %v8693_v43  ;;  %v8137_v43 = vor.u32 %v10084_v42, %v8134_v26  ;;  %v9560_v42 = vld [vmem:[#allocation14 + $0xcf0] sm:$0xf]  ;;  %v10161_v26 = vld [vmem:[#allocation14 + $0x434] sm:$0xf] }
 0x300   :  { %6066 = vmatpush.bf16.msra.mxu3 %v8249_v44  ;;  %v9673_v44 = vor.u32 %v10472_v28, %v9672_v27  ;;  %v10329_v27 = vld [vmem:[#allocation14 + $0x974] sm:$0xf]  ;;  %v9114_v28 = vld [vmem:[#allocation14 + $0x98c] sm:$0xf0] }
 0x301   :  { %6053 = vmatpush.bf16.msra.mxu2 %v7997_v6  ;;  %v9308_v6 = vld [vmem:[#allocation14 + $0xaf8] sm:$0xf] }
 0x302   :  { %6024 = vmatpush.bf16.msra.mxu0 %v9365_v35  ;;  %v9309_v7 = vor.u32 %v10381_v46, %v9308_v6  ;;  %v8893_v35 = vor.u32 %v10273_v49, %v8890_v60  ;;  %v8529_v6 = vor.u32 %v10182_v58, %v8526_v41  ;;  %v9616_v46 = vld [vmem:[#allocation14 + $0xd60] sm:$0xf]  ;;  %v8113_v49 = vor.u32 %v10081_v11, %v8112_v20  ;;  %v8442_v60 = vld [vmem:[#allocation14 + $0x44c] sm:$0xf0]  ;;  %v8336_v20 = vld [vmem:[#allocation14 + $0x358] sm:$0xf] }
 0x303   :  { %5983 = vmatpush.bf16.msrb.mxu1 %v8665_v37  ;;  %v9198_v37 = vld [vmem:[#allocation14 + $0xa34] sm:$0xf0]  ;;  %v10137_v11 = vld [vmem:[#allocation14 + $0x370] sm:$0xf0] }
 0x304   :  { %6067 = vmatpush.bf16.msra.mxu3 %v8221_v62  ;;  %v9645_v62 = vor.u32 %v10465_v57, %v9644_v52  ;;  %v10067_v52 = vld [vmem:[#allocation14 + $0x140] sm:$0xf0] }
 0x305   :  { %6054 = vmatpush.bf16.msra.mxu2 %v7969_v34  ;;  %v9280_v34 = vld [vmem:[#allocation14 + $0xac0] sm:$0xf] }
 0x306   :  { %6025 = vmatpush.bf16.msra.mxu0 %v9337_v59  ;;  %v9281_v29 = vor.u32 %v10374_v30, %v9280_v34  ;;  %v8865_v59 = vor.u32 %v10266_v45, %v8862_v50  ;;  %v8501_v34 = vor.u32 %v10175_v1, %v8498_v3  ;;  %v9588_v30 = vld [vmem:[#allocation14 + $0xd28] sm:$0xf]  ;;  %v8414_v45 = vld [vmem:[#allocation14 + $0x414] sm:$0xf0]  ;;  %v10322_v50 = vld [vmem:[#allocation14 + $0x93c] sm:$0xf] }
 0x307   :  { %5984 = vmatpush.bf16.msrb.mxu1 %v8637_v14  ;;  %v9170_v14 = vld [vmem:[#allocation14 + $0x9fc] sm:$0xf0]  ;;  %v9476_v1 = vld [vmem:[#allocation14 + $0xc48] sm:$0xf]  ;;  %v10423_v3 = vld [vmem:[#allocation14 + $0xc60] sm:$0xf0] }
 0x308   :  { %6068 = vmatpush.bf16.msra.mxu3 %v8193_v8  ;;  %v9617_v8 = vor.u32 %v10458_v0, %v9616_v46  ;;  %v10060_v46 = vld [vmem:[#allocation14 + $0x108] sm:$0xf0] }
 0x309   :  { %6055 = vmatpush.bf16.msra.mxu2 %v7941_v21  ;;  %v9252_v21 = vld [vmem:[#allocation14 + $0xa88] sm:$0xf] }
 0x30a   :  { %6026 = vmatpush.bf16.msra.mxu0 %v9309_v7  ;;  %v8837_v7 = vor.u32 %v10259_v22, %v8834_v55  ;;  %v8386_v22 = vld [vmem:[#allocation14 + $0x3dc] sm:$0xf0]  ;;  %v10315_v55 = vld [vmem:[#allocation14 + $0x904] sm:$0xf] }
 0x30b   :  { %5985 = vmatpush.bf16.msrb.mxu1 %v8609_v2  ;;  %v9142_v2 = vld [vmem:[#allocation14 + $0x9c4] sm:$0xf0] }
 0x30c   :  { %6069 = vmatpush.bf16.msra.mxu3 %v8165_v53  ;;  %v9589_v53 = vor.u32 %v10451_v15, %v9588_v30  ;;  %v10053_v30 = vld [vmem:[#allocation14 + $0xd0] sm:$0xf0] }
 0x30d   :  { %6056 = vmatpush.bf16.msra.mxu2 %v7913_v40  ;;  %v9253_v40 = vor.u32 %v10367_v17, %v9252_v21  ;;  %v8473_v21 = vor.u32 %v10168_v16, %v8470_v56  ;;  %v9145_v17 = vor.u32 %v10336_v12, %v9142_v2  ;;  %v10245_v15 = vld [vmem:[#allocation14 + $0x6d4] sm:$0xf]  ;;  %v8778_v16 = vld [vmem:[#allocation14 + $0x6ec] sm:$0xf0]  ;;  %v9477_v12 = vor.u32 %v10423_v3, %v9476_v1  ;;  %v9366_v1 = vld [vmem:[#allocation14 + $0xb84] sm:$0xf0] }
 0x30e   :  { %6027 = vmatpush.bf16.msra.mxu0 %v9281_v29  ;;  %v8809_v29 = vor.u32 %v10252_v9, %v8806_v38  ;;  %v10308_v9 = vld [vmem:[#allocation14 + $0x8cc] sm:$0xf]  ;;  %v10413_v56 = vld [vmem:[#allocation14 + $0xc14] sm:$0xf]  ;;  %v9450_v2 = vld [vmem:[#allocation14 + $0xc2c] sm:$0xf0] }
 0x30f   :  { %5986 = vmatpush.bf16.msrb.mxu1 %v8581_v33  ;;  %v10074_v33 = vld [vmem:[#allocation14 + $0x178] sm:$0xf0]  ;;  %v8252_v3 = vld [vmem:[#allocation14 + $0x2b0] sm:$0xf] }
 0x310   :  { %6057 = vmatmul.bf16.vlgmr.msra.gmra.mxu2 %v11031_v51  ;;  %6070 = vmatpush.bf16.msra.mxu3 %v8137_v43  ;;  %v10437_v43 = vld [vmem:[#allocation14 + $0xcd0] sm:$0xf0] }
 0x311   :  { %6105 = vmatpush.bf16.msrb.mxu2 %v9005_v31  ;;  %v9229_v31 = vor.u32 %v10357_v23, %v9226_v39  ;;  %v8445_v23 = vor.u32 %v10161_v26, %v8442_v60  ;;  %v9117_v39 = vor.u32 %v10329_v27, %v9114_v28  ;;  %v9453_v26 = vor.u32 %v10413_v56, %v9450_v2  ;;  %v10238_v60 = vld [vmem:[#allocation14 + $0x69c] sm:$0xf]  ;;  %v8750_v27 = vld [vmem:[#allocation14 + $0x6b4] sm:$0xf0] }
 0x312   :  { %6028 = vmatpush.bf16.msra.mxu0 %v9253_v40  ;;  %5987 = vmatmul.bf16.vlgmr.msrb.gmra.mxu1 %v11043_v32  ;;  %v9532_v40 = vld [vmem:[#allocation14 + $0xcb8] sm:$0xf]  ;;  %v10406_v28 = vld [vmem:[#allocation14 + $0xbdc] sm:$0xf] }
 0x313   :  { %6035 = vmatpush.bf16.msra.mxu1 %v9673_v44  ;;  %6071 = vmatmul.bf16.vlgmr.msra.gmra.mxu3 %v11024_v18  ;;  %v8085_v44 = vor.u32 %v10074_v33, %v8084_v24  ;;  %v9533_v57 = vor.u32 %v10437_v43, %v9532_v40  ;;  %v9422_v24 = vld [vmem:[#allocation14 + $0xbf4] sm:$0xf0]  ;;  %v8308_v33 = vld [vmem:[#allocation14 + $0x320] sm:$0xf]  ;;  %v8753_v40 = vor.u32 %v10238_v60, %v8750_v27  ;;  %v7944_v43 = vld [vmem:[#allocation14 + $0x48] sm:$0xf] }
 0x314   :  { %6119 = vmatpush.bf16.msrb.mxu3 %v9229_v31  ;;  %v8056_v31 = vld [vmem:[#allocation14 + $0x128] sm:$0xf]  ;;  %v8224_v2 = vld [vmem:[#allocation14 + $0x278] sm:$0xf] }
 0x315   :  { %6106 = vmatpush.bf16.msrb.mxu2 %v8977_v36  ;;  %v9201_v36 = vor.u32 %v10350_v54, %v9198_v37  ;;  %6029 = vmatmul.bf16.vlgmr.msra.gmra.mxu0 %v11063_v10  ;;  %v9504_v54 = vld [vmem:[#allocation14 + $0xc80] sm:$0xf]  ;;  %v10430_v37 = vld [vmem:[#allocation14 + $0xc98] sm:$0xf0]  ;;  %v9310_v27 = vld [vmem:[#allocation14 + $0xb14] sm:$0xf0] }
 0x316   :  { %6077 = vmatpush.bf16.msrb.mxu0 %v8557_v47  ;;  %v9086_v47 = vld [vmem:[#allocation14 + $0x954] sm:$0xf0]  ;;  %v9505_v0 = vor.u32 %v10430_v37, %v9504_v54 }
 0x317   :  { %6036 = vmatpush.bf16.msra.mxu1 %v9645_v62  ;;  %v9089_v41 = vor.u32 %v10322_v50, %v9086_v47  ;;  %v8057_v62 = vor.u32 %v10067_v52, %v8056_v31  ;;  %v10231_v50 = vld [vmem:[#allocation14 + $0x664] sm:$0xf]  ;;  %v8722_v47 = vld [vmem:[#allocation14 + $0x67c] sm:$0xf0]  ;;  %v11087_v52 = vpop.f32.mrf.mxu3 }
 0x318   :  { %6120 = vmatpush.bf16.msrb.mxu3 %v9201_v36  ;;  %v8028_v36 = vld [vmem:[#allocation14 + $0xf0] sm:$0xf]  ;;  %v10399_v31 = vld [vmem:[#allocation14 + $0xba4] sm:$0xf]  ;;  %v8725_v37 = vor.u32 %v10231_v50, %v8722_v47  ;;  %v8610_v50 = vld [vmem:[#allocation14 + $0x59c] sm:$0xf0] }
 0x319   :  { %6107 = vmatpush.bf16.msrb.mxu2 %v8949_v13  ;;  %v9173_v13 = vor.u32 %v10343_v4, %v9170_v14  ;;  %v8029_v38 = vor.u32 %v10060_v46, %v8028_v36  ;;  %v8694_v36 = vld [vmem:[#allocation14 + $0x644] sm:$0xf0]  ;;  %v10392_v46 = vld [vmem:[#allocation14 + $0xb6c] sm:$0xf]  ;;  %v10371_v47 = vld [vmem:[#allocation14 + $0xac4] sm:$0xf] }
 0x31a   :  { %6078 = vmatpush.bf16.msrb.mxu0 %v8529_v6  ;;  %v9058_v6 = vld [vmem:[#allocation14 + $0x91c] sm:$0xf0] }
 0x31b   :  { %6037 = vmatpush.bf16.msra.mxu1 %v9617_v8  ;;  %v9061_v14 = vor.u32 %v10315_v55, %v9058_v6  ;;  %v8358_v8 = vld [vmem:[#allocation14 + $0x3a4] sm:$0xf0]  ;;  %v10224_v6 = vld [vmem:[#allocation14 + $0x62c] sm:$0xf] }
 0x31c   :  { %6121 = vmatpush.bf16.msrb.mxu3 %v9173_v13  ;;  %v8000_v13 = vld [vmem:[#allocation14 + $0xb8] sm:$0xf] }
 0x31d   :  { %6108 = vmatpush.bf16.msrb.mxu2 %v8921_v25  ;;  %v10444_v25 = vld [vmem:[#allocation14 + $0xd08] sm:$0xf0] }
 0x31e   :  { %6079 = vmatpush.bf16.msrb.mxu0 %v8501_v34  ;;  %v9561_v5 = vor.u32 %v10444_v25, %v9560_v42  ;;  %v9030_v34 = vld [vmem:[#allocation14 + $0x8e4] sm:$0xf0]  ;;  %v7972_v42 = vld [vmem:[#allocation14 + $0x80] sm:$0xf]  ;;  %v10046_v25 = vld [vmem:[#allocation14 + $0x98] sm:$0xf0] }
 0x31f   :  { %6038 = vmatpush.bf16.msra.mxu1 %v9589_v53  ;;  %v9033_v53 = vor.u32 %v10308_v9, %v9030_v34  ;;  %v8697_v9 = vor.u32 %v10224_v6, %v8694_v36  ;;  %v8582_v6 = vld [vmem:[#allocation14 + $0x564] sm:$0xf0] }
 0x320   :  { %6122 = vmatpush.bf16.msrb.mxu3 %v9145_v17  ;;  %v8781_v17 = vor.u32 %v10245_v15, %v8778_v16  ;;  %v10385_v15 = vld [vmem:[#allocation14 + $0xb34] sm:$0xf] }
 0x321   :  { %6109 = vmatpush.bf16.msrb.mxu2 %v8893_v35  ;;  %v10154_v35 = vld [vmem:[#allocation14 + $0x3fc] sm:$0xf] }
 0x322   :  { %6080 = vmatpush.bf16.msrb.mxu0 %v8473_v21  ;;  %v8417_v58 = vor.u32 %v10154_v35, %v8414_v45  ;;  %v8001_v21 = vor.u32 %v10053_v30, %v8000_v13  ;;  %v10039_v35 = vld [vmem:[#allocation14 + $0x60] sm:$0xf0]  ;;  %v10217_v13 = vld [vmem:[#allocation14 + $0x5f4] sm:$0xf]  ;;  %v8666_v30 = vld [vmem:[#allocation14 + $0x60c] sm:$0xf0] }
 0x323   :  { %6039 = vmatpush.bf16.msra.mxu1 %v9561_v5  ;;  %v10130_v5 = vld [vmem:[#allocation14 + $0x338] sm:$0xf0]  ;;  %v7945_v54 = vor.u32 %v10039_v35, %v7944_v43  ;;  %v11101_v43 = vpop.f32.mrf.mxu1 }
 0x324   :  { %6123 = vmatpush.bf16.msrb.mxu3 %v9117_v39  ;;  %v7973_v39 = vor.u32 %v10046_v25, %v7972_v42  ;;  %v8309_v45 = vor.u32 %v10130_v5, %v8308_v33  ;;  %v10210_v25 = vld [vmem:[#allocation14 + $0x5bc] sm:$0xf]  ;;  %v8952_v33 = vld [vmem:[#allocation14 + $0x828] sm:$0xf]  ;;  %v10291_v5 = vld [vmem:[#allocation14 + $0x840] sm:$0xf0] }
 0x325   :  { %6110 = vmatpush.bf16.msrb.mxu2 %v8865_v59  ;;  %v10147_v59 = vld [vmem:[#allocation14 + $0x3c4] sm:$0xf] }
 0x326   :  { %6081 = vmatpush.bf16.msrb.mxu0 %v8445_v23  ;;  %v8389_v4 = vor.u32 %v10147_v59, %v8386_v22  ;;  %v11085_v23 = vpop.f32.mrf.mxu2  ;;  %v7916_v59 = vld [vmem:[#allocation14 + $0x10] sm:$0xf] }
 0x327   :  { %6040 = vmatpush.bf16.msra.mxu1 %v9533_v57  ;;  %v9394_v57 = vld [vmem:[#allocation14 + $0xbbc] sm:$0xf0] }
 0x328   :  { %6124 = vmatpush.bf16.msrb.mxu3 %v9089_v41  ;;  %v10123_v41 = vld [vmem:[#allocation14 + $0x300] sm:$0xf0]  ;;  %v9397_v22 = vor.u32 %v10399_v31, %v9394_v57  ;;  %v8953_v57 = vor.u32 %v10291_v5, %v8952_v33  ;;  %v10186_v33 = vld [vmem:[#allocation14 + $0x4f8] sm:$0xf0]  ;;  %v9204_v5 = vld [vmem:[#allocation14 + $0xa20] sm:$0xf] }
 0x329   :  { %6111 = vmatpush.bf16.msrb.mxu2 %v8837_v7  ;;  %v10140_v7 = vld [vmem:[#allocation14 + $0x38c] sm:$0xf] }
 0x32a   :  { %6082 = vmatpush.bf16.msrb.mxu0 %v8417_v58  ;;  %v8280_v58 = vld [vmem:[#allocation14 + $0x2e8] sm:$0xf] }
 0x32b   :  { %6041 = vmatpush.bf16.msra.mxu1 %v9505_v0  ;;  %v8281_v55 = vor.u32 %v10123_v41, %v8280_v58  ;;  %v11092_v0 = vpop.f32.mrf.mxu0  ;;  %v9282_v58 = vld [vmem:[#allocation14 + $0xadc] sm:$0xf0]  ;;  %v8168_v41 = vld [vmem:[#allocation14 + $0x208] sm:$0xf] }
 0x32c   :  { %6125 = vmatpush.bf16.msrb.mxu3 %v9061_v14  ;;  %v9008_v14 = vld [vmem:[#allocation14 + $0x898] sm:$0xf]  ;;  %v9285_v36 = vor.u32 %v10371_v47, %v9282_v58  ;;  %v10263_v47 = vld [vmem:[#allocation14 + $0x760] sm:$0xf0] }
 0x32d   :  { %6112 = vmatpush.bf16.msrb.mxu2 %v8809_v29  ;;  %v8361_v29 = vor.u32 %v10140_v7, %v8358_v8  ;;  %v10305_v7 = vld [vmem:[#allocation14 + $0x8b0] sm:$0xf0] }
 0x32e   :  { %6083 = vmatpush.bf16.msrb.mxu0 %v8389_v4  ;;  %v10116_v4 = vld [vmem:[#allocation14 + $0x2c8] sm:$0xf0]  ;;  %v11094_v16 = vpop.f32.mrf.mxu2  ;;  %v9009_v56 = vor.u32 %v10305_v7, %v9008_v14 }
 0x32f   :  { %6042 = vmatpush.bf16.msra.mxu1 %v9477_v12  ;;  %v8253_v34 = vor.u32 %v10116_v4, %v8252_v3  ;;  %v9338_v12 = vld [vmem:[#allocation14 + $0xb4c] sm:$0xf0]  ;;  %v9254_v3 = vld [vmem:[#allocation14 + $0xaa4] sm:$0xf0]  ;;  %v10088_v7 = vld [vmem:[#allocation14 + $0x1e8] sm:$0xf0] }
 0x330   :  { %6113 = vmatmul.bf16.vlgmr.msrb.gmra.mxu2 %v11050_v61  ;;  %6126 = vmatpush.bf16.msrb.mxu3 %v9033_v53  ;;  %v11096_v53 = vpop.f32.mrf.mxu3  ;;  %v8140_v4 = vld [vmem:[#allocation14 + $0x1d0] sm:$0xf] }
 0x331   :  { %6161 = vmatpush.bf16.msra.mxu2 %v8113_v49  ;;  %v8337_v49 = vor.u32 %v10137_v11, %v8336_v20  ;;  %v10109_v20 = vld [vmem:[#allocation14 + $0x290] sm:$0xf0]  ;;  %v8980_v11 = vld [vmem:[#allocation14 + $0x860] sm:$0xf] }
 0x332   :  { %6084 = vmatpush.bf16.msrb.mxu0 %v8361_v29  ;;  %6043 = vmatmul.bf16.vlgmr.msra.gmra.mxu1 %v11070_v19  ;;  %v10298_v29 = vld [vmem:[#allocation14 + $0x878] sm:$0xf0]  ;;  %v8225_v42 = vor.u32 %v10109_v20, %v8224_v2  ;;  %v10361_v2 = vld [vmem:[#allocation14 + $0xa70] sm:$0xf0] }
 0x333   :  { %6091 = vmatpush.bf16.msrb.mxu1 %v8781_v17  ;;  %6127 = vmatmul.bf16.vlgmr.msrb.gmra.mxu3 %v11055_v63  ;;  %v9341_v17 = vor.u32 %v10385_v15, %v9338_v12  ;;  %v8981_v60 = vor.u32 %v10298_v29, %v8980_v11  ;;  %v9232_v12 = vld [vmem:[#allocation14 + $0xa58] sm:$0xf]  ;;  %v8141_v11 = vor.u32 %v10088_v7, %v8140_v4 }
 0x334   :  { %6175 = vmatpush.bf16.msra.mxu3 %v8337_v49  ;;  %v10378_v49 = vld [vmem:[#allocation14 + $0xafc] sm:$0xf] }
 0x335   :  { %6162 = vmatpush.bf16.msra.mxu2 %v8085_v44  ;;  %v9425_v44 = vor.u32 %v10406_v28, %v9422_v24  ;;  %6085 = vmatmul.bf16.vlgmr.msrb.gmra.mxu0 %v11046_v48  ;;  %v8196_v28 = vld [vmem:[#allocation14 + $0x240] sm:$0xf]  ;;  %v10102_v24 = vld [vmem:[#allocation14 + $0x258] sm:$0xf0]  ;;  %v9313_v35 = vor.u32 %v10378_v49, %v9310_v27  ;;  %v9233_v49 = vor.u32 %v10361_v2, %v9232_v12  ;;  %v9646_v27 = vld [vmem:[#allocation14 + $0xdb4] sm:$0xf0] }
 0x336   :  { %6133 = vmatpush.bf16.msra.mxu0 %v9453_v26  ;;  %v8638_v26 = vld [vmem:[#allocation14 + $0x5d4] sm:$0xf0]  ;;  %v11103_v31 = vpop.f32.mrf.mxu2  ;;  %v11122_v2 = vld [vmem:[#allocation16] sm:$0xff] }
 0x337   :  { %6092 = vmatpush.bf16.msrb.mxu1 %v8753_v40  ;;  %v8641_v40 = vor.u32 %v10210_v25, %v8638_v26  ;;  %v11109_v25 = vpop.f32.mrf.mxu1  ;;  %v8114_v12 = vld [vmem:[#allocation14 + $0x1b4] sm:$0xf0] }
 0x338   :  { %6176 = vmatpush.bf16.msra.mxu3 %v8309_v45  ;;  %v10203_v45 = vld [vmem:[#allocation14 + $0x584] sm:$0xf] }
 0x339   :  { %6163 = vmatpush.bf16.msra.mxu2 %v8057_v62  ;;  %v10032_v62 = vld [vmem:[#allocation14 + $0x28] sm:$0xf0] }
 0x33a   :  { %6134 = vmatpush.bf16.msra.mxu0 %v9425_v44  ;;  %v7917_v8 = vor.u32 %v10032_v62, %v7916_v59  ;;  %v8197_v44 = vor.u32 %v10102_v24, %v8196_v28  ;;  %v10284_v59 = vld [vmem:[#allocation14 + $0x808] sm:$0xf0]  ;;  %v11105_v62 = vpop.f32.mrf.mxu3  ;;  %v8532_v28 = vld [vmem:[#allocation14 + $0x4e0] sm:$0xf] }
 0x33b   :  { %6093 = vmatpush.bf16.msrb.mxu1 %v8725_v37  ;;  %v8924_v37 = vld [vmem:[#allocation14 + $0x7f0] sm:$0xf] }
 0x33c   :  { %6177 = vmatpush.bf16.msra.mxu3 %v8281_v55  ;;  %v10196_v55 = vld [vmem:[#allocation14 + $0x54c] sm:$0xf]  ;;  %v8925_v14 = vor.u32 %v10284_v59, %v8924_v37  ;;  %v8504_v37 = vld [vmem:[#allocation14 + $0x4a8] sm:$0xf]  ;;  %v10179_v59 = vld [vmem:[#allocation14 + $0x4c0] sm:$0xf0] }
 0x33d   :  { %6164 = vmatpush.bf16.msra.mxu2 %v8029_v38  ;;  %v9369_v38 = vor.u32 %v10392_v46, %v9366_v1  ;;  %v10364_v1 = vld [vmem:[#allocation14 + $0xa8c] sm:$0xf]  ;;  %v8585_v15 = vor.u32 %v10196_v55, %v8582_v6  ;;  %v10347_v55 = vld [vmem:[#allocation14 + $0xa00] sm:$0xf0]  ;;  %v8505_v4 = vor.u32 %v10179_v59, %v8504_v37  ;;  %v8420_v37 = vld [vmem:[#allocation14 + $0x400] sm:$0xf] }
 0x33e   :  { %6135 = vmatpush.bf16.msra.mxu0 %v9397_v22  ;;  %v8613_v22 = vor.u32 %v10203_v45, %v8610_v50  ;;  %v9257_v20 = vor.u32 %v10364_v1, %v9254_v3  ;;  %v11111_v24 = vpop.f32.mrf.mxu2  ;;  %v8840_v50 = vld [vmem:[#allocation14 + $0x748] sm:$0xf]  ;;  %v8812_v1 = vld [vmem:[#allocation14 + $0x710] sm:$0xf]  ;;  %v10256_v3 = vld [vmem:[#allocation14 + $0x728] sm:$0xf0] }
 0x33f   :  { %6094 = vmatpush.bf16.msrb.mxu1 %v8697_v9  ;;  %v10277_v9 = vld [vmem:[#allocation14 + $0x7d0] sm:$0xf0] }
 0x340   :  { %6178 = vmatpush.bf16.msra.mxu3 %v8253_v34  ;;  %v9674_v34 = vld [vmem:[#allocation14 + $0xdec] sm:$0xf0] }
 0x341   :  { %6165 = vmatpush.bf16.msra.mxu2 %v8001_v21  ;;  %v8669_v21 = vor.u32 %v10217_v13, %v8666_v30  ;;  %v8560_v13 = vld [vmem:[#allocation14 + $0x518] sm:$0xf] }
 0x342   :  { %6136 = vmatpush.bf16.msra.mxu0 %v9369_v38  ;;  %v10469_v38 = vld [vmem:[#allocation14 + $0xdd4] sm:$0xf] }
 0x343   :  { %6095 = vmatpush.bf16.msrb.mxu1 %v8669_v21  ;;  %v9677_v21 = vor.u32 %v10469_v38, %v9674_v34  ;;  %v8476_v38 = vld [vmem:[#allocation14 + $0x470] sm:$0xf]  ;;  %v10172_v34 = vld [vmem:[#allocation14 + $0x488] sm:$0xf0] }
 0x344   :  { %6179 = vmatpush.bf16.msra.mxu3 %v8225_v42  ;;  %v10270_v42 = vld [vmem:[#allocation14 + $0x798] sm:$0xf0] }
 0x345   :  { %6166 = vmatpush.bf16.msra.mxu2 %v7973_v39  ;;  %v11099_v39 = vpop.f32.mrf.mxu0 }
 0x346   :  { %6137 = vmatpush.bf16.msra.mxu0 %v9341_v17  ;;  %v8868_v17 = vld [vmem:[#allocation14 + $0x780] sm:$0xf] }
 0x347   :  { %6096 = vmatpush.bf16.msrb.mxu1 %v8641_v40  ;;  %v10354_v40 = vld [vmem:[#allocation14 + $0xa38] sm:$0xf0] }
 0x348   :  { %6180 = vmatpush.bf16.msra.mxu3 %v8197_v44  ;;  %v8869_v44 = vor.u32 %v10270_v42, %v8868_v17  ;;  %v9205_v58 = vor.u32 %v10354_v40, %v9204_v5  ;;  %v10441_v42 = vld [vmem:[#allocation14 + $0xcf4] sm:$0xf]  ;;  %v10071_v40 = vld [vmem:[#allocation14 + $0x164] sm:$0xf] }
 0x349   :  { %6167 = vmatpush.bf16.msra.mxu2 %v7945_v54  ;;  %v10095_v54 = vld [vmem:[#allocation14 + $0x220] sm:$0xf0]  ;;  %v10333_v5 = vld [vmem:[#allocation14 + $0x990] sm:$0xf0] }
 0x34a   :  { %6138 = vmatpush.bf16.msra.mxu0 %v9313_v35  ;;  %v8169_v46 = vor.u32 %v10095_v54, %v8168_v41  ;;  %v11113_v35 = vpop.f32.mrf.mxu3  ;;  %v10455_v41 = vld [vmem:[#allocation14 + $0xd64] sm:$0xf]  ;;  %v9618_v54 = vld [vmem:[#allocation14 + $0xd7c] sm:$0xf0] }
 0x34b   :  { %6097 = vmatpush.bf16.msrb.mxu1 %v8613_v22  ;;  %v9176_v22 = vld [vmem:[#allocation14 + $0x9e8] sm:$0xf] }
 0x34c   :  { %6181 = vmatpush.bf16.msra.mxu3 %v8169_v46  ;;  %v9621_v46 = vor.u32 %v10455_v41, %v9618_v54  ;;  %v10434_v41 = vld [vmem:[#allocation14 + $0xcbc] sm:$0xf]  ;;  %v9534_v54 = vld [vmem:[#allocation14 + $0xcd4] sm:$0xf0] }
 0x34d   :  { %6168 = vmatpush.bf16.msra.mxu2 %v7917_v8  ;;  %v8896_v8 = vld [vmem:[#allocation14 + $0x7b8] sm:$0xf]  ;;  %v11107_v30 = vpop.f32.mrf.mxu0 }
 0x34e   :  { %6139 = vmatpush.bf16.msra.mxu0 %v9285_v36  ;;  %v8897_v29 = vor.u32 %v10277_v9, %v8896_v8  ;;  %v8841_v36 = vor.u32 %v10263_v47, %v8840_v50  ;;  %v11120_v7 = vpop.f32.mrf.mxu1  ;;  %v10448_v8 = vld [vmem:[#allocation14 + $0xd2c] sm:$0xf]  ;;  %v9590_v9 = vld [vmem:[#allocation14 + $0xd44] sm:$0xf0] }
 0x34f   :  { %6098 = vmatpush.bf16.msrb.mxu1 %v8585_v15  ;;  %v10340_v15 = vld [vmem:[#allocation14 + $0x9c8] sm:$0xf0] }
 0x350   :  { %6169 = vmatmul.bf16.vlgmr.msra.gmra.mxu2 %v11031_v51  ;;  %6182 = vmatpush.bf16.msra.mxu3 %v8141_v11  ;;  %v8813_v11 = vor.u32 %v10256_v3, %v8812_v1  ;;  %v3396_v1 = vperm.slane %v11122_v2, 1  ;;  %v10064_v3 = vld [vmem:[#allocation14 + $0x12c] sm:$0xf] }
 0x351   :  { %6217 = vmatpush.bf16.msrb.mxu2 %v9009_v56  ;;  %v10193_v56 = vld [vmem:[#allocation14 + $0x530] sm:$0xf0] }
 0x352   :  { %v8561_v26 = vor.u32 %v10193_v56, %v8560_v13  ;;  %6140 = vmatpush.bf16.msra.mxu0 %v9257_v20  ;;  %6099 = vmatmul.bf16.vlgmr.msrb.gmra.mxu1 %v11043_v32  ;;  %v9148_v13 = vld [vmem:[#allocation14 + $0x9b0] sm:$0xf]  ;;  %v10078_v56 = vld [vmem:[#allocation14 + $0x19c] sm:$0xf]  ;;  %v5834_v20 = vpop.f32.mrf.mxu2 }
 0x353   :  { %6147 = vmatpush.bf16.msra.mxu1 %v9677_v21  ;;  %6183 = vmatmul.bf16.vlgmr.msra.gmra.mxu3 %v11024_v18  ;;  %v8477_v21 = vor.u32 %v10172_v34, %v8476_v38  ;;  %v9149_v17 = vor.u32 %v10340_v15, %v9148_v13  ;;  %v10427_v38 = vld [vmem:[#allocation14 + $0xc84] sm:$0xf]  ;;  %v9506_v34 = vld [vmem:[#allocation14 + $0xc9c] sm:$0xf0]  ;;  %v8392_v13 = vld [vmem:[#allocation14 + $0x3c8] sm:$0xf] }
 0x354   :  { %6231 = vmatpush.bf16.msrb.mxu3 %v9233_v49  ;;  %v8448_v49 = vld [vmem:[#allocation14 + $0x438] sm:$0xf] }
 0x355   :  { %6218 = vmatpush.bf16.msrb.mxu2 %v8981_v60  ;;  %v10462_v60 = vld [vmem:[#allocation14 + $0xd9c] sm:$0xf]  ;;  %6141 = vmatmul.bf16.vlgmr.msra.gmra.mxu0 %v11063_v10  ;;  %v11118_v6 = vpop.f32.mrf.mxu0 }
 0x356   :  { %v9649_v45 = vor.u32 %v10462_v60, %v9646_v27  ;;  %6189 = vmatpush.bf16.msrb.mxu0 %v8561_v26  ;;  %v9562_v26 = vld [vmem:[#allocation14 + $0xd0c] sm:$0xf0]  ;;  %v5848_v60 = vpop.f32.mrf.mxu3  ;;  %v8117_v27 = vor.u32 %v10078_v56, %v8114_v12 }
 0x357   :  { %v9565_v50 = vor.u32 %v10441_v42, %v9562_v26  ;;  %v10057_v42 = vld [vmem:[#allocation14 + $0xf4] sm:$0xf]  ;;  %v8030_v26 = vld [vmem:[#allocation14 + $0x10c] sm:$0xf0] }
 0x358   :  { %6148 = vmatpush.bf16.msra.mxu1 %v9649_v45  ;;  %6232 = vmatpush.bf16.msrb.mxu3 %v9205_v58  ;;  %v3395_v45 = vperm.slane %v11122_v2, 0  ;;  %v11125_v58 = vpop.f32.mrf.mxu1 }
 0x359   :  { %6219 = vmatpush.bf16.msrb.mxu2 %v8953_v57  ;;  %v8533_v57 = vor.u32 %v10186_v33, %v8532_v28  ;;  %v10165_v28 = vld [vmem:[#allocation14 + $0x450] sm:$0xf0]  ;;  %v9120_v33 = vld [vmem:[#allocation14 + $0x978] sm:$0xf] }
 0x35a   :  { %v8449_v47 = vor.u32 %v10165_v28, %v8448_v49  ;;  %v5723_v15 = vadd.f32 %v11085_v23, %v3395_v45  ;;  %v5836_v56 = vpop.f32.mrf.mxu2  ;;  %v10420_v28 = vld [vmem:[#allocation14 + $0xc4c] sm:$0xf] }
 0x35b   :  { %6190 = vmatpush.bf16.msrb.mxu0 %v8533_v57  ;;  %v9121_v57 = vor.u32 %v10333_v5, %v9120_v33  ;;  %v9478_v33 = vld [vmem:[#allocation14 + $0xc64] sm:$0xf0] }
 0x35c   :  { %6149 = vmatpush.bf16.msra.mxu1 %v9621_v46  ;;  %v10326_v46 = vld [vmem:[#allocation14 + $0x958] sm:$0xf0] }
 0x35d   :  { %6220 = vmatpush.bf16.msrb.mxu2 %v8925_v14  ;;  %v9177_v14 = vor.u32 %v10347_v55, %v9176_v22  ;;  %v5862_v59 = vpop.f32.mrf.mxu0  ;;  %v10158_v55 = vld [vmem:[#allocation14 + $0x418] sm:$0xf0] }
 0x35e   :  { %v5850_v49 = vpop.f32.mrf.mxu3 }
 0x35f   :  { %6191 = vmatpush.bf16.msrb.mxu0 %v8505_v4  ;;  %6233 = vmatpush.bf16.msrb.mxu3 %v9177_v14  ;;  %v8058_v4 = vld [vmem:[#allocation14 + $0x144] sm:$0xf0]  ;;  %v9537_v14 = vor.u32 %v10434_v41, %v9534_v54  ;;  %v5737_v41 = vadd.f32 %v11087_v52, %v5723_v15  ;;  %v10312_v54 = vld [vmem:[#allocation14 + $0x8e8] sm:$0xf0]  ;;  %v10134_v52 = vld [vmem:[#allocation14 + $0x35c] sm:$0xf] }
 0x360   :  { %v8061_v12 = vor.u32 %v10064_v3, %v8058_v4  ;;  %v9456_v3 = vld [vmem:[#allocation14 + $0xc18] sm:$0xf] }
 0x361   :  { %6221 = vmatpush.bf16.msrb.mxu2 %v8897_v29  ;;  %v9593_v29 = vor.u32 %v10448_v8, %v9590_v9  ;;  %v8421_v8 = vor.u32 %v10158_v55, %v8420_v37  ;;  %v10050_v37 = vld [vmem:[#allocation14 + $0xbc] sm:$0xf]  ;;  %v5751_v4 = vadd.f32 %v11092_v0, %v5737_v41  ;;  %v5837_v0 = vadd.f32 %v5836_v56, %v3396_v1 }
 0x362   :  { %v5890_v15 = vpop.f32.mrf.mxu2 }
 0x363   :  { %6150 = vmatpush.bf16.msra.mxu1 %v9593_v29  ;;  %6192 = vmatpush.bf16.msrb.mxu0 %v8477_v21  ;;  %v9064_v29 = vld [vmem:[#allocation14 + $0x908] sm:$0xf]  ;;  %v10319_v21 = vld [vmem:[#allocation14 + $0x920] sm:$0xf0] }
 0x364   :  { %6234 = vmatpush.bf16.msrb.mxu3 %v9149_v17  ;;  %v5835_v17 = vadd.f32 %v5834_v20, %v3396_v1  ;;  %v8033_v20 = vor.u32 %v10057_v42, %v8030_v26  ;;  %v10242_v42 = vld [vmem:[#allocation14 + $0x6b8] sm:$0xf0]  ;;  %v9428_v26 = vld [vmem:[#allocation14 + $0xbe0] sm:$0xf] }
 0x365   :  { %6222 = vmatpush.bf16.msrb.mxu2 %v8869_v44  ;;  %v8086_v44 = vld [vmem:[#allocation14 + $0x17c] sm:$0xf0] }
 0x366   :  { %v8089_v22 = vor.u32 %v10071_v40, %v8086_v44  ;;  %v5849_v5 = vadd.f32 %v5848_v60, %v5835_v17  ;;  %v9065_v40 = vor.u32 %v10319_v21, %v9064_v29  ;;  %v5876_v44 = vpop.f32.mrf.mxu1  ;;  %v5725_v60 = vadd.f32 %v11094_v16, %v3395_v45  ;;  %v10043_v29 = vld [vmem:[#allocation14 + $0x84] sm:$0xf]  ;;  %v7974_v21 = vld [vmem:[#allocation14 + $0x9c] sm:$0xf0]  ;;  %v5904_v1 = vpop.f32.mrf.mxu3 }
 0x367   :  { %6151 = vmatpush.bf16.msra.mxu1 %v9565_v50  ;;  %6193 = vmatpush.bf16.msrb.mxu0 %v8449_v47  ;;  %v8364_v50 = vld [vmem:[#allocation14 + $0x390] sm:$0xf]  ;;  %v10144_v47 = vld [vmem:[#allocation14 + $0x3a8] sm:$0xf0]  ;;  %v8756_v17 = vld [vmem:[#allocation14 + $0x6a0] sm:$0xf]  ;;  %v7977_v56 = vor.u32 %v10043_v29, %v7974_v21 }
 0x368   :  { %6235 = vmatpush.bf16.msrb.mxu3 %v9121_v57  ;;  %v9036_v57 = vld [vmem:[#allocation14 + $0x8d0] sm:$0xf]  ;;  %v5863_v55 = vadd.f32 %v5862_v59, %v5849_v5  ;;  %v8310_v5 = vld [vmem:[#allocation14 + $0x33c] sm:$0xf0]  ;;  %v10113_v29 = vld [vmem:[#allocation14 + $0x2b4] sm:$0xf] }
 0x369   :  { %6223 = vmatpush.bf16.msrb.mxu2 %v8841_v36  ;;  %v9092_v36 = vld [vmem:[#allocation14 + $0x940] sm:$0xf]  ;;  %v9037_v59 = vor.u32 %v10312_v54, %v9036_v57  ;;  %v10036_v57 = vld [vmem:[#allocation14 + $0x4c] sm:$0xf]  ;;  %v8254_v21 = vld [vmem:[#allocation14 + $0x2cc] sm:$0xf0] }
 0x36a   :  { %v9093_v9 = vor.u32 %v10326_v46, %v9092_v36  ;;  %v8784_v36 = vld [vmem:[#allocation14 + $0x6d8] sm:$0xf]  ;;  %v10249_v46 = vld [vmem:[#allocation14 + $0x6f0] sm:$0xf0] }
 0x36b   :  { %6152 = vmatpush.bf16.msra.mxu1 %v9537_v14  ;;  %6194 = vmatpush.bf16.msrb.mxu0 %v8421_v8  ;;  %v5864_v14 = vpop.f32.mrf.mxu0  ;;  %v9481_v8 = vor.u32 %v10420_v28, %v9478_v33  ;;  %v10410_v28 = vld [vmem:[#allocation14 + $0xbf8] sm:$0xf0]  ;;  %v10127_v33 = vld [vmem:[#allocation14 + $0x324] sm:$0xf] }
 0x36c   :  { %6236 = vmatpush.bf16.msrb.mxu3 %v9093_v9  ;;  %v10417_v9 = vld [vmem:[#allocation14 + $0xc30] sm:$0xf0]  ;;  %v8313_v54 = vor.u32 %v10127_v33, %v8310_v5  ;;  %v8257_v5 = vor.u32 %v10113_v29, %v8254_v21  ;;  %v8926_v21 = vld [vmem:[#allocation14 + $0x80c] sm:$0xf0] }
 0x36d   :  { %6224 = vmatpush.bf16.msrb.mxu2 %v8813_v11  ;;  %v10151_v11 = vld [vmem:[#allocation14 + $0x3e0] sm:$0xf0]  ;;  %v9457_v16 = vor.u32 %v10417_v9, %v9456_v3  ;;  %v10029_v9 = vld [vmem:[#allocation14 + $0x14] sm:$0xf] }
 0x36e   :  { %v8393_v23 = vor.u32 %v10151_v11, %v8392_v13  ;;  %v8365_v13 = vor.u32 %v10144_v47, %v8364_v50  ;;  %v8785_v11 = vor.u32 %v10249_v46, %v8784_v36  ;;  %v5878_v50 = vpop.f32.mrf.mxu1  ;;  %v8757_v47 = vor.u32 %v10242_v42, %v8756_v17  ;;  %v10120_v36 = vld [vmem:[#allocation14 + $0x2ec] sm:$0xf]  ;;  %v8282_v46 = vld [vmem:[#allocation14 + $0x304] sm:$0xf0]  ;;  %v9010_v17 = vld [vmem:[#allocation14 + $0x8b4] sm:$0xf0] }
 0x36f   :  { %v10281_v29 = vld [vmem:[#allocation14 + $0x7f4] sm:$0xf] }
 0x370   :  { %6225 = vmatmul.bf16.vlgmr.msrb.gmra.mxu2 %v11050_v61  ;;  %6195 = vmatpush.bf16.msrb.mxu0 %v8393_v23  ;;  %v5739_v23 = vadd.f32 %v11096_v53, %v5725_v60  ;;  %v8728_v53 = vld [vmem:[#allocation14 + $0x668] sm:$0xf] }
 0x371   :  { %6273 = vmatpush.bf16.msra.mxu2 %v8117_v27  ;;  %v9509_v27 = vor.u32 %v10427_v38, %v9506_v34  ;;  %v8338_v38 = vld [vmem:[#allocation14 + $0x374] sm:$0xf0]  ;;  %6237 = vmatpush.bf16.msrb.mxu3 %v9065_v40  ;;  %v5877_v34 = vadd.f32 %v5876_v44, %v5863_v55  ;;  %v5851_v40 = vadd.f32 %v5850_v49, %v5837_v0  ;;  %v10235_v49 = vld [vmem:[#allocation14 + $0x680] sm:$0xf0] }
 0x372   :  { %v8341_v45 = vor.u32 %v10134_v52, %v8338_v38  ;;  %v8285_v38 = vor.u32 %v10120_v36, %v8282_v46  ;;  %v10382_v36 = vld [vmem:[#allocation14 + $0xb18] sm:$0xf0]  ;;  %v10099_v46 = vld [vmem:[#allocation14 + $0x244] sm:$0xf] }
 0x373   :  { %6153 = vmatpush.bf16.msra.mxu1 %v9509_v27  ;;  %v5765_v27 = vadd.f32 %v11101_v43, %v5751_v4  ;;  %v5891_v44 = vadd.f32 %v5890_v15, %v5877_v34  ;;  %v7946_v43 = vld [vmem:[#allocation14 + $0x64] sm:$0xf0]  ;;  %v5865_v41 = vadd.f32 %v5864_v14, %v5851_v40  ;;  %v5918_v14 = vpop.f32.mrf.mxu0  ;;  %v8700_v34 = vld [vmem:[#allocation14 + $0x630] sm:$0xf]  ;;  %v9344_v40 = vld [vmem:[#allocation14 + $0xb38] sm:$0xf] }
 0x374   :  { %6196 = vmatpush.bf16.msrb.mxu0 %v8365_v13  ;;  %v10228_v13 = vld [vmem:[#allocation14 + $0x648] sm:$0xf0] }
 0x375   :  { %6274 = vmatpush.bf16.msra.mxu2 %v8089_v22  ;;  %v8002_v22 = vld [vmem:[#allocation14 + $0xd4] sm:$0xf0]  ;;  %6238 = vmatpush.bf16.msrb.mxu3 %v9037_v59  ;;  %v5779_v2 = vadd.f32 %v11103_v31, %v5765_v27  ;;  %v10403_v31 = vld [vmem:[#allocation14 + $0xbc0] sm:$0xf0]  ;;  %v5879_v3 = vadd.f32 %v5878_v50, %v5865_v41  ;;  %v5905_v60 = vadd.f32 %v5904_v1, %v5891_v44  ;;  %v9372_v59 = vld [vmem:[#allocation14 + $0xb70] sm:$0xf]  ;;  %v5906_v50 = vpop.f32.mrf.mxu3 }
 0x376   :  { %v5932_v27 = vpop.f32.mrf.mxu1  ;;  %v10389_v1 = vld [vmem:[#allocation14 + $0xb50] sm:$0xf0] }
 0x377   :  { %6154 = vmatpush.bf16.msra.mxu1 %v9481_v8  ;;  %v5793_v55 = vadd.f32 %v11105_v62, %v5779_v2  ;;  %6197 = vmatmul.bf16.vlgmr.msrb.gmra.mxu0 %v11046_v48  ;;  %v7949_v8 = vor.u32 %v10036_v57, %v7946_v43  ;;  %v7918_v62 = vld [vmem:[#allocation14 + $0x2c] sm:$0xf0]  ;;  %v8982_v57 = vld [vmem:[#allocation14 + $0x87c] sm:$0xf0] }
 0x378   :  { %6245 = vmatpush.bf16.msra.mxu0 %v9457_v16  ;;  %6239 = vmatmul.bf16.vlgmr.msrb.gmra.mxu3 %v11055_v63  ;;  %v5919_v16 = vadd.f32 %v5918_v14, %v5905_v60  ;;  %v10288_v60 = vld [vmem:[#allocation14 + $0x82c] sm:$0xf] }
 0x379   :  { %6275 = vmatpush.bf16.msra.mxu2 %v8061_v12  ;;  %v8005_v12 = vor.u32 %v10050_v37, %v8002_v22  ;;  %6287 = vmatpush.bf16.msra.mxu3 %v8341_v45  ;;  %v9400_v37 = vld [vmem:[#allocation14 + $0xba8] sm:$0xf]  ;;  %v5753_v22 = vadd.f32 %v11099_v39, %v5739_v23  ;;  %v5807_v4 = vadd.f32 %v11107_v30, %v5793_v55  ;;  %v10396_v30 = vld [vmem:[#allocation14 + $0xb88] sm:$0xf0]  ;;  %v10302_v45 = vld [vmem:[#allocation14 + $0x89c] sm:$0xf] }
 0x37a   :  { %6155 = vmatmul.bf16.vlgmr.msra.gmra.mxu1 %v11070_v19  ;;  %v8729_v39 = vor.u32 %v10235_v49, %v8728_v53  ;;  %v9401_v52 = vor.u32 %v10403_v31, %v9400_v37  ;;  %v9373_v33 = vor.u32 %v10396_v30, %v9372_v59  ;;  %v10221_v23 = vld [vmem:[#allocation14 + $0x610] sm:$0xf0]  ;;  %v9013_v2 = vor.u32 %v10302_v45, %v9010_v17  ;;  %v10214_v49 = vld [vmem:[#allocation14 + $0x5d8] sm:$0xf0]  ;;  %v9316_v37 = vld [vmem:[#allocation14 + $0xb00] sm:$0xf] }
 0x37b   :  { %6203 = vmatpush.bf16.msrb.mxu1 %v8785_v11  ;;  %v5767_v15 = vadd.f32 %v11109_v25, %v5753_v22  ;;  %v5821_v11 = vadd.f32 %v11120_v7, %v5807_v4  ;;  %v5933_v25 = vadd.f32 %v5932_v27, %v5919_v16  ;;  %v8672_v7 = vld [vmem:[#allocation14 + $0x5f8] sm:$0xf]  ;;  %v5920_v55 = vpop.f32.mrf.mxu0  ;;  %v8954_v4 = vld [vmem:[#allocation14 + $0x844] sm:$0xf0]  ;;  %v8588_v16 = vld [vmem:[#allocation14 + $0x550] sm:$0xf] }
 0x37c   :  { %v8170_v30 = vld [vmem:[#allocation14 + $0x224] sm:$0xf0]  ;;  %v10200_v45 = vld [vmem:[#allocation14 + $0x568] sm:$0xf0] }
 0x37d   :  { %6276 = vmatpush.bf16.msra.mxu2 %v8033_v20  ;;  %v9429_v20 = vor.u32 %v10410_v28, %v9428_v26  ;;  %6288 = vmatpush.bf16.msra.mxu3 %v8313_v54  ;;  %v5781_v42 = vadd.f32 %v11111_v24, %v5767_v15  ;;  %v7921_v26 = vor.u32 %v10029_v9, %v7918_v62  ;;  %10495 = vtanh.f32 %v5821_v11  ;;  %v10106_v24 = vld [vmem:[#allocation14 + $0x27c] sm:$0xf]  ;;  %v10092_v11 = vld [vmem:[#allocation14 + $0x20c] sm:$0xf] }
 0x37e   :  { %v8701_v28 = vor.u32 %v10228_v13, %v8700_v34  ;;  %10497 = vtanh.f32 %v5933_v25  ;;  %v9345_v54 = vor.u32 %v10389_v1, %v9344_v40  ;;  %v10207_v34 = vld [vmem:[#allocation14 + $0x5a0] sm:$0xf0]  ;;  %v9288_v13 = vld [vmem:[#allocation14 + $0xac8] sm:$0xf]  ;;  %v8957_v15 = vor.u32 %v10288_v60, %v8954_v4  ;;  %v10368_v27 = vld [vmem:[#allocation14 + $0xaa8] sm:$0xf0] }
 0x37f   :  { %6204 = vmatpush.bf16.msrb.mxu1 %v8757_v47  ;;  %6246 = vmatpush.bf16.msra.mxu0 %v9429_v20  ;;  %v5795_v44 = vadd.f32 %v11113_v35, %v5781_v42  ;;  %v10295_v47 = vld [vmem:[#allocation14 + $0x864] sm:$0xf]  ;;  %v8673_v20 = vor.u32 %v10221_v23, %v8672_v7  ;;  %v8644_v35 = vld [vmem:[#allocation14 + $0x5c0] sm:$0xf]  ;;  %v8173_v42 = vor.u32 %v10092_v11, %v8170_v30  ;;  %v8898_v7 = vld [vmem:[#allocation14 + $0x7d4] sm:$0xf0] }
 0x380   :  { %v8985_v31 = vor.u32 %v10295_v47, %v8982_v57  ;;  %v8929_v25 = vor.u32 %v10281_v29, %v8926_v21  ;;  %v9680_v23 = vld [vmem:[#allocation14 + $0xdd8] sm:$0xf]  ;;  %v10473_v40 = vld [vmem:[#allocation14 + $0xdf0] sm:$0xf0]  ;;  %v10260_v4 = vld [vmem:[#allocation14 + $0x74c] sm:$0xf] }
 0x381   :  { %6277 = vmatpush.bf16.msra.mxu2 %v8005_v12  ;;  %v5892_v12 = vpop.f32.mrf.mxu2  ;;  %6289 = vmatpush.bf16.msra.mxu3 %v8285_v38  ;;  %v5809_v41 = vadd.f32 %v11118_v6, %v5795_v44  ;;  %v8616_v38 = vld [vmem:[#allocation14 + $0x588] sm:$0xf]  ;;  %v10190_v44 = vld [vmem:[#allocation14 + $0x51c] sm:$0xf]  ;;  %v8562_v1 = vld [vmem:[#allocation14 + $0x534] sm:$0xf0] }
 0x382   :  { %v5893_v0 = vadd.f32 %v5892_v12, %v5879_v3  ;;  %v8198_v3 = vld [vmem:[#allocation14 + $0x25c] sm:$0xf0]  ;;  %v10375_v12 = vld [vmem:[#allocation14 + $0xae0] sm:$0xf0]  ;;  %v9596_v29 = vld [vmem:[#allocation14 + $0xd30] sm:$0xf] }
 0x383   :  { %6205 = vmatpush.bf16.msrb.mxu1 %v8729_v39  ;;  %6247 = vmatpush.bf16.msra.mxu0 %v9401_v52  ;;  %v5823_v22 = vadd.f32 %v11125_v58, %v5809_v41  ;;  %v10496_v14 = vpop.eup %10495  ;;  %v8645_v39 = vor.u32 %v10214_v49, %v8644_v35  ;;  %v9317_v58 = vor.u32 %v10382_v36, %v9316_v37  ;;  %v8870_v35 = vld [vmem:[#allocation14 + $0x79c] sm:$0xf0]  ;;  %v10452_v21 = vld [vmem:[#allocation14 + $0xd48] sm:$0xf0] }
 0x384   :  { %v5907_v43 = vadd.f32 %v5906_v50, %v5893_v0  ;;  %v10498_v9 = vpop.eup %10497  ;;  %v8201_v52 = vor.u32 %v10099_v46, %v8198_v3  ;;  %v8617_v0 = vor.u32 %v10207_v34, %v8616_v38  ;;  %v9289_v17 = vor.u32 %v10375_v12, %v9288_v13  ;;  %v9652_v49 = vld [vmem:[#allocation14 + $0xda0] sm:$0xf]  ;;  %v10351_v46 = vld [vmem:[#allocation14 + $0xa24] sm:$0xf]  ;;  %v10344_v38 = vld [vmem:[#allocation14 + $0x9ec] sm:$0xf] }
 0x385   :  { %6278 = vmatpush.bf16.msra.mxu2 %v7977_v56  ;;  %v8226_v56 = vld [vmem:[#allocation14 + $0x294] sm:$0xf0]  ;;  %6290 = vmatpush.bf16.msra.mxu3 %v8257_v5  ;;  %10499 = vtanh.f32 %v5823_v22  ;;  %v6511_v59 = vpack.c.bf16 %v10498_v9, %v10496_v14  ;;  %v10274_v5 = vld [vmem:[#allocation14 + $0x7bc] sm:$0xf]  ;;  %v8565_v37 = vor.u32 %v10190_v44, %v8562_v1  ;;  %v8534_v36 = vld [vmem:[#allocation14 + $0x4fc] sm:$0xf0] }
 0x386   :  { %v8229_v53 = vor.u32 %v10106_v24, %v8226_v56  ;;  %v5921_v6 = vadd.f32 %v5920_v55, %v5907_v43  ;;  %v10358_v24 = vld [vmem:[#allocation14 + $0xa5c] sm:$0xf]  ;;  %v9234_v56 = vld [vmem:[#allocation14 + $0xa74] sm:$0xf0]  ;;  %v9206_v3 = vld [vmem:[#allocation14 + $0xa3c] sm:$0xf0] }
 0x387   :  { %6206 = vmatpush.bf16.msrb.mxu1 %v8701_v28  ;;  %6248 = vmatpush.bf16.msra.mxu0 %v9373_v33  ;;  %6519 = vst [vmem:[#allocation17] sm:$0xff] %v6511_v59  ;;  %v10085_v28 = vld [vmem:[#allocation14 + $0x1d4] sm:$0xf]  ;;  %v8142_v33 = vld [vmem:[#allocation14 + $0x1ec] sm:$0xf0]  ;;  %v9237_v22 = vor.u32 %v10358_v24, %v9234_v56 }
 0x388   :  { %v8145_v43 = vor.u32 %v10085_v28, %v8142_v33  ;;  %v10466_v55 = vld [vmem:[#allocation14 + $0xdb8] sm:$0xf0]  ;;  %v8842_v14 = vld [vmem:[#allocation14 + $0x764] sm:$0xf0]  ;;  %v8814_v12 = vld [vmem:[#allocation14 + $0x72c] sm:$0xf0]  ;;  %v9597_v28 = vor.u32 %v10452_v21, %v9596_v29 }
 0x389   :  { %6279 = vmatpush.bf16.msra.mxu2 %v7949_v8  ;;  %v5934_v8 = vpop.f32.mrf.mxu1  ;;  %6291 = vmatpush.bf16.msra.mxu3 %v8229_v53  ;;  %v10267_v53 = vld [vmem:[#allocation14 + $0x784] sm:$0xf]  ;;  %v9653_v60 = vor.u32 %v10466_v55, %v9652_v49  ;;  %v9624_v9 = vld [vmem:[#allocation14 + $0xd68] sm:$0xf]  ;;  %v8845_v13 = vor.u32 %v10260_v4, %v8842_v14  ;;  %v8450_v44 = vld [vmem:[#allocation14 + $0x454] sm:$0xf0] }
 0x38a   :  { %v5935_v62 = vadd.f32 %v5934_v8, %v5921_v6  ;;  %v8873_v6 = vor.u32 %v10267_v53, %v8870_v35  ;;  %v9178_v34 = vld [vmem:[#allocation14 + $0xa04] sm:$0xf0]  ;;  %v10075_v24 = vld [vmem:[#allocation14 + $0x180] sm:$0xf0]  ;;  %v8422_v53 = vld [vmem:[#allocation14 + $0x41c] sm:$0xf0] }
 0x38b   :  { %6207 = vmatpush.bf16.msrb.mxu1 %v8673_v20  ;;  %6249 = vmatpush.bf16.msra.mxu0 %v9345_v54  ;;  %v10500_v50 = vpop.eup %10499  ;;  %v8901_v20 = vor.u32 %v10274_v5, %v8898_v7  ;;  %v9681_v54 = vor.u32 %v10473_v40, %v9680_v23  ;;  %v9181_v30 = vor.u32 %v10344_v38, %v9178_v34  ;;  %v9568_v5 = vld [vmem:[#allocation14 + $0xcf8] sm:$0xf]  ;;  %v10445_v7 = vld [vmem:[#allocation14 + $0xd10] sm:$0xf0]  ;;  %v10162_v23 = vld [vmem:[#allocation14 + $0x43c] sm:$0xf] }
 0x38c   :  { %10501 = vtanh.f32 %v5935_v62  ;;  %v10459_v62 = vld [vmem:[#allocation14 + $0xd80] sm:$0xf0]  ;;  %v8092_v1 = vld [vmem:[#allocation14 + $0x168] sm:$0xf]  ;;  %v9569_v56 = vor.u32 %v10445_v7, %v9568_v5  ;;  %v9094_v49 = vld [vmem:[#allocation14 + $0x95c] sm:$0xf0] }
 0x38d   :  { %6280 = vmatpush.bf16.msra.mxu2 %v7921_v26  ;;  %6292 = vmatpush.bf16.msra.mxu3 %v8201_v52  ;;  %v9260_v26 = vld [vmem:[#allocation14 + $0xa90] sm:$0xf]  ;;  %v8506_v52 = vld [vmem:[#allocation14 + $0x4c4] sm:$0xf0]  ;;  %v9625_v59 = vor.u32 %v10459_v62, %v9624_v9  ;;  %v10323_v35 = vld [vmem:[#allocation14 + $0x944] sm:$0xf] }
 0x38e   :  { %v9261_v57 = vor.u32 %v10368_v27, %v9260_v26  ;;  %v10082_v26 = vld [vmem:[#allocation14 + $0x1b8] sm:$0xf0]  ;;  %v8394_v4 = vld [vmem:[#allocation14 + $0x3e4] sm:$0xf0]  ;;  %v10316_v14 = vld [vmem:[#allocation14 + $0x90c] sm:$0xf] }
 0x38f   :  { %6208 = vmatpush.bf16.msrb.mxu1 %v8645_v39  ;;  %6250 = vmatpush.bf16.msra.mxu0 %v9317_v58  ;;  %v9209_v39 = vor.u32 %v10351_v46, %v9206_v3  ;;  %v10176_v58 = vld [vmem:[#allocation14 + $0x4ac] sm:$0xf]  ;;  %v9512_v46 = vld [vmem:[#allocation14 + $0xc88] sm:$0xf]  ;;  %v10431_v3 = vld [vmem:[#allocation14 + $0xca0] sm:$0xf0] }
 0x390   :  { %6281 = vmatmul.bf16.vlgmr.msra.gmra.mxu2 %v11031_v51  ;;  %v8509_v11 = vor.u32 %v10176_v58, %v8506_v52  ;;  %v10061_v9 = vld [vmem:[#allocation14 + $0x110] sm:$0xf0]  ;;  %v9513_v62 = vor.u32 %v10431_v3, %v9512_v46  ;;  %v9484_v58 = vld [vmem:[#allocation14 + $0xc50] sm:$0xf]  ;;  %v10424_v52 = vld [vmem:[#allocation14 + $0xc68] sm:$0xf0] }
 0x391   :  { %6329 = vmatpush.bf16.msrb.mxu2 %v9013_v2  ;;  %v8589_v2 = vor.u32 %v10200_v45, %v8588_v16  ;;  %6293 = vmatpush.bf16.msra.mxu3 %v8173_v42  ;;  %v8478_v16 = vld [vmem:[#allocation14 + $0x48c] sm:$0xf0]  ;;  %v10337_v45 = vld [vmem:[#allocation14 + $0x9b4] sm:$0xf]  ;;  %v8120_v42 = vld [vmem:[#allocation14 + $0x1a0] sm:$0xf] }
 0x392   :  { %v10502_v47 = vpop.eup %10501  ;;  %v8121_v40 = vor.u32 %v10082_v26, %v8120_v42  ;;  %v10054_v29 = vld [vmem:[#allocation14 + $0xd8] sm:$0xf0]  ;;  %v8344_v42 = vld [vmem:[#allocation14 + $0x360] sm:$0xf]  ;;  %v7980_v5 = vld [vmem:[#allocation14 + $0x88] sm:$0xf] }
 0x393   :  { %6209 = vmatpush.bf16.msrb.mxu1 %v8617_v0  ;;  %6251 = vmatpush.bf16.msra.mxu0 %v9289_v17  ;;  %v6515_v41 = vpack.c.bf16 %v10502_v47, %v10500_v50  ;;  %v10169_v0 = vld [vmem:[#allocation14 + $0x474] sm:$0xf]  ;;  %v9150_v17 = vld [vmem:[#allocation14 + $0x9cc] sm:$0xf0]  ;;  %v10330_v50 = vld [vmem:[#allocation14 + $0x97c] sm:$0xf]  ;;  %v8453_v47 = vor.u32 %v10162_v23, %v8450_v44 }
 0x394   :  { %v9153_v33 = vor.u32 %v10337_v45, %v9150_v17  ;;  %v10246_v21 = vld [vmem:[#allocation14 + $0x6dc] sm:$0xf]  ;;  %v9485_v45 = vor.u32 %v10424_v52, %v9484_v58  ;;  %v9458_v17 = vld [vmem:[#allocation14 + $0xc34] sm:$0xf0]  ;;  %v10047_v7 = vld [vmem:[#allocation14 + $0xa0] sm:$0xf0] }
 0x395   :  { %6330 = vmatpush.bf16.msrb.mxu2 %v8985_v31  ;;  %v10183_v31 = vld [vmem:[#allocation14 + $0x4e4] sm:$0xf]  ;;  %6523 = vst [vmem:[#allocation17 + $0x1c] sm:$0xff] %v6515_v41  ;;  %6294 = vmatpush.bf16.msra.mxu3 %v8145_v43  ;;  %v9540_v43 = vld [vmem:[#allocation14 + $0xcc0] sm:$0xf] }
 0x396   :  { %v8537_v8 = vor.u32 %v10183_v31, %v8534_v36  ;;  %v10438_v41 = vld [vmem:[#allocation14 + $0xcd8] sm:$0xf0]  ;;  %v9097_v36 = vor.u32 %v10323_v35, %v9094_v49  ;;  %v10239_v44 = vld [vmem:[#allocation14 + $0x6a4] sm:$0xf]  ;;  %v10232_v35 = vld [vmem:[#allocation14 + $0x66c] sm:$0xf] }
 0x397   :  { %6210 = vmatpush.bf16.msrb.mxu1 %v8589_v2  ;;  %6252 = vmatpush.bf16.msra.mxu0 %v9261_v57  ;;  %v9122_v2 = vld [vmem:[#allocation14 + $0x994] sm:$0xf0]  ;;  %v9541_v55 = vor.u32 %v10438_v41, %v9540_v43  ;;  %v10138_v26 = vld [vmem:[#allocation14 + $0x378] sm:$0xf0]  ;;  %v7952_v43 = vld [vmem:[#allocation14 + $0x50] sm:$0xf] }
 0x398   :  { %6295 = vmatmul.bf16.vlgmr.msra.gmra.mxu3 %v11024_v18  ;;  %v9125_v57 = vor.u32 %v10330_v50, %v9122_v2  ;;  %v8758_v50 = vld [vmem:[#allocation14 + $0x6bc] sm:$0xf0]  ;;  %v10407_v2 = vld [vmem:[#allocation14 + $0xbe4] sm:$0xf]  ;;  %v10040_v41 = vld [vmem:[#allocation14 + $0x68] sm:$0xf0] }
 0x399   :  { %6331 = vmatpush.bf16.msrb.mxu2 %v8957_v15  ;;  %6343 = vmatpush.bf16.msrb.mxu3 %v9237_v22  ;;  %v10253_v15 = vld [vmem:[#allocation14 + $0x714] sm:$0xf]  ;;  %v10068_v22 = vld [vmem:[#allocation14 + $0x148] sm:$0xf0]  ;;  %v8730_v49 = vld [vmem:[#allocation14 + $0x684] sm:$0xf0] }
 0x39a   :  { %6211 = vmatmul.bf16.vlgmr.msrb.gmra.mxu1 %v11043_v32  ;;  %6253 = vmatmul.bf16.vlgmr.msra.gmra.mxu0 %v11063_v10  ;;  %v8817_v27 = vor.u32 %v10253_v15, %v8814_v12  ;;  %v10309_v15 = vld [vmem:[#allocation14 + $0x8d4] sm:$0xf]  ;;  %v8733_v46 = vor.u32 %v10232_v35, %v8730_v49  ;;  %v7924_v3 = vld [vmem:[#allocation14 + $0x18] sm:$0xf]  ;;  %v10372_v35 = vld [vmem:[#allocation14 + $0xacc] sm:$0xf] }
 0x39b   :  { %6259 = vmatpush.bf16.msra.mxu1 %v9681_v54  ;;  %6301 = vmatpush.bf16.msrb.mxu0 %v8565_v37  ;;  %v8093_v54 = vor.u32 %v10075_v24, %v8092_v1  ;;  %v8064_v37 = vld [vmem:[#allocation14 + $0x130] sm:$0xf]  ;;  %v9430_v1 = vld [vmem:[#allocation14 + $0xbfc] sm:$0xf0]  ;;  %v8316_v24 = vld [vmem:[#allocation14 + $0x328] sm:$0xf] }
 0x39c   :  { %v8260_v58 = vld [vmem:[#allocation14 + $0x2b8] sm:$0xf]  ;;  %v10117_v52 = vld [vmem:[#allocation14 + $0x2d0] sm:$0xf0] }
 0x39d   :  { %6332 = vmatpush.bf16.msrb.mxu2 %v8929_v25  ;;  %6344 = vmatpush.bf16.msrb.mxu3 %v9209_v39  ;;  %v8481_v25 = vor.u32 %v10169_v0, %v8478_v16  ;;  %v8036_v39 = vld [vmem:[#allocation14 + $0xf8] sm:$0xf]  ;;  %v10414_v16 = vld [vmem:[#allocation14 + $0xc1c] sm:$0xf] }
 0x39e   :  { %v8037_v12 = vor.u32 %v10061_v9, %v8036_v39  ;;  %v8786_v0 = vld [vmem:[#allocation14 + $0x6f4] sm:$0xf0]  ;;  %v9461_v23 = vor.u32 %v10414_v16, %v9458_v17  ;;  %v8702_v39 = vld [vmem:[#allocation14 + $0x64c] sm:$0xf0]  ;;  %v10393_v9 = vld [vmem:[#allocation14 + $0xb74] sm:$0xf] }
 0x39f   :  { %6260 = vmatpush.bf16.msra.mxu1 %v9653_v60  ;;  %6302 = vmatpush.bf16.msrb.mxu0 %v8537_v8  ;;  %v8065_v60 = vor.u32 %v10068_v22, %v8064_v37  ;;  %v9066_v8 = vld [vmem:[#allocation14 + $0x924] sm:$0xf0]  ;;  %v10400_v37 = vld [vmem:[#allocation14 + $0xbac] sm:$0xf]  ;;  %v9346_v16 = vld [vmem:[#allocation14 + $0xb54] sm:$0xf0] }
 0x3a0   :  { %v9069_v34 = vor.u32 %v10316_v14, %v9066_v8  ;;  %v9402_v22 = vld [vmem:[#allocation14 + $0xbc4] sm:$0xf0]  ;;  %v10225_v8 = vld [vmem:[#allocation14 + $0x634] sm:$0xf]  ;;  %v10110_v17 = vld [vmem:[#allocation14 + $0x298] sm:$0xf0] }
 0x3a1   :  { %6333 = vmatpush.bf16.msrb.mxu2 %v8901_v20  ;;  %6345 = vmatpush.bf16.msrb.mxu3 %v9181_v30  ;;  %v10155_v20 = vld [vmem:[#allocation14 + $0x404] sm:$0xf]  ;;  %v8008_v30 = vld [vmem:[#allocation14 + $0xc0] sm:$0xf] }
 0x3a2   :  { %v8425_v31 = vor.u32 %v10155_v20, %v8422_v53  ;;  %v11161_v20 = vpop.f32.mrf.mxu2 }
 0x3a3   :  { %6261 = vmatpush.bf16.msra.mxu1 %v9625_v59  ;;  %6303 = vmatpush.bf16.msrb.mxu0 %v8509_v11  ;;  %v8366_v59 = vld [vmem:[#allocation14 + $0x3ac] sm:$0xf0] }
 0x3a4   :  { %v9038_v11 = vld [vmem:[#allocation14 + $0x8ec] sm:$0xf0] }
 0x3a5   :  { %6334 = vmatpush.bf16.msrb.mxu2 %v8873_v6  ;;  %6346 = vmatpush.bf16.msrb.mxu3 %v9153_v33  ;;  %v10148_v6 = vld [vmem:[#allocation14 + $0x3cc] sm:$0xf]  ;;  %v8789_v33 = vor.u32 %v10246_v21, %v8786_v0  ;;  %v10386_v21 = vld [vmem:[#allocation14 + $0xb3c] sm:$0xf] }
 0x3a6   :  { %v8397_v38 = vor.u32 %v10148_v6, %v8394_v4  ;;  %v10033_v6 = vld [vmem:[#allocation14 + $0x30] sm:$0xf0]  ;;  %v9405_v4 = vor.u32 %v10400_v37, %v9402_v22  ;;  %v9290_v37 = vld [vmem:[#allocation14 + $0xae4] sm:$0xf0]  ;;  %v8176_v22 = vld [vmem:[#allocation14 + $0x210] sm:$0xf] }
 0x3a7   :  { %6262 = vmatpush.bf16.msra.mxu1 %v9597_v28  ;;  %6304 = vmatpush.bf16.msrb.mxu0 %v8481_v25  ;;  %v9041_v28 = vor.u32 %v10309_v15, %v9038_v11  ;;  %v8009_v25 = vor.u32 %v10054_v29, %v8008_v30  ;;  %v11168_v15 = vpop.f32.mrf.mxu0  ;;  %v8261_v11 = vor.u32 %v10117_v52, %v8260_v58  ;;  %v10218_v30 = vld [vmem:[#allocation14 + $0x5fc] sm:$0xf]  ;;  %v8674_v29 = vld [vmem:[#allocation14 + $0x614] sm:$0xf0]  ;;  %v10089_v52 = vld [vmem:[#allocation14 + $0x1f0] sm:$0xf0] }
 0x3a9   :  { %6335 = vmatpush.bf16.msrb.mxu2 %v8845_v13  ;;  %6347 = vmatpush.bf16.msrb.mxu3 %v9125_v57  ;;  %v10141_v13 = vld [vmem:[#allocation14 + $0x394] sm:$0xf]  ;;  %v8761_v57 = vor.u32 %v10239_v44, %v8758_v50  ;;  %v9318_v50 = vld [vmem:[#allocation14 + $0xb1c] sm:$0xf0] }
 0x3ab   :  { %6263 = vmatpush.bf16.msra.mxu1 %v9569_v56  ;;  %6305 = vmatpush.bf16.msrb.mxu0 %v8453_v47  ;;  %v10131_v56 = vld [vmem:[#allocation14 + $0x340] sm:$0xf0]  ;;  %v7981_v47 = vor.u32 %v10047_v7, %v7980_v5 }
 0x3ac   :  { %v8317_v53 = vor.u32 %v10131_v56, %v8316_v24  ;;  %v10211_v7 = vld [vmem:[#allocation14 + $0x5c4] sm:$0xf]  ;;  %v8960_v56 = vld [vmem:[#allocation14 + $0x830] sm:$0xf] }
 0x3ad   :  { %6336 = vmatpush.bf16.msrb.mxu2 %v8817_v27  ;;  %6348 = vmatpush.bf16.msrb.mxu3 %v9097_v36  ;;  %v8369_v27 = vor.u32 %v10141_v13, %v8366_v59  ;;  %v7953_v36 = vor.u32 %v10040_v41, %v7952_v43  ;;  %v7925_v13 = vor.u32 %v10033_v6, %v7924_v3  ;;  %v10197_v6 = vld [vmem:[#allocation14 + $0x554] sm:$0xf] }
 0x3ae   :  { %v8705_v59 = vor.u32 %v10225_v8, %v8702_v39  ;;  %v10365_v39 = vld [vmem:[#allocation14 + $0xa94] sm:$0xf] }
 0x3af   :  { %6264 = vmatpush.bf16.msra.mxu1 %v9541_v55  ;;  %6306 = vmatpush.bf16.msrb.mxu0 %v8425_v31  ;;  %v8288_v55 = vld [vmem:[#allocation14 + $0x2f0] sm:$0xf]  ;;  %v10124_v31 = vld [vmem:[#allocation14 + $0x308] sm:$0xf0] }
 0x3b0   :  { %6337 = vmatmul.bf16.vlgmr.msrb.gmra.mxu2 %v11050_v61  ;;  %v8289_v14 = vor.u32 %v10124_v31, %v8288_v55  ;;  %v10096_v55 = vld [vmem:[#allocation14 + $0x228] sm:$0xf0] }
 0x3b1   :  { %6385 = vmatpush.bf16.msra.mxu2 %v8121_v40  ;;  %6349 = vmatpush.bf16.msrb.mxu3 %v9069_v34  ;;  %v8345_v40 = vor.u32 %v10138_v26, %v8344_v42  ;;  %v10306_v34 = vld [vmem:[#allocation14 + $0x8b8] sm:$0xf0]  ;;  %v11170_v42 = vpop.f32.mrf.mxu2  ;;  %v8988_v26 = vld [vmem:[#allocation14 + $0x868] sm:$0xf]  ;;  %v8177_v8 = vor.u32 %v10096_v55, %v8176_v22  ;;  %v8512_v55 = vld [vmem:[#allocation14 + $0x4b0] sm:$0xf] }
 0x3b2   :  { %v9626_v22 = vld [vmem:[#allocation14 + $0xd84] sm:$0xf0] }
 0x3b3   :  { %6265 = vmatpush.bf16.msra.mxu1 %v9513_v62  ;;  %6307 = vmatpush.bf16.msrb.mxu0 %v8397_v38  ;;  %v9374_v62 = vld [vmem:[#allocation14 + $0xb8c] sm:$0xf0]  ;;  %v9016_v38 = vld [vmem:[#allocation14 + $0x8a0] sm:$0xf] }
 0x3b4   :  { %v9017_v0 = vor.u32 %v10306_v34, %v9016_v38  ;;  %v8904_v38 = vld [vmem:[#allocation14 + $0x7c0] sm:$0xf]  ;;  %v10278_v34 = vld [vmem:[#allocation14 + $0x7d8] sm:$0xf0] }
 0x3b5   :  { %6386 = vmatpush.bf16.msra.mxu2 %v8093_v54  ;;  %6350 = vmatpush.bf16.msrb.mxu3 %v9041_v28  ;;  %v9433_v54 = vor.u32 %v10407_v2, %v9430_v1  ;;  %v8677_v28 = vor.u32 %v10218_v30, %v8674_v29  ;;  %v8204_v2 = vld [vmem:[#allocation14 + $0x248] sm:$0xf]  ;;  %v10103_v1 = vld [vmem:[#allocation14 + $0x260] sm:$0xf0]  ;;  %v8568_v30 = vld [vmem:[#allocation14 + $0x520] sm:$0xf] }
 0x3b6   :  { %v8205_v41 = vor.u32 %v10103_v1, %v8204_v2  ;;  %v10187_v2 = vld [vmem:[#allocation14 + $0x500] sm:$0xf0]  ;;  %v9212_v1 = vld [vmem:[#allocation14 + $0xa28] sm:$0xf] }
 0x3b7   :  { %6266 = vmatpush.bf16.msra.mxu1 %v9485_v45  ;;  %6308 = vmatpush.bf16.msrb.mxu0 %v8369_v27  ;;  %v8232_v45 = vld [vmem:[#allocation14 + $0x280] sm:$0xf]  ;;  %v10299_v27 = vld [vmem:[#allocation14 + $0x880] sm:$0xf0] }
 0x3b8   :  { %6351 = vmatmul.bf16.vlgmr.msrb.gmra.mxu3 %v11055_v63  ;;  %v8233_v5 = vor.u32 %v10110_v17, %v8232_v45  ;;  %v8989_v44 = vor.u32 %v10299_v27, %v8988_v26  ;;  %v8905_v26 = vor.u32 %v10278_v34, %v8904_v38  ;;  %v8484_v38 = vld [vmem:[#allocation14 + $0x478] sm:$0xf]  ;;  %v10173_v34 = vld [vmem:[#allocation14 + $0x490] sm:$0xf0] }
 0x3b9   :  { %6387 = vmatpush.bf16.msra.mxu2 %v8065_v60  ;;  %6399 = vmatpush.bf16.msra.mxu3 %v8345_v40  ;;  %v11166_v60 = vpop.f32.mrf.mxu3  ;;  %v10379_v40 = vld [vmem:[#allocation14 + $0xb04] sm:$0xf]  ;;  %v11177_v31 = vpop.f32.mrf.mxu2 }
 0x3ba   :  { %6267 = vmatmul.bf16.vlgmr.msra.gmra.mxu1 %v11070_v19  ;;  %6309 = vmatmul.bf16.vlgmr.msrb.gmra.mxu0 %v11046_v48  ;;  %v9321_v43 = vor.u32 %v10379_v40, %v9318_v50  ;;  %v10463_v40 = vld [vmem:[#allocation14 + $0xda4] sm:$0xf]  ;;  %v8540_v50 = vld [vmem:[#allocation14 + $0x4e8] sm:$0xf] }
 0x3bb   :  { %6315 = vmatpush.bf16.msrb.mxu1 %v8789_v33  ;;  %6357 = vmatpush.bf16.msra.mxu0 %v9461_v23  ;;  %v9349_v33 = vor.u32 %v10386_v21, %v9346_v16  ;;  %v8646_v23 = vld [vmem:[#allocation14 + $0x5dc] sm:$0xf0]  ;;  %v10194_v21 = vld [vmem:[#allocation14 + $0x538] sm:$0xf0] }
 0x3bc   :  { %v10362_v16 = vld [vmem:[#allocation14 + $0xa78] sm:$0xf0] }
 0x3bd   :  { %6388 = vmatpush.bf16.msra.mxu2 %v8037_v12  ;;  %6400 = vmatpush.bf16.msra.mxu3 %v8317_v53  ;;  %v9377_v12 = vor.u32 %v10393_v9, %v9374_v62  ;;  %v8618_v53 = vld [vmem:[#allocation14 + $0x5a4] sm:$0xf0]  ;;  %v9262_v9 = vld [vmem:[#allocation14 + $0xaac] sm:$0xf0]  ;;  %v8148_v62 = vld [vmem:[#allocation14 + $0x1d8] sm:$0xf] }
 0x3be   :  { %v9265_v45 = vor.u32 %v10365_v39, %v9262_v9  ;;  %v8149_v17 = vor.u32 %v10089_v52, %v8148_v62  ;;  %v10257_v39 = vld [vmem:[#allocation14 + $0x730] sm:$0xf0]  ;;  %v9598_v52 = vld [vmem:[#allocation14 + $0xd4c] sm:$0xf0] }
 0x3bf   :  { %6316 = vmatpush.bf16.msrb.mxu1 %v8761_v57  ;;  %6358 = vmatpush.bf16.msra.mxu0 %v9433_v54  ;;  %v8649_v57 = vor.u32 %v10211_v7, %v8646_v23  ;;  %v10204_v54 = vld [vmem:[#allocation14 + $0x58c] sm:$0xf]  ;;  %v8569_v7 = vor.u32 %v10194_v21, %v8568_v30 }
 0x3c0   :  { %v8621_v3 = vor.u32 %v10204_v54, %v8618_v53  ;;  %v10264_v54 = vld [vmem:[#allocation14 + $0x768] sm:$0xf0] }
 0x3c1   :  { %6389 = vmatpush.bf16.msra.mxu2 %v8009_v25  ;;  %6401 = vmatpush.bf16.msra.mxu3 %v8289_v14  ;;  %v11172_v25 = vpop.f32.mrf.mxu1  ;;  %v11174_v24 = vpop.f32.mrf.mxu3  ;;  %v9293_v14 = vor.u32 %v10372_v35, %v9290_v37  ;;  %v8541_v35 = vor.u32 %v10187_v2, %v8540_v50  ;;  %v10456_v37 = vld [vmem:[#allocation14 + $0xd6c] sm:$0xf] }
 0x3c3   :  { %6317 = vmatpush.bf16.msrb.mxu1 %v8733_v46  ;;  %6359 = vmatpush.bf16.msra.mxu0 %v9405_v4  ;;  %v10285_v46 = vld [vmem:[#allocation14 + $0x810] sm:$0xf0]  ;;  %v8590_v4 = vld [vmem:[#allocation14 + $0x56c] sm:$0xf0] }
 0x3c4   :  { %v8593_v29 = vor.u32 %v10197_v6, %v8590_v4 }
 0x3c5   :  { %6390 = vmatpush.bf16.msra.mxu2 %v7981_v47  ;;  %6402 = vmatpush.bf16.msra.mxu3 %v8261_v11  ;;  %v10292_v47 = vld [vmem:[#allocation14 + $0x848] sm:$0xf0]  ;;  %v9682_v11 = vld [vmem:[#allocation14 + $0xdf4] sm:$0xf0] }
 0x3c6   :  { %v8961_v49 = vor.u32 %v10292_v47, %v8960_v56  ;;  %v10355_v56 = vld [vmem:[#allocation14 + $0xa40] sm:$0xf0]  ;;  %v11187_v47 = vpop.f32.mrf.mxu2 }
 0x3c7   :  { %6318 = vmatpush.bf16.msrb.mxu1 %v8705_v59  ;;  %6360 = vmatpush.bf16.msra.mxu0 %v9377_v12  ;;  %v10470_v12 = vld [vmem:[#allocation14 + $0xddc] sm:$0xf] }
 0x3c8   :  { %v9685_v27 = vor.u32 %v10470_v12, %v9682_v11  ;;  %v9156_v12 = vld [vmem:[#allocation14 + $0x9b8] sm:$0xf]  ;;  %v10341_v11 = vld [vmem:[#allocation14 + $0x9d0] sm:$0xf0] }
 0x3c9   :  { %6391 = vmatpush.bf16.msra.mxu2 %v7953_v36  ;;  %6403 = vmatpush.bf16.msra.mxu3 %v8233_v5  ;;  %v11179_v36 = vpop.f32.mrf.mxu0  ;;  %v11183_v59 = vpop.f32.mrf.mxu1 }
 0x3cb   :  { %6319 = vmatpush.bf16.msrb.mxu1 %v8677_v28  ;;  %6361 = vmatpush.bf16.msra.mxu0 %v9349_v33  ;;  %v8876_v28 = vld [vmem:[#allocation14 + $0x788] sm:$0xf]  ;;  %v10271_v33 = vld [vmem:[#allocation14 + $0x7a0] sm:$0xf0] }
 0x3cd   :  { %6392 = vmatpush.bf16.msra.mxu2 %v7925_v13  ;;  %6404 = vmatpush.bf16.msra.mxu3 %v8205_v41  ;;  %v11181_v13 = vpop.f32.mrf.mxu3  ;;  %v8848_v41 = vld [vmem:[#allocation14 + $0x750] sm:$0xf] }
 0x3ce   :  { %v8849_v4 = vor.u32 %v10264_v54, %v8848_v41  ;;  %v6058_v30 = vpop.f32.mrf.mxu2  ;;  %v8428_v41 = vld [vmem:[#allocation14 + $0x408] sm:$0xf]  ;;  %v10159_v54 = vld [vmem:[#allocation14 + $0x420] sm:$0xf0] }
 0x3cf   :  { %6320 = vmatpush.bf16.msrb.mxu1 %v8649_v57  ;;  %6362 = vmatpush.bf16.msra.mxu0 %v9321_v43  ;;  %v8877_v57 = vor.u32 %v10271_v33, %v8876_v28  ;;  %v9128_v28 = vld [vmem:[#allocation14 + $0x980] sm:$0xf]  ;;  %v10334_v33 = vld [vmem:[#allocation14 + $0x998] sm:$0xf0] }
 0x3d0   :  { %6393 = vmatmul.bf16.vlgmr.msra.gmra.mxu2 %v11031_v51  ;;  %v8932_v51 = vld [vmem:[#allocation14 + $0x7f8] sm:$0xf] }
 0x3d1   :  { %6441 = vmatpush.bf16.msrb.mxu2 %v9017_v0  ;;  %v8933_v58 = vor.u32 %v10285_v46, %v8932_v51  ;;  %v9240_v0 = vld [vmem:[#allocation14 + $0xa60] sm:$0xf]  ;;  %6405 = vmatpush.bf16.msra.mxu3 %v8177_v8  ;;  %v11185_v5 = vpop.f32.mrf.mxu0  ;;  %v11189_v53 = vpop.f32.mrf.mxu1  ;;  %v10180_v51 = vld [vmem:[#allocation14 + $0x4c8] sm:$0xf0]  ;;  %v9184_v46 = vld [vmem:[#allocation14 + $0x9f0] sm:$0xf] }
 0x3d2   :  { %v9241_v23 = vor.u32 %v10362_v16, %v9240_v0  ;;  %v8820_v8 = vld [vmem:[#allocation14 + $0x718] sm:$0xf]  ;;  %v8513_v9 = vor.u32 %v10180_v51, %v8512_v55  ;;  %v8485_v0 = vor.u32 %v10173_v34, %v8484_v38  ;;  %v9157_v16 = vor.u32 %v10341_v11, %v9156_v12  ;;  %v10421_v34 = vld [vmem:[#allocation14 + $0xc54] sm:$0xf] }
 0x3d3   :  { %6321 = vmatpush.bf16.msrb.mxu1 %v8621_v3  ;;  %6363 = vmatpush.bf16.msra.mxu0 %v9293_v14  ;;  %v10348_v3 = vld [vmem:[#allocation14 + $0xa08] sm:$0xf0]  ;;  %v9629_v14 = vor.u32 %v10456_v37, %v9626_v22 }
 0x3d4   :  { %v9185_v62 = vor.u32 %v10348_v3, %v9184_v46  ;;  %v8429_v3 = vor.u32 %v10159_v54, %v8428_v41 }
 0x3d5   :  { %6442 = vmatpush.bf16.msrb.mxu2 %v8989_v44  ;;  %v9654_v44 = vld [vmem:[#allocation14 + $0xdbc] sm:$0xf0]  ;;  %6406 = vmatpush.bf16.msra.mxu3 %v8149_v17  ;;  %v11193_v6 = vpop.f32.mrf.mxu3  ;;  %v9570_v17 = vld [vmem:[#allocation14 + $0xd14] sm:$0xf0] }
 0x3d6   :  { %v9657_v43 = vor.u32 %v10463_v40, %v9654_v44  ;;  %v6060_v46 = vpop.f32.mrf.mxu2 }
 0x3d7   :  { %6322 = vmatpush.bf16.msrb.mxu1 %v8593_v29  ;;  %6364 = vmatpush.bf16.msra.mxu0 %v9265_v45  ;;  %v10442_v45 = vld [vmem:[#allocation14 + $0xcfc] sm:$0xf] }
 0x3d8   :  { %6407 = vmatmul.bf16.vlgmr.msra.gmra.mxu3 %v11024_v18  ;;  %v8821_v18 = vor.u32 %v10257_v39, %v8820_v8  ;;  %v9573_v2 = vor.u32 %v10442_v45, %v9570_v17  ;;  %v9514_v8 = vld [vmem:[#allocation14 + $0xca4] sm:$0xf0]  ;;  %v8400_v39 = vld [vmem:[#allocation14 + $0x3d0] sm:$0xf] }
 0x3d9   :  { %6443 = vmatpush.bf16.msrb.mxu2 %v8961_v49  ;;  %6455 = vmatpush.bf16.msrb.mxu3 %v9241_v23  ;;  %v9213_v49 = vor.u32 %v10355_v56, %v9212_v1  ;;  %v11196_v29 = vpop.f32.mrf.mxu0  ;;  %v11201_v44 = vpop.f32.mrf.mxu1  ;;  %v9129_v56 = vor.u32 %v10334_v33, %v9128_v28  ;;  %v10250_v28 = vld [vmem:[#allocation14 + $0x6f8] sm:$0xf0]  ;;  %v9464_v33 = vld [vmem:[#allocation14 + $0xc20] sm:$0xf] }
 0x3da   :  { %6323 = vmatmul.bf16.vlgmr.msrb.gmra.mxu1 %v11043_v32  ;;  %6365 = vmatmul.bf16.vlgmr.msra.gmra.mxu0 %v11063_v10 }
 0x3db   :  { %6371 = vmatpush.bf16.msra.mxu1 %v9685_v27  ;;  %6413 = vmatpush.bf16.msrb.mxu0 %v8569_v7  ;;  %v10166_v27 = vld [vmem:[#allocation14 + $0x458] sm:$0xf0]  ;;  %v11198_v7 = vld [vmem:[#allocation16] sm:$0xff] }
 0x3dc   :  { %v3397_v23 = vperm.slane %v11198_v7, 2  ;;  %v3398_v50 = vperm.slane %v11198_v7, 3 }
 0x3dd   :  { %6444 = vmatpush.bf16.msrb.mxu2 %v8933_v58  ;;  %6456 = vmatpush.bf16.msrb.mxu3 %v9213_v49  ;;  %v10449_v58 = vld [vmem:[#allocation14 + $0xd34] sm:$0xf]  ;;  %v6072_v40 = vpop.f32.mrf.mxu3  ;;  %v10327_v49 = vld [vmem:[#allocation14 + $0x960] sm:$0xf0] }
 0x3de   :  { %v9601_v21 = vor.u32 %v10449_v58, %v9598_v52  ;;  %v5947_v37 = vadd.f32 %v11161_v20, %v3397_v23  ;;  %v9072_v20 = vld [vmem:[#allocation14 + $0x910] sm:$0xf]  ;;  %v10320_v58 = vld [vmem:[#allocation14 + $0x928] sm:$0xf0]  ;;  %v5949_v45 = vadd.f32 %v11170_v42, %v3397_v23  ;;  %v6061_v23 = vadd.f32 %v6060_v46, %v3398_v50 }
 0x3df   :  { %6372 = vmatpush.bf16.msra.mxu1 %v9657_v43  ;;  %6414 = vmatpush.bf16.msrb.mxu0 %v8541_v35  ;;  %v9542_v43 = vld [vmem:[#allocation14 + $0xcdc] sm:$0xf0]  ;;  %v9100_v35 = vld [vmem:[#allocation14 + $0x948] sm:$0xf] }
 0x3e0   :  { %v5961_v51 = vadd.f32 %v11166_v60, %v5947_v37 }
 0x3e1   :  { %6445 = vmatpush.bf16.msrb.mxu2 %v8905_v26  ;;  %6457 = vmatpush.bf16.msrb.mxu3 %v9185_v62  ;;  %v8456_v26 = vld [vmem:[#allocation14 + $0x440] sm:$0xf]  ;;  %v6086_v22 = vpop.f32.mrf.mxu0  ;;  %v10152_v62 = vld [vmem:[#allocation14 + $0x3e8] sm:$0xf0]  ;;  %v6100_v52 = vpop.f32.mrf.mxu1 }
 0x3e2   :  { %v8457_v1 = vor.u32 %v10166_v27, %v8456_v26  ;;  %v9044_v26 = vld [vmem:[#allocation14 + $0x8d8] sm:$0xf]  ;;  %v8792_v27 = vld [vmem:[#allocation14 + $0x6e0] sm:$0xf] }
 0x3e3   :  { %6373 = vmatpush.bf16.msra.mxu1 %v9629_v14  ;;  %6415 = vmatpush.bf16.msrb.mxu0 %v8513_v9  ;;  %v10428_v14 = vld [vmem:[#allocation14 + $0xc8c] sm:$0xf]  ;;  %v6059_v9 = vadd.f32 %v6058_v30, %v3398_v50  ;;  %v10145_v30 = vld [vmem:[#allocation14 + $0x3b0] sm:$0xf0]  ;;  %v8793_v54 = vor.u32 %v10250_v28, %v8792_v27  ;;  %v9352_v27 = vld [vmem:[#allocation14 + $0xb40] sm:$0xf] }
 0x3e4   :  { %v9517_v60 = vor.u32 %v10428_v14, %v9514_v8  ;;  %v10390_v28 = vld [vmem:[#allocation14 + $0xb58] sm:$0xf0] }
 0x3e5   :  { %6446 = vmatpush.bf16.msrb.mxu2 %v8877_v57  ;;  %6458 = vmatpush.bf16.msrb.mxu3 %v9157_v16  ;;  %v10435_v57 = vld [vmem:[#allocation14 + $0xcc4] sm:$0xf]  ;;  %v6073_v38 = vadd.f32 %v6072_v40, %v6059_v9  ;;  %v6074_v11 = vpop.f32.mrf.mxu3  ;;  %v8372_v16 = vld [vmem:[#allocation14 + $0x398] sm:$0xf]  ;;  %v10418_v40 = vld [vmem:[#allocation14 + $0xc38] sm:$0xf0] }
 0x3e6   :  { %v9545_v55 = vor.u32 %v10435_v57, %v9542_v43  ;;  %v6114_v57 = vpop.f32.mrf.mxu2  ;;  %v8373_v41 = vor.u32 %v10145_v30, %v8372_v16  ;;  %v10236_v9 = vld [vmem:[#allocation14 + $0x688] sm:$0xf0] }
 0x3e7   :  { %6374 = vmatpush.bf16.msra.mxu1 %v9601_v21  ;;  %6416 = vmatpush.bf16.msrb.mxu0 %v8485_v0  ;;  %v9073_v21 = vor.u32 %v10320_v58, %v9072_v20  ;;  %v9486_v0 = vld [vmem:[#allocation14 + $0xc6c] sm:$0xf0]  ;;  %v6087_v17 = vadd.f32 %v6086_v22, %v6073_v38  ;;  %v9436_v22 = vld [vmem:[#allocation14 + $0xbe8] sm:$0xf]  ;;  %v10404_v20 = vld [vmem:[#allocation14 + $0xbc8] sm:$0xf0] }
 0x3e9   :  { %6447 = vmatpush.bf16.msrb.mxu2 %v8849_v4  ;;  %6459 = vmatpush.bf16.msrb.mxu3 %v9129_v56  ;;  %v9101_v4 = vor.u32 %v10327_v49, %v9100_v35  ;;  %v6088_v43 = vpop.f32.mrf.mxu0  ;;  %v9465_v35 = vor.u32 %v10418_v40, %v9464_v33  ;;  %v8764_v49 = vld [vmem:[#allocation14 + $0x6a8] sm:$0xf]  ;;  %v6102_v8 = vpop.f32.mrf.mxu1 }
 0x3eb   :  { %6375 = vmatpush.bf16.msra.mxu1 %v9573_v2  ;;  %6417 = vmatpush.bf16.msrb.mxu0 %v8457_v1  ;;  %v5963_v2 = vadd.f32 %v11174_v24, %v5949_v45  ;;  %v9489_v1 = vor.u32 %v10421_v34, %v9486_v0  ;;  %v10243_v24 = vld [vmem:[#allocation14 + $0x6c0] sm:$0xf0]  ;;  %v8708_v34 = vld [vmem:[#allocation14 + $0x638] sm:$0xf]  ;;  %v10397_v0 = vld [vmem:[#allocation14 + $0xb90] sm:$0xf0] }
 0x3ec   :  { %v8765_v46 = vor.u32 %v10243_v24, %v8764_v49 }
 0x3ed   :  { %6448 = vmatpush.bf16.msrb.mxu2 %v8821_v18  ;;  %6460 = vmatpush.bf16.msrb.mxu3 %v9101_v4  ;;  %v8401_v18 = vor.u32 %v10152_v62, %v8400_v39  ;;  %v5977_v37 = vadd.f32 %v11179_v36, %v5963_v2  ;;  %v6128_v14 = vpop.f32.mrf.mxu3  ;;  %v8736_v36 = vld [vmem:[#allocation14 + $0x670] sm:$0xf]  ;;  %v8652_v2 = vld [vmem:[#allocation14 + $0x5c8] sm:$0xf] }
 0x3ee   :  { %v9408_v62 = vld [vmem:[#allocation14 + $0xbb0] sm:$0xf]  ;;  %v8737_v38 = vor.u32 %v10236_v9, %v8736_v36 }
 0x3ef   :  { %6376 = vmatpush.bf16.msra.mxu1 %v9545_v55  ;;  %6418 = vmatpush.bf16.msrb.mxu0 %v8429_v3  ;;  %v10411_v55 = vld [vmem:[#allocation14 + $0xc00] sm:$0xf0]  ;;  %v5991_v4 = vadd.f32 %v11183_v59, %v5977_v37  ;;  %v8624_v37 = vld [vmem:[#allocation14 + $0x590] sm:$0xf] }
 0x3f0   :  { %6449 = vmatmul.bf16.vlgmr.msrb.gmra.mxu2 %v11050_v61  ;;  %v5975_v61 = vadd.f32 %v11168_v15, %v5961_v51  ;;  %v10313_v15 = vld [vmem:[#allocation14 + $0x8f0] sm:$0xf0]  ;;  %v6075_v51 = vadd.f32 %v6074_v11, %v6061_v23  ;;  %v9437_v39 = vor.u32 %v10411_v55, %v9436_v22  ;;  %v10208_v22 = vld [vmem:[#allocation14 + $0x5a8] sm:$0xf0]  ;;  %v9296_v55 = vld [vmem:[#allocation14 + $0xad0] sm:$0xf] }
 0x3f1   :  { %6461 = vmatpush.bf16.msrb.mxu3 %v9073_v21  ;;  %v9045_v42 = vor.u32 %v10313_v15, %v9044_v26  ;;  %v6005_v59 = vadd.f32 %v11187_v47, %v5991_v4  ;;  %v9380_v21 = vld [vmem:[#allocation14 + $0xb78] sm:$0xf]  ;;  %v10222_v15 = vld [vmem:[#allocation14 + $0x618] sm:$0xf0]  ;;  %v10201_v4 = vld [vmem:[#allocation14 + $0x570] sm:$0xf0] }
 0x3f2   :  { %v5989_v12 = vadd.f32 %v11172_v25, %v5975_v61  ;;  %v6101_v25 = vadd.f32 %v6100_v52, %v6087_v17  ;;  %v6089_v50 = vadd.f32 %v6088_v43, %v6075_v51  ;;  %v6142_v52 = vpop.f32.mrf.mxu0  ;;  %v9381_v45 = vor.u32 %v10397_v0, %v9380_v21  ;;  %v8680_v17 = vld [vmem:[#allocation14 + $0x600] sm:$0xf]  ;;  %v10383_v43 = vld [vmem:[#allocation14 + $0xb20] sm:$0xf0]  ;;  %v10376_v51 = vld [vmem:[#allocation14 + $0xae8] sm:$0xf0] }
 0x3f3   :  { %6377 = vmatpush.bf16.msra.mxu1 %v9517_v60  ;;  %6419 = vmatpush.bf16.msrb.mxu0 %v8401_v18  ;;  %v9409_v60 = vor.u32 %v10404_v20, %v9408_v62  ;;  %v10229_v18 = vld [vmem:[#allocation14 + $0x650] sm:$0xf0]  ;;  %v8681_v40 = vor.u32 %v10222_v15, %v8680_v17  ;;  %v10446_v21 = vld [vmem:[#allocation14 + $0xd18] sm:$0xf0] }
 0x3f4   :  { %v6003_v56 = vadd.f32 %v11177_v31, %v5989_v12  ;;  %v6115_v3 = vadd.f32 %v6114_v57, %v6101_v25  ;;  %v6103_v61 = vadd.f32 %v6102_v8, %v6089_v50  ;;  %v6116_v12 = vpop.f32.mrf.mxu2  ;;  %v8709_v47 = vor.u32 %v10229_v18, %v8708_v34  ;;  %v9324_v57 = vld [vmem:[#allocation14 + $0xb08] sm:$0xf]  ;;  %v10369_v8 = vld [vmem:[#allocation14 + $0xab0] sm:$0xf0]  ;;  %v9688_v50 = vld [vmem:[#allocation14 + $0xde0] sm:$0xf] }
 0x3f5   :  { %6462 = vmatpush.bf16.msrb.mxu3 %v9045_v42  ;;  %v6130_v26 = vpop.f32.mrf.mxu3  ;;  %v9604_v34 = vld [vmem:[#allocation14 + $0xd38] sm:$0xf]  ;;  %v9576_v18 = vld [vmem:[#allocation14 + $0xd00] sm:$0xf] }
 0x3f6   :  { %v6017_v31 = vadd.f32 %v11181_v13, %v6003_v56  ;;  %v6129_v58 = vadd.f32 %v6128_v14, %v6115_v3  ;;  %v10215_v56 = vld [vmem:[#allocation14 + $0x5e0] sm:$0xf0]  ;;  %v9297_v3 = vor.u32 %v10376_v51, %v9296_v55  ;;  %v9268_v14 = vld [vmem:[#allocation14 + $0xa98] sm:$0xf]  ;;  %v9577_v0 = vor.u32 %v10446_v21, %v9576_v18 }
 0x3f7   :  { %6378 = vmatpush.bf16.msra.mxu1 %v9489_v1  ;;  %6420 = vmatpush.bf16.msrb.mxu0 %v8373_v41  ;;  %v6156_v30 = vpop.f32.mrf.mxu1  ;;  %v8653_v49 = vor.u32 %v10215_v56, %v8652_v2  ;;  %v9269_v62 = vor.u32 %v10369_v8, %v9268_v14 }
 0x3f8   :  { %6463 = vmatmul.bf16.vlgmr.msrb.gmra.mxu3 %v11055_v63  ;;  %v6031_v13 = vadd.f32 %v11185_v5, %v6017_v31  ;;  %v6143_v16 = vadd.f32 %v6142_v52, %v6129_v58  ;;  %v6019_v63 = vadd.f32 %v11193_v6, %v6005_v59  ;;  %v9353_v6 = vor.u32 %v10390_v28, %v9352_v27  ;;  %v8596_v31 = vld [vmem:[#allocation14 + $0x558] sm:$0xf]  ;;  %v9632_v52 = vld [vmem:[#allocation14 + $0xd70] sm:$0xf] }
 0x3f9   :  { %v8597_v9 = vor.u32 %v10201_v4, %v8596_v31 }
 0x3fa   :  { %6379 = vmatmul.bf16.vlgmr.msra.gmra.mxu1 %v11070_v19  ;;  %6421 = vmatmul.bf16.vlgmr.msrb.gmra.mxu0 %v11046_v48  ;;  %v6045_v11 = vadd.f32 %v11189_v53, %v6031_v13  ;;  %v6117_v48 = vadd.f32 %v6116_v12, %v6103_v61  ;;  %v6157_v5 = vadd.f32 %v6156_v30, %v6143_v16  ;;  %v6144_v1 = vpop.f32.mrf.mxu0  ;;  %v9660_v61 = vld [vmem:[#allocation14 + $0xda8] sm:$0xf]  ;;  %v10467_v13 = vld [vmem:[#allocation14 + $0xdc0] sm:$0xf0]  ;;  %v10453_v12 = vld [vmem:[#allocation14 + $0xd50] sm:$0xf0] }
 0x3fb   :  { %6427 = vmatpush.bf16.msrb.mxu1 %v8793_v54  ;;  %6469 = vmatpush.bf16.msra.mxu0 %v9465_v35  ;;  %v6033_v33 = vadd.f32 %v11196_v29, %v6019_v63  ;;  %v9325_v29 = vor.u32 %v10383_v43, %v9324_v57  ;;  %v9661_v59 = vor.u32 %v10467_v13, %v9660_v61  ;;  %v9548_v16 = vld [vmem:[#allocation14 + $0xcc8] sm:$0xf]  ;;  %v9520_v30 = vld [vmem:[#allocation14 + $0xc90] sm:$0xf] }
 0x3fc   :  { %10503 = vtanh.f32 %v6045_v11  ;;  %v6131_v53 = vadd.f32 %v6130_v26, %v6117_v48  ;;  %v9605_v11 = vor.u32 %v10453_v12, %v9604_v34  ;;  %v10439_v48 = vld [vmem:[#allocation14 + $0xce0] sm:$0xf0]  ;;  %v6170_v17 = vpop.f32.mrf.mxu2 }
 0x3fd   :  { %10505 = vtanh.f32 %v6157_v5  ;;  %v6047_v25 = vadd.f32 %v11201_v44, %v6033_v33  ;;  %v8625_v44 = vor.u32 %v10208_v22, %v8624_v37  ;;  %v9549_v63 = vor.u32 %v10439_v48, %v9548_v16  ;;  %v10432_v5 = vld [vmem:[#allocation14 + $0xca8] sm:$0xf0]  ;;  %v6184_v26 = vpop.f32.mrf.mxu3 }
 0x3fe   :  { %v6145_v41 = vadd.f32 %v6144_v1, %v6131_v53 }
 0x3ff   :  { %6428 = vmatpush.bf16.msrb.mxu1 %v8765_v46  ;;  %6470 = vmatpush.bf16.msra.mxu0 %v9437_v39  ;;  %v6158_v23 = vpop.f32.mrf.mxu1  ;;  %10507 = vtanh.f32 %v6047_v25  ;;  %v10474_v46 = vld [vmem:[#allocation14 + $0xdf8] sm:$0xf0] }
 0x400   :  { %v6159_v35 = vadd.f32 %v6158_v23, %v6145_v41  ;;  %v9689_v58 = vor.u32 %v10474_v46, %v9688_v50 }
 0x402   :  { %v10504_v42 = vpop.eup %10503  ;;  %10509 = vtanh.f32 %v6159_v35  ;;  %v6198_v15 = vpop.f32.mrf.mxu0 }
 0x403   :  { %6429 = vmatpush.bf16.msrb.mxu1 %v8737_v38  ;;  %6471 = vmatpush.bf16.msra.mxu0 %v9409_v60  ;;  %v10506_v54 = vpop.eup %10505  ;;  %v10460_v38 = vld [vmem:[#allocation14 + $0xd88] sm:$0xf0] }
 0x404   :  { %v6512_v24 = vpack.c.bf16 %v10506_v54, %v10504_v42  ;;  %v9633_v60 = vor.u32 %v10460_v38, %v9632_v52  ;;  %v6172_v27 = vpop.f32.mrf.mxu2  ;;  %v3399_v42 = vperm.slane %v11198_v7, 4 }
 0x405   :  { %v10508_v39 = vpop.eup %10507  ;;  %v6186_v53 = vpop.f32.mrf.mxu3 }
 0x406   :  { %6520 = vst [vmem:[#allocation17 + $0x8] sm:$0xff] %v6512_v24  ;;  %v6171_v35 = vadd.f32 %v6170_v17, %v3399_v42  ;;  %v6173_v4 = vadd.f32 %v6172_v27, %v3399_v42 }
 0x407   :  { %6430 = vmatpush.bf16.msrb.mxu1 %v8709_v47  ;;  %6472 = vmatpush.bf16.msra.mxu0 %v9381_v45  ;;  %v9492_v47 = vld [vmem:[#allocation14 + $0xc58] sm:$0xf] }
 0x408   :  { %v10510_v36 = vpop.eup %10509  ;;  %v6187_v8 = vadd.f32 %v6186_v53, %v6173_v4 }
 0x409   :  { %v6516_v20 = vpack.c.bf16 %v10510_v36, %v10508_v39 }
 0x40b   :  { %6431 = vmatpush.bf16.msrb.mxu1 %v8681_v40  ;;  %6473 = vmatpush.bf16.msra.mxu0 %v9353_v6  ;;  %6524 = vst [vmem:[#allocation17 + $0x24] sm:$0xff] %v6516_v20  ;;  %v6200_v40 = vpop.f32.mrf.mxu0 }
 0x40c   :  { %v6226_v33 = vpop.f32.mrf.mxu2 }
 0x40d   :  { %v6240_v6 = vpop.f32.mrf.mxu3 }
 0x40f   :  { %6432 = vmatpush.bf16.msrb.mxu1 %v8653_v49  ;;  %6474 = vmatpush.bf16.msra.mxu0 %v9325_v29  ;;  %v6185_v29 = vadd.f32 %v6184_v26, %v6171_v35 }
 0x411   :  { %v6199_v22 = vadd.f32 %v6198_v15, %v6185_v29 }
 0x413   :  { %6433 = vmatpush.bf16.msrb.mxu1 %v8625_v44  ;;  %6475 = vmatpush.bf16.msra.mxu0 %v9297_v3 }
 0x414   :  { %v6228_v1 = vpop.f32.mrf.mxu2 }
 0x415   :  { %v6242_v57 = vpop.f32.mrf.mxu3 }
 0x417   :  { %6434 = vmatpush.bf16.msrb.mxu1 %v8597_v9  ;;  %6476 = vmatpush.bf16.msra.mxu0 %v9269_v62  ;;  %v6212_v28 = vpop.f32.mrf.mxu1  ;;  %v6254_v25 = vpop.f32.mrf.mxu0  ;;  %v6201_v9 = vadd.f32 %v6200_v40, %v6187_v8 }
 0x418   :  { %v6213_v44 = vadd.f32 %v6212_v28, %v6199_v22 }
 0x41a   :  { %6435 = vmatmul.bf16.vlgmr.msrb.gmra.mxu1 %v11043_v32  ;;  %6477 = vmatmul.bf16.vlgmr.msra.gmra.mxu0 %v11063_v10  ;;  %v9521_v32 = vor.u32 %v10432_v5, %v9520_v30  ;;  %v10425_v10 = vld [vmem:[#allocation14 + $0xc70] sm:$0xf0]  ;;  %v6227_v50 = vadd.f32 %v6226_v33, %v6213_v44 }
 0x41b   :  { %6483 = vmatpush.bf16.msra.mxu1 %v9689_v58  ;;  %v9493_v45 = vor.u32 %v10425_v10, %v9492_v47 }
 0x41c   :  { %v6282_v43 = vpop.f32.mrf.mxu2  ;;  %v6241_v58 = vadd.f32 %v6240_v6, %v6227_v50 }
 0x41d   :  { %v6296_v23 = vpop.f32.mrf.mxu3 }
 0x41e   :  { %v6255_v34 = vadd.f32 %v6254_v25, %v6241_v58 }
 0x41f   :  { %6484 = vmatpush.bf16.msra.mxu1 %v9661_v59  ;;  %v6214_v2 = vpop.f32.mrf.mxu1  ;;  %v6256_v41 = vpop.f32.mrf.mxu0 }
 0x420   :  { %v6215_v61 = vadd.f32 %v6214_v2, %v6201_v9 }
 0x422   :  { %v6229_v12 = vadd.f32 %v6228_v1, %v6215_v61  ;;  %v3401_v1 = vperm.slane %v11198_v7, 6 }
 0x423   :  { %6485 = vmatpush.bf16.msra.mxu1 %v9633_v60 }
 0x424   :  { %v6284_v37 = vpop.f32.mrf.mxu2  ;;  %v6243_v48 = vadd.f32 %v6242_v57, %v6229_v12 }
 0x425   :  { %v6298_v3 = vpop.f32.mrf.mxu3 }
 0x426   :  { %v6257_v47 = vadd.f32 %v6256_v41, %v6243_v48 }
 0x427   :  { %6486 = vmatpush.bf16.msra.mxu1 %v9605_v11 }
 0x42b   :  { %6487 = vmatpush.bf16.msra.mxu1 %v9577_v0 }
 0x42f   :  { %6488 = vmatpush.bf16.msra.mxu1 %v9549_v63 }
 0x433   :  { %6489 = vmatpush.bf16.msra.mxu1 %v9521_v32  ;;  %v6338_v46 = vpop.f32.mrf.mxu2 }
 0x437   :  { %6490 = vmatpush.bf16.msra.mxu1 %v9493_v45  ;;  %v6268_v56 = vpop.f32.mrf.mxu1  ;;  %v6310_v49 = vpop.f32.mrf.mxu0 }
 0x438   :  { %v6269_v21 = vadd.f32 %v6268_v56, %v6255_v34 }
 0x43a   :  { %6491 = vmatmul.bf16.vlgmr.msra.gmra.mxu1 %v11070_v19  ;;  %v3400_v19 = vperm.slane %v11198_v7, 5  ;;  %10511 = vtanh.f32 %v6269_v21 }
 0x43b   :  { %v6352_v13 = vpop.f32.mrf.mxu3  ;;  %v6340_v18 = vpop.f32.mrf.mxu2 }
 0x43c   :  { %v6283_v24 = vadd.f32 %v6282_v43, %v3400_v19  ;;  %v6285_v36 = vadd.f32 %v6284_v37, %v3400_v19 }
 0x43e   :  { %v6297_v51 = vadd.f32 %v6296_v23, %v6283_v24  ;;  %v6299_v62 = vadd.f32 %v6298_v3, %v6285_v36 }
 0x43f   :  { %v6270_v54 = vpop.f32.mrf.mxu1  ;;  %v6312_v39 = vpop.f32.mrf.mxu0 }
 0x440   :  { %v6311_v31 = vadd.f32 %v6310_v49, %v6297_v51  ;;  %v6313_v52 = vadd.f32 %v6312_v39, %v6299_v62  ;;  %v6271_v10 = vadd.f32 %v6270_v54, %v6257_v47  ;;  %v10512_v26 = vpop.eup %10511 }
 0x443   :  { %v6354_v5 = vpop.f32.mrf.mxu3 }
 0x453   :  { %v6394_v2 = vpop.f32.mrf.mxu2 }
 0x454   :  { %v6395_v43 = vadd.f32 %v6394_v2, %v3401_v1 }
 0x457   :  { %v6324_v55 = vpop.f32.mrf.mxu1  ;;  %v6366_v11 = vpop.f32.mrf.mxu0 }
 0x458   :  { %v6325_v14 = vadd.f32 %v6324_v55, %v6311_v31 }
 0x45a   :  { %v6339_v20 = vadd.f32 %v6338_v46, %v6325_v14 }
 0x45b   :  { %v6408_v25 = vpop.f32.mrf.mxu3  ;;  %v6396_v57 = vpop.f32.mrf.mxu2 }
 0x45c   :  { %v6353_v38 = vadd.f32 %v6352_v13, %v6339_v20  ;;  %v6409_v42 = vadd.f32 %v6408_v25, %v6395_v43  ;;  %v6397_v29 = vadd.f32 %v6396_v57, %v3401_v1 }
 0x45e   :  { %v6367_v0 = vadd.f32 %v6366_v11, %v6353_v38 }
 0x45f   :  { %v6326_v59 = vpop.f32.mrf.mxu1  ;;  %v6368_v45 = vpop.f32.mrf.mxu0 }
 0x460   :  { %v6327_v60 = vadd.f32 %v6326_v59, %v6313_v52 }
 0x462   :  { %v6341_v16 = vadd.f32 %v6340_v18, %v6327_v60 }
 0x463   :  { %v6410_v23 = vpop.f32.mrf.mxu3 }
 0x464   :  { %v6355_v32 = vadd.f32 %v6354_v5, %v6341_v16  ;;  %v6411_v37 = vadd.f32 %v6410_v23, %v6397_v29 }
 0x466   :  { %v6369_v17 = vadd.f32 %v6368_v45, %v6355_v32 }
 0x473   :  { %v6450_v35 = vpop.f32.mrf.mxu2 }
 0x477   :  { %v6380_v63 = vpop.f32.mrf.mxu1  ;;  %v6422_v56 = vpop.f32.mrf.mxu0 }
 0x478   :  { %v6381_v30 = vadd.f32 %v6380_v63, %v6367_v0  ;;  %v6423_v54 = vadd.f32 %v6422_v56, %v6409_v42 }
 0x47a   :  { %10513 = vtanh.f32 %v6381_v30 }
 0x47b   :  { %10515 = vtanh.f32 %v6271_v10  ;;  %v6464_v22 = vpop.f32.mrf.mxu3  ;;  %v6452_v7 = vpop.f32.mrf.mxu2 }
 0x47f   :  { %v6382_v15 = vpop.f32.mrf.mxu1  ;;  %v6424_v49 = vpop.f32.mrf.mxu0 }
 0x480   :  { %v10514_v27 = vpop.eup %10513  ;;  %v6383_v28 = vadd.f32 %v6382_v15, %v6369_v17  ;;  %v6425_v51 = vadd.f32 %v6424_v49, %v6411_v37 }
 0x481   :  { %v6513_v53 = vpack.c.bf16 %v10514_v27, %v10512_v26  ;;  %v10516_v33 = vpop.eup %10515 }
 0x482   :  { %10517 = vtanh.f32 %v6383_v28 }
 0x483   :  { %6521 = vst [vmem:[#allocation17 + $0x10] sm:$0xff] %v6513_v53  ;;  %v6466_v46 = vpop.f32.mrf.mxu3 }
 0x488   :  { %v10518_v40 = vpop.eup %10517 }
 0x489   :  { %v6517_v6 = vpack.c.bf16 %v10518_v40, %v10516_v33 }
 0x48b   :  { %6525 = vst [vmem:[#allocation17 + $0x2c] sm:$0xff] %v6517_v6 }
 0x497   :  { %v6436_v41 = vpop.f32.mrf.mxu1  ;;  %v6478_v31 = vpop.f32.mrf.mxu0 }
 0x498   :  { %v6437_v19 = vadd.f32 %v6436_v41, %v6423_v54 }
 0x49a   :  { %v6451_v24 = vadd.f32 %v6450_v35, %v6437_v19 }
 0x49c   :  { %v6465_v44 = vadd.f32 %v6464_v22, %v6451_v24 }
 0x49e   :  { %v6479_v4 = vadd.f32 %v6478_v31, %v6465_v44 }
 0x49f   :  { %v6438_v55 = vpop.f32.mrf.mxu1  ;;  %v6480_v36 = vpop.f32.mrf.mxu0 }
 0x4a0   :  { %v6439_v3 = vadd.f32 %v6438_v55, %v6425_v51 }
 0x4a2   :  { %v6453_v14 = vadd.f32 %v6452_v7, %v6439_v3 }
 0x4a4   :  { %v6467_v39 = vadd.f32 %v6466_v46, %v6453_v14 }
 0x4a6   :  { %v6481_v9 = vadd.f32 %v6480_v36, %v6467_v39 }
 0x4b7   :  { %v6492_v8 = vpop.f32.mrf.mxu1 }
 0x4b8   :  { %v6493_v50 = vadd.f32 %v6492_v8, %v6479_v4 }
 0x4ba   :  { %10519 = vtanh.f32 %v6493_v50 }
 0x4bf   :  { %v6494_v62 = vpop.f32.mrf.mxu1 }
 0x4c0   :  { %v10520_v20 = vpop.eup %10519  ;;  %v6495_v58 = vadd.f32 %v6494_v62, %v6481_v9 }
 0x4c1   :  { %v6514_v61 = vpack.c.bf16 %v10520_v20, %v10520_v20 }
 0x4c2   :  { %10521 = vtanh.f32 %v6495_v58 }
 0x4c3   :  { %6522 = vst [vmem:[#allocation17 + $0x18] sm:$0xf] %v6514_v61 }
 0x4c8   :  { %v10522_v13 = vpop.eup %10521 }
 0x4c9   :  { %v6518_v59 = vpack.c.bf16 %v10522_v13, %v10522_v13 }
 0x4cb   :  { %6526 = vst [vmem:[#allocation17 + $0x34] sm:$0xf] %v6518_v59 }
 0x4cc   :  { %6539 = dma.vmem_to_hbm [thread:$0]  %s6532_s8, 896, %s6534_s16, [#allocation4], %s10787_s12, %s10787_s12, %s10788_s13  }
 0x4cd   :  { %10775 = dma.done.wait [#allocation4], 896  }
 0x4ce   :  { %10776 = vsyncadd [#allocation4], 4294966400 }
 0x4cf   :  { %6544 = vsyncpa [#allocation3], 1 }
 0x4d0   :  { %6545 = vsyncpa [#allocation6], 1 }
 0x4d1   :  { %6546 = vsyncpa [#allocation9], 1 }
 0x4d2   :  { %6547 = vsyncpa [#allocation12], 1 }
 0x4d3   :  { %6548 = vsyncpa [#allocation15], 1 }
 0x4d4   :  { %6549 = vsyncpa [#allocation4], 1 }

</bundles_post_ra>
